<compile_context>
chip_gen: v7x
topology: tpu7x:2x2x1
jax: 0.10.0
libtpu: 0.0.40
codegen_flags: <defaults>
</compile_context>

<pallas_src>
import jax
import jax.numpy as jnp
import numpy as np
from jax import lax
from jax.experimental import pallas as pl
from jax.experimental.pallas import tpu as pltpu

H, W = 6, 40
HW = H * W            # 240
HIDDEN = 512          # self.hidden_size
EMB = 128             # self.num_embeddings


# ---------------------------------------------------------------------------
# Fused kernel: attention (scores + softmax + weighted context) + GRU cell.
# One grid step = one batch element.  GRU weights use constant index maps, so
# they are DMA'd once and stay resident in VMEM across the whole grid.
# ---------------------------------------------------------------------------
def fused_attention_gru_kernel(cf_ref, cfo_ref, hcol_ref, hrow_ref, emb_ref,
                               ws_ref, wctx_ref, wemb_ref, whh_ref,
                               bih_ref, bhh_ref,
                               alpha_ref, hid_ref):
    C = HIDDEN
    cf = cf_ref[0]            # (C, HW)   conv_feats, channels on sublanes
    cfo = cfo_ref[0]          # (C, HW)   conv_feats_origin
    hcol = hcol_ref[0]        # (C, 1)    prev_hidden as a column (lane broadcast)
    hrow = hrow_ref[0]        # (1, C)    prev_hidden as a row (for the GRU)
    emb = emb_ref[0]          # (1, EMB)  cur_embeddings
    ws = ws_ref[...]          # (1, C)    score weight

    # ---- attention scores: MXU (1,C) @ (C,HW) -> (1,HW) ---------------------
    t = jnp.tanh(cf + hcol)                                     # VPU/EUP
    e = jnp.dot(ws, t, preferred_element_type=jnp.float32)      # (1, HW)

    # ---- softmax over the spatial (lane) axis -------------------------------
    m = jnp.max(e, axis=1, keepdims=True)                       # (1, 1)
    p = jnp.exp(e - m)                                          # (1, HW)
    s = jnp.sum(p, axis=1, keepdims=True)                       # (1, 1)
    alpha = p / s                                               # (1, HW)
    alpha_ref[...] = alpha[None]                                # lane-dense store

    # ---- weighted context: contract HW of alpha(1,HW) with cfo(C,HW) -> (1,C)
    ctx = lax.dot_general(alpha, cfo, (((1,), (1,)), ((), ())),
                          preferred_element_type=jnp.float32)   # (1, C)

    # ---- GRU cell (PyTorch gate order r, z, n); bf16 weights, f32 accum -----
    ctx_bf = ctx.astype(jnp.bfloat16)
    emb_bf = emb.astype(jnp.bfloat16)
    h_bf = hrow.astype(jnp.bfloat16)

    gi = (jnp.dot(ctx_bf, wctx_ref[...], preferred_element_type=jnp.float32)
          + jnp.dot(emb_bf, wemb_ref[...], preferred_element_type=jnp.float32)
          + bih_ref[...])                                       # (1, 3C)
    gh = (jnp.dot(h_bf, whh_ref[...], preferred_element_type=jnp.float32)
          + bhh_ref[...])                                       # (1, 3C)

    r = jax.nn.sigmoid(gi[:, :C] + gh[:, :C])
    z = jax.nn.sigmoid(gi[:, C:2 * C] + gh[:, C:2 * C])
    n = jnp.tanh(gi[:, 2 * C:] + r * gh[:, 2 * C:])
    h_new = (1.0 - z) * n + z * hrow                            # (1, C) f32
    hid_ref[...] = h_new[None]


# ---------------------------------------------------------------------------
# Wrapper: layout plumbing only (free reshapes, no big transposes).
# ---------------------------------------------------------------------------
def attention_cell_forward(kparams, prev_hidden, conv_feats, conv_feats_origin,
                           cur_embeddings):
    nB, C = prev_hidden.shape
    assert C == HIDDEN

    cf = conv_feats.reshape(nB, C, HW)            # NCHW -> (nB, C, HW): free
    cfo = conv_feats_origin.reshape(nB, C, HW)
    hcol = prev_hidden.reshape(nB, C, 1)
    hrow = prev_hidden.reshape(nB, 1, C)
    emb = cur_embeddings.reshape(nB, 1, EMB)

    alpha3, hid3 = pl.pallas_call(
        fused_attention_gru_kernel,
        grid=(nB,),
        in_specs=[
            pl.BlockSpec((1, C, HW), lambda b: (b, 0, 0)),    # conv_feats
            pl.BlockSpec((1, C, HW), lambda b: (b, 0, 0)),    # conv_feats_origin
            pl.BlockSpec((1, C, 1), lambda b: (b, 0, 0)),     # prev_hidden (col)
            pl.BlockSpec((1, 1, C), lambda b: (b, 0, 0)),     # prev_hidden (row)
            pl.BlockSpec((1, 1, EMB), lambda b: (b, 0, 0)),   # cur_embeddings
            pl.BlockSpec((1, C), lambda b: (0, 0)),           # w_score
            pl.BlockSpec((C, 3 * C), lambda b: (0, 0)),       # W_ih[:, :C]^T  bf16
            pl.BlockSpec((EMB, 3 * C), lambda b: (0, 0)),     # W_ih[:, C:]^T  bf16
            pl.BlockSpec((C, 3 * C), lambda b: (0, 0)),       # W_hh^T         bf16
            pl.BlockSpec((1, 3 * C), lambda b: (0, 0)),       # b_ih
            pl.BlockSpec((1, 3 * C), lambda b: (0, 0)),       # b_hh
        ],
        out_specs=(
            pl.BlockSpec((1, 1, HW), lambda b: (b, 0, 0)),    # alpha (lane-dense)
            pl.BlockSpec((1, 1, C), lambda b: (b, 0, 0)),     # cur_hidden
        ),
        out_shape=(
            jax.ShapeDtypeStruct((nB, 1, HW), jnp.float32),
            jax.ShapeDtypeStruct((nB, 1, C), jnp.float32),
        ),
        compiler_params=pltpu.CompilerParams(
            dimension_semantics=("parallel",),
            vmem_limit_bytes=32 * 1024 * 1024,   # headroom on v5e's 16 MiB default
        ),
    )(cf, cfo, hcol, hrow, emb,
      kparams["w_score"], kparams["w_ih_ctx_t"], kparams["w_ih_emb_t"],
      kparams["w_hh_t"], kparams["b_ih"], kparams["b_hh"])

    alpha = alpha3[:, 0, :].T          # (HW, nB), as the PyTorch module returns
    cur_hidden = hid3[:, 0, :]         # (nB, C)
    return cur_hidden, alpha


# ---------------------------------------------------------------------------
# Parameters: PyTorch-style f32 master params + one-time kernel repack (bf16).
# ---------------------------------------------------------------------------
def init_params(key):
    ks = jax.random.split(key, 5)
    b_lin = 1.0 / np.sqrt(HIDDEN)     # nn.Linear(512, 1) default init
    b_gru = 1.0 / np.sqrt(HIDDEN)     # nn.GRUCell default init
    return {
        "w_score": jax.random.uniform(ks[0], (1, HIDDEN), jnp.float32,
                                      -b_lin, b_lin),
        "w_ih": jax.random.uniform(ks[1], (3 * HIDDEN, HIDDEN + EMB),
                                   jnp.float32, -b_gru, b_gru),
        "w_hh": jax.random.uniform(ks[2], (3 * HIDDEN, HIDDEN),
                                   jnp.float32, -b_gru, b_gru),
        "b_ih": jax.random.uniform(ks[3], (3 * HIDDEN,), jnp.float32,
                                   -b_gru, b_gru),
        "b_hh": jax.random.uniform(ks[4], (3 * HIDDEN,), jnp.float32,
                                   -b_gru, b_gru),
    }


def prepare_kernel_params(params):
    # One-time repack (done outside the hot path): split W_ih by input
    # (context / embedding), transpose to (in, 3H), cast GRU weights to bf16.
    return {
        "w_score": params["w_score"],                                     # (1, C)
        "w_ih_ctx_t": params["w_ih"][:, :HIDDEN].T.astype(jnp.bfloat16),  # (C, 3C)
        "w_ih_emb_t": params["w_ih"][:, HIDDEN:].T.astype(jnp.bfloat16),  # (EMB, 3C)
        "w_hh_t": params["w_hh"].T.astype(jnp.bfloat16),                  # (C, 3C)
        "b_ih": params["b_ih"].reshape(1, 3 * HIDDEN),
        "b_hh": params["b_hh"].reshape(1, 3 * HIDDEN),
    }


# ---------------------------------------------------------------------------
# Pure-JAX f32 reference of the PyTorch forward (for correctness check).
# ---------------------------------------------------------------------------
def reference_forward(params, prev_hidden, conv_feats, conv_feats_origin,
                      cur_embeddings):
    nB, C = prev_hidden.shape
    cf = conv_feats.reshape(nB, C, HW)
    cfo = conv_feats_origin.reshape(nB, C, HW)
    e = jnp.einsum("c,bcs->sb", params["w_score"][0],
                   jnp.tanh(cf + prev_hidden[:, :, None]))      # (HW, nB)
    alpha = jax.nn.softmax(e, axis=0)                           # (HW, nB)
    context = jnp.einsum("bcs,sb->bc", cfo, alpha)              # (nB, C)
    x = jnp.concatenate([context, cur_embeddings], axis=1)      # (nB, C + EMB)
    gi = x @ params["w_ih"].T + params["b_ih"]
    gh = prev_hidden @ params["w_hh"].T + params["b_hh"]
    r = jax.nn.sigmoid(gi[:, :C] + gh[:, :C])
    z = jax.nn.sigmoid(gi[:, C:2 * C] + gh[:, C:2 * C])
    n = jnp.tanh(gi[:, 2 * C:] + r * gh[:, 2 * C:])
    h_new = (1.0 - z) * n + z * prev_hidden
    return h_new, alpha


if __name__ == "__main__":
    key = jax.random.PRNGKey(0)
    kp, k1, k2, k3, k4 = jax.random.split(key, 5)

    params = init_params(kp)
    kparams = prepare_kernel_params(params)

    nB = 2
    prev_hidden = jax.random.normal(k1, (nB, HIDDEN), jnp.float32) * 0.1
    conv_feats = jax.random.normal(k2, (nB, HIDDEN, H, W), jnp.float32) * 0.1
    conv_feats_origin = jax.random.normal(k3, (nB, HIDDEN, H, W), jnp.float32) * 0.1
    cur_embeddings = jax.random.normal(k4, (nB, EMB), jnp.float32) * 0.1

    fwd = jax.jit(attention_cell_forward)
    cur_hidden, alpha = fwd(kparams, prev_hidden, conv_feats,
                            conv_feats_origin, cur_embeddings)
    cur_hidden = jax.block_until_ready(cur_hidden)
    alpha = jax.block_until_ready(alpha)

    # correctness check against the f32 pure-JAX reference of the PyTorch math
    ref_hidden, ref_alpha = reference_forward(
        params, prev_hidden, conv_feats, conv_feats_origin, cur_embeddings)
    assert cur_hidden.shape == (nB, HIDDEN)
    assert alpha.shape == (HW, nB)
    err_h = float(jnp.max(jnp.abs(cur_hidden - ref_hidden)))
    err_a = float(jnp.max(jnp.abs(alpha - ref_alpha)))
    assert err_h < 2e-2 and err_a < 2e-2, (err_h, err_a)

    # TODO(synk): self.conv / self.bn / self.relu exist in __init__ but are
    # unused in forward(), so they are intentionally not implemented.
    print("KERNEL_OK")
</pallas_src>

<mosaic_0001>
module attributes {stable_mosaic.version = 11 : i64} {
  func.func @fused_attention_gru_kernel(%arg0: i32, %arg1: memref<1x512x240xf32, #tpu.memory_space<vmem>>, %arg2: memref<1x512x240xf32, #tpu.memory_space<vmem>>, %arg3: memref<1x512x1xf32, #tpu.memory_space<vmem>>, %arg4: memref<1x1x512xf32, #tpu.memory_space<vmem>>, %arg5: memref<1x1x128xf32, #tpu.memory_space<vmem>>, %arg6: memref<1x512xf32, #tpu.memory_space<vmem>>, %arg7: memref<512x1536xbf16, #tpu.memory_space<vmem>>, %arg8: memref<128x1536xbf16, #tpu.memory_space<vmem>>, %arg9: memref<512x1536xbf16, #tpu.memory_space<vmem>>, %arg10: memref<1x1536xf32, #tpu.memory_space<vmem>>, %arg11: memref<1x1536xf32, #tpu.memory_space<vmem>>, %arg12: memref<1x1x240xf32, #tpu.memory_space<vmem>>, %arg13: memref<1x1x512xf32, #tpu.memory_space<vmem>>) attributes {dimension_semantics = [#tpu.dimension_semantics<parallel>], iteration_bounds = array<i64: 2>, scalar_prefetch = 0 : i64, scratch_operands = 0 : i64, tpu.core_type = #tpu.core_type<tc>, window_params = [{transform_indices = @transform_0, window_bounds = array<i64: 1, 512, 240>}, {transform_indices = @transform_1, window_bounds = array<i64: 1, 512, 240>}, {transform_indices = @transform_2, window_bounds = array<i64: 1, 512, 1>}, {transform_indices = @transform_3, window_bounds = array<i64: 1, 1, 512>}, {transform_indices = @transform_4, window_bounds = array<i64: 1, 1, 128>}, {pipeline_mode = #tpu.pipeline_mode<synchronous>, transform_indices = @transform_5, window_bounds = array<i64: 1, 512>}, {pipeline_mode = #tpu.pipeline_mode<synchronous>, transform_indices = @transform_6, window_bounds = array<i64: 512, 1536>}, {pipeline_mode = #tpu.pipeline_mode<synchronous>, transform_indices = @transform_7, window_bounds = array<i64: 128, 1536>}, {pipeline_mode = #tpu.pipeline_mode<synchronous>, transform_indices = @transform_8, window_bounds = array<i64: 512, 1536>}, {pipeline_mode = #tpu.pipeline_mode<synchronous>, transform_indices = @transform_9, window_bounds = array<i64: 1, 1536>}, {pipeline_mode = #tpu.pipeline_mode<synchronous>, transform_indices = @transform_10, window_bounds = array<i64: 1, 1536>}, {transform_indices = @transform_11, window_bounds = array<i64: 1, 1, 240>}, {transform_indices = @transform_12, window_bounds = array<i64: 1, 1, 512>}]} {
    %c0 = arith.constant 0 : index
    %c0_0 = arith.constant 0 : index
    %c0_1 = arith.constant 0 : index
    %0 = vector.load %arg1[%c0, %c0_0, %c0_1] : memref<1x512x240xf32, #tpu.memory_space<vmem>>, vector<1x512x240xf32>
    %1 = vector.shape_cast %0 : vector<1x512x240xf32> to vector<512x240xf32>
    %c0_2 = arith.constant 0 : index
    %c0_3 = arith.constant 0 : index
    %c0_4 = arith.constant 0 : index
    %2 = vector.load %arg2[%c0_2, %c0_3, %c0_4] : memref<1x512x240xf32, #tpu.memory_space<vmem>>, vector<1x512x240xf32>
    %3 = vector.shape_cast %2 : vector<1x512x240xf32> to vector<512x240xf32>
    %c0_5 = arith.constant 0 : index
    %c0_6 = arith.constant 0 : index
    %c0_7 = arith.constant 0 : index
    %4 = vector.load %arg3[%c0_5, %c0_6, %c0_7] : memref<1x512x1xf32, #tpu.memory_space<vmem>>, vector<1x512x1xf32>
    %5 = vector.shape_cast %4 : vector<1x512x1xf32> to vector<512x1xf32>
    %c0_8 = arith.constant 0 : index
    %c0_9 = arith.constant 0 : index
    %c0_10 = arith.constant 0 : index
    %6 = vector.load %arg4[%c0_8, %c0_9, %c0_10] : memref<1x1x512xf32, #tpu.memory_space<vmem>>, vector<1x1x512xf32>
    %7 = vector.shape_cast %6 : vector<1x1x512xf32> to vector<1x512xf32>
    %c0_11 = arith.constant 0 : index
    %c0_12 = arith.constant 0 : index
    %c0_13 = arith.constant 0 : index
    %8 = vector.load %arg5[%c0_11, %c0_12, %c0_13] : memref<1x1x128xf32, #tpu.memory_space<vmem>>, vector<1x1x128xf32>
    %9 = vector.shape_cast %8 : vector<1x1x128xf32> to vector<1x128xf32>
    %c0_14 = arith.constant 0 : index
    %c0_15 = arith.constant 0 : index
    %10 = vector.load %arg6[%c0_14, %c0_15] : memref<1x512xf32, #tpu.memory_space<vmem>>, vector<1x512xf32>
    %11 = vector.broadcast %5 : vector<512x1xf32> to vector<512x240xf32>
    %12 = arith.addf %1, %11 : vector<512x240xf32>
    %13 = math.tanh %12 : vector<512x240xf32>
    %cst = arith.constant dense<0.000000e+00> : vector<1x240xf32>
    %14 = tpu.matmul %10, %13, %cst {dimension_numbers = #tpu.dot_dimension_numbers<[1], [0], [0], [1], [0, 0, 1, 1], [], []>} : vector<1x512xf32>, vector<512x240xf32>, vector<1x240xf32> -> vector<1x240xf32>
    %cst_16 = arith.constant dense<0xFF800000> : vector<1xf32>
    %15 = vector.multi_reduction <maximumf>, %14, %cst_16 [1] : vector<1x240xf32> to vector<1xf32>
    %16 = vector.shape_cast %15 : vector<1xf32> to vector<1x1xf32>
    %17 = vector.broadcast %16 : vector<1x1xf32> to vector<1x240xf32>
    %18 = arith.subf %14, %17 : vector<1x240xf32>
    %19 = math.exp %18 : vector<1x240xf32>
    %cst_17 = arith.constant dense<0.000000e+00> : vector<1xf32>
    %20 = vector.multi_reduction <add>, %19, %cst_17 [1] : vector<1x240xf32> to vector<1xf32>
    %21 = vector.shape_cast %20 : vector<1xf32> to vector<1x1xf32>
    %22 = vector.broadcast %21 : vector<1x1xf32> to vector<1x240xf32>
    %23 = arith.divf %19, %22 : vector<1x240xf32>
    %24 = vector.shape_cast %23 : vector<1x240xf32> to vector<1x1x240xf32>
    %c0_18 = arith.constant 0 : index
    %c0_19 = arith.constant 0 : index
    %c0_20 = arith.constant 0 : index
    %25 = vector.load %arg12[%c0_18, %c0_19, %c0_20] : memref<1x1x240xf32, #tpu.memory_space<vmem>>, vector<1x1x240xf32>
    tpu.vector_store %arg12[%c0_18, %c0_19, %c0_20], %24 {strides = array<i32>} : memref<1x1x240xf32, #tpu.memory_space<vmem>>, vector<1x1x240xf32>,
    %cst_21 = arith.constant dense<0.000000e+00> : vector<1x512xf32>
    %26 = tpu.matmul %23, %3, %cst_21 {dimension_numbers = #tpu.dot_dimension_numbers<[1], [1], [0], [0], [0, 0, 1, 0], [], []>} : vector<1x240xf32>, vector<512x240xf32>, vector<1x512xf32> -> vector<1x512xf32>
    %27 = arith.truncf %26 : vector<1x512xf32> to vector<1x512xbf16>
    %28 = arith.truncf %9 : vector<1x128xf32> to vector<1x128xbf16>
    %29 = arith.truncf %7 : vector<1x512xf32> to vector<1x512xbf16>
    %c0_22 = arith.constant 0 : index
    %c0_23 = arith.constant 0 : index
    %30 = vector.load %arg7[%c0_22, %c0_23] : memref<512x1536xbf16, #tpu.memory_space<vmem>>, vector<512x1536xbf16>
    %cst_24 = arith.constant dense<0.000000e+00> : vector<1x1536xf32>
    %31 = tpu.matmul %27, %30, %cst_24 {dimension_numbers = #tpu.dot_dimension_numbers<[1], [0], [0], [1], [0, 0, 1, 1], [], []>} : vector<1x512xbf16>, vector<512x1536xbf16>, vector<1x1536xf32> -> vector<1x1536xf32>
    %c0_25 = arith.constant 0 : index
    %c0_26 = arith.constant 0 : index
    %32 = vector.load %arg8[%c0_25, %c0_26] : memref<128x1536xbf16, #tpu.memory_space<vmem>>, vector<128x1536xbf16>
    %cst_27 = arith.constant dense<0.000000e+00> : vector<1x1536xf32>
    %33 = tpu.matmul %28, %32, %cst_27 {dimension_numbers = #tpu.dot_dimension_numbers<[1], [0], [0], [1], [0, 0, 1, 1], [], []>} : vector<1x128xbf16>, vector<128x1536xbf16>, vector<1x1536xf32> -> vector<1x1536xf32>
    %34 = arith.addf %31, %33 : vector<1x1536xf32>
    %c0_28 = arith.constant 0 : index
    %c0_29 = arith.constant 0 : index
    %35 = vector.load %arg10[%c0_28, %c0_29] : memref<1x1536xf32, #tpu.memory_space<vmem>>, vector<1x1536xf32>
    %36 = arith.addf %34, %35 : vector<1x1536xf32>
    %c0_30 = arith.constant 0 : index
    %c0_31 = arith.constant 0 : index
    %37 = vector.load %arg9[%c0_30, %c0_31] : memref<512x1536xbf16, #tpu.memory_space<vmem>>, vector<512x1536xbf16>
    %cst_32 = arith.constant dense<0.000000e+00> : vector<1x1536xf32>
    %38 = tpu.matmul %29, %37, %cst_32 {dimension_numbers = #tpu.dot_dimension_numbers<[1], [0], [0], [1], [0, 0, 1, 1], [], []>} : vector<1x512xbf16>, vector<512x1536xbf16>, vector<1x1536xf32> -> vector<1x1536xf32>
    %c0_33 = arith.constant 0 : index
    %c0_34 = arith.constant 0 : index
    %39 = vector.load %arg11[%c0_33, %c0_34] : memref<1x1536xf32, #tpu.memory_space<vmem>>, vector<1x1536xf32>
    %40 = arith.addf %38, %39 : vector<1x1536xf32>
    %41 = vector.extract_strided_slice %36 {offsets = [0, 0], sizes = [1, 512], strides = [1, 1]} : vector<1x1536xf32> to vector<1x512xf32>
    %42 = vector.extract_strided_slice %40 {offsets = [0, 0], sizes = [1, 512], strides = [1, 1]} : vector<1x1536xf32> to vector<1x512xf32>
    %43 = arith.addf %41, %42 : vector<1x512xf32>
    %44 = arith.negf %43 : vector<1x512xf32>
    %45 = math.exp %44 : vector<1x512xf32>
    %cst_35 = arith.constant 1.000000e+00 : f32
    %46 = vector.broadcast %cst_35 : f32 to vector<1x512xf32>
    %47 = arith.addf %46, %45 : vector<1x512xf32>
    %48 = arith.divf %46, %47 : vector<1x512xf32>
    %49 = vector.extract_strided_slice %36 {offsets = [0, 512], sizes = [1, 512], strides = [1, 1]} : vector<1x1536xf32> to vector<1x512xf32>
    %50 = vector.extract_strided_slice %40 {offsets = [0, 512], sizes = [1, 512], strides = [1, 1]} : vector<1x1536xf32> to vector<1x512xf32>
    %51 = arith.addf %49, %50 : vector<1x512xf32>
    %52 = arith.negf %51 : vector<1x512xf32>
    %53 = math.exp %52 : vector<1x512xf32>
    %cst_36 = arith.constant 1.000000e+00 : f32
    %54 = vector.broadcast %cst_36 : f32 to vector<1x512xf32>
    %55 = arith.addf %54, %53 : vector<1x512xf32>
    %56 = arith.divf %54, %55 : vector<1x512xf32>
    %57 = vector.extract_strided_slice %36 {offsets = [0, 1024], sizes = [1, 512], strides = [1, 1]} : vector<1x1536xf32> to vector<1x512xf32>
    %58 = vector.extract_strided_slice %40 {offsets = [0, 1024], sizes = [1, 512], strides = [1, 1]} : vector<1x1536xf32> to vector<1x512xf32>
    %59 = arith.mulf %48, %58 : vector<1x512xf32>
    %60 = arith.addf %57, %59 : vector<1x512xf32>
    %61 = math.tanh %60 : vector<1x512xf32>
    %cst_37 = arith.constant 1.000000e+00 : f32
    %62 = vector.broadcast %cst_37 : f32 to vector<1x512xf32>
    %63 = arith.subf %62, %56 : vector<1x512xf32>
    %64 = arith.mulf %63, %61 : vector<1x512xf32>
    %65 = arith.mulf %56, %7 : vector<1x512xf32>
    %66 = arith.addf %64, %65 : vector<1x512xf32>
    %67 = vector.shape_cast %66 : vector<1x512xf32> to vector<1x1x512xf32>
    %c0_38 = arith.constant 0 : index
    %c0_39 = arith.constant 0 : index
    %c0_40 = arith.constant 0 : index
    %68 = vector.load %arg13[%c0_38, %c0_39, %c0_40] : memref<1x1x512xf32, #tpu.memory_space<vmem>>, vector<1x1x512xf32>
    tpu.vector_store %arg13[%c0_38, %c0_39, %c0_40], %67 {strides = array<i32>} : memref<1x1x512xf32, #tpu.memory_space<vmem>>, vector<1x1x512xf32>,
    return
  }
  func.func @transform_0(%arg0: i32) -> (i32, i32, i32) {
    %c0_i32 = arith.constant 0 : i32
    %c0_i32_0 = arith.constant 0 : i32
    %c0_i32_1 = arith.constant 0 : i32
    return %arg0, %c0_i32, %c0_i32_0 : i32, i32, i32
  }
  func.func @transform_1(%arg0: i32) -> (i32, i32, i32) {
    %c0_i32 = arith.constant 0 : i32
    %c0_i32_0 = arith.constant 0 : i32
    %c0_i32_1 = arith.constant 0 : i32
    return %arg0, %c0_i32, %c0_i32_0 : i32, i32, i32
  }
  func.func @transform_2(%arg0: i32) -> (i32, i32, i32) {
    %c0_i32 = arith.constant 0 : i32
    %c0_i32_0 = arith.constant 0 : i32
    %c0_i32_1 = arith.constant 0 : i32
    return %arg0, %c0_i32, %c0_i32_0 : i32, i32, i32
  }
  func.func @transform_3(%arg0: i32) -> (i32, i32, i32) {
    %c0_i32 = arith.constant 0 : i32
    %c0_i32_0 = arith.constant 0 : i32
    %c0_i32_1 = arith.constant 0 : i32
    return %arg0, %c0_i32, %c0_i32_0 : i32, i32, i32
  }
  func.func @transform_4(%arg0: i32) -> (i32, i32, i32) {
    %c0_i32 = arith.constant 0 : i32
    %c0_i32_0 = arith.constant 0 : i32
    %c0_i32_1 = arith.constant 0 : i32
    return %arg0, %c0_i32, %c0_i32_0 : i32, i32, i32
  }
  func.func @transform_5(%arg0: i32) -> (i32, i32) {
    %c0_i32 = arith.constant 0 : i32
    %c0_i32_0 = arith.constant 0 : i32
    %c0_i32_1 = arith.constant 0 : i32
    return %c0_i32, %c0_i32_0 : i32, i32
  }
  func.func @transform_6(%arg0: i32) -> (i32, i32) {
    %c0_i32 = arith.constant 0 : i32
    %c0_i32_0 = arith.constant 0 : i32
    %c0_i32_1 = arith.constant 0 : i32
    return %c0_i32, %c0_i32_0 : i32, i32
  }
  func.func @transform_7(%arg0: i32) -> (i32, i32) {
    %c0_i32 = arith.constant 0 : i32
    %c0_i32_0 = arith.constant 0 : i32
    %c0_i32_1 = arith.constant 0 : i32
    return %c0_i32, %c0_i32_0 : i32, i32
  }
  func.func @transform_8(%arg0: i32) -> (i32, i32) {
    %c0_i32 = arith.constant 0 : i32
    %c0_i32_0 = arith.constant 0 : i32
    %c0_i32_1 = arith.constant 0 : i32
    return %c0_i32, %c0_i32_0 : i32, i32
  }
  func.func @transform_9(%arg0: i32) -> (i32, i32) {
    %c0_i32 = arith.constant 0 : i32
    %c0_i32_0 = arith.constant 0 : i32
    %c0_i32_1 = arith.constant 0 : i32
    return %c0_i32, %c0_i32_0 : i32, i32
  }
  func.func @transform_10(%arg0: i32) -> (i32, i32) {
    %c0_i32 = arith.constant 0 : i32
    %c0_i32_0 = arith.constant 0 : i32
    %c0_i32_1 = arith.constant 0 : i32
    return %c0_i32, %c0_i32_0 : i32, i32
  }
  func.func @transform_11(%arg0: i32) -> (i32, i32, i32) {
    %c0_i32 = arith.constant 0 : i32
    %c0_i32_0 = arith.constant 0 : i32
    %c0_i32_1 = arith.constant 0 : i32
    return %arg0, %c0_i32, %c0_i32_0 : i32, i32, i32
  }
  func.func @transform_12(%arg0: i32) -> (i32, i32, i32) {
    %c0_i32 = arith.constant 0 : i32
    %c0_i32_0 = arith.constant 0 : i32
    %c0_i32_1 = arith.constant 0 : i32
    return %arg0, %c0_i32, %c0_i32_0 : i32, i32, i32
  }
}

</mosaic_0001>

<bundles_post_ra>
// kernel: attention_cell_forward.1
= control target key start
LH: loop header
LB: loop body
LE: loop exit
PB: predicated region body
PF: predicated region fallthrough
CT: control target
= control target key end

     0   :  { %s11788_s21 = smov 0   ;;  %s15124_s0 = inlined_call_operand.vmem [shape: f32[2,512,240], index: 0, kind: input, shape index: {}]   ;;  %s15125_s1 = inlined_call_operand.vmem [shape: f32[2,512,240], index: 1, kind: input, shape index: {}]   ;;  %s15126_s2 = inlined_call_operand.vmem [shape: f32[2,512,1], index: 2, kind: input, shape index: {}]   ;;  %s15127_s3 = inlined_call_operand.vmem [shape: f32[2,1,512], index: 3, kind: input, shape index: {}]   ;;  %s15128_s4 = inlined_call_operand.vmem [shape: f32[2,1,128], index: 4, kind: input, shape index: {}]   ;;  %s15129_s5 = inlined_call_operand.vmem [shape: f32[1,512], index: 5, kind: input, shape index: {}]   ;;  %s15130_s6 = inlined_call_operand.vmem [shape: bf16[512,1536], index: 6, kind: input, shape index: {}]   ;;  %s15131_s7 = inlined_call_operand.vmem [shape: bf16[128,1536], index: 7, kind: input, shape index: {}]   ;;  %s15132_s8 = inlined_call_operand.vmem [shape: bf16[512,1536], index: 8, kind: input, shape index: {}]   ;;  %s15133_s9 = inlined_call_operand.vmem [shape: f32[1,1536], index: 9, kind: input, shape index: {}]   ;;  %s15134_s10 = inlined_call_operand.vmem [shape: f32[1,1536], index: 10, kind: input, shape index: {}]   ;;  %s15135_s11 = inlined_call_operand.vmem [shape: f32[2,1,240], index: 11, kind: output, shape index: {0}]   ;;  %s15136_s12 = inlined_call_operand.vmem [shape: f32[2,1,512], index: 12, kind: output, shape index: {1}]  }
   0x1 LB: > { %s8767_s22 = sadd.s32 4294967295, %s11719_s21   ;;  %p8771_p0 = scmp.ge.s32.totalorder %s11719_s21, 1  ;;  %s11719_s21 = sphi %s11788_s21, %s23_s21  }
   0x2   : > { %p402_p1 = scmp.lt.s32.totalorder %s11719_s21, 3 }
   0x4   : > { %p403_p2 = pnand %p8771_p0, %p402_p1 }
   0x5   : > { %p464_p3 = scmp.lt.s32.totalorder (!%p403_p2), %s8767_s22, 1  ;;  %v11721_v0 = vmov (!%p403_p2), 0   ;;  %v1395_v43 = vlaneseq (!%p403_p2)  ;;  %v817_v48 = vld [vmem:[%s15129_s5] sm:$0xf] (!%p403_p2)  ;;  %vm1557_vm0 = vcmask (!%p403_p2), 1040384   ;;  %vm1559_vm1 = vcmask (!%p403_p2), 909312  }
   0x6   : > { %406 = sbr.rel (%p403_p2) target bundleno = 2194 (0x892), region = 64  ;;  %10113 = vset.pattern.permute.xlu1 (!%p403_p2), %v11721_v0  ;;  %10112 = vset.pattern.permute.xlu0 (!%p403_p2), %v11721_v0  ;;  %vm1601_vm2 = vcmask (!%p403_p2), 916480  }
   0x7   : > { %2960 = vmatprep.mubr.bf16.mxu1 (!%p403_p2), %v11721_v0  ;;  %v11852_v46 = vshrl.u32 (!%p403_p2), %v1395_v43, 7  ;;  %vm12057_vm3 = vmpackc.low (!%p403_p2), %vm1601_vm2, %vm1601_vm2  ;;  %vm1598_vm4 = vcmp.lt.s32.totalorder (!%p403_p2), %v1395_v43, 240  ;;  %vm8635_vm5 = vcmp.lt.s32.totalorder (!%p403_p2), %v1395_v43, 512 }
   0x9   : > { %v11855_v47 = vsub.s32 (!%p403_p2), 1, %v11852_v46 }
   0xb   : > { %v1402_v51 = vrot.slane (!%p403_p2), %v817_v48, %v11855_v47 }
   0xd   : > { %s15140_s22 = smov (!%p464_p3, %s8767_s22), 1  ;;  %1479 = vmatprep.mubr.f32.mxu0 %v1402_v51 }
   0xe   : > { %s9723_s23 = sshll.u32 %s15140_s22, 9  ;;  %s9721_s29 = sshll.u32 %s15140_s22, 10 }
   0xf   : > { %s11805_s26 = scalar_lea.vmem %s15126_s2, %s9723_s23  ;;  %s11887_s14 = scalar_lea.vmem %s15124_s0, %s9721_s29 }
  0x10   : > { %v753_v1 = vld [vmem:[%s11805_s26 + $0x10] sm:$0xff]  ;;  %v751_v2 = vld [vmem:[%s11805_s26] sm:$0xff]  ;;  %v754_v3 = vld [vmem:[%s11805_s26 + $0x18] sm:$0xff]  ;;  %s12050_s19 = scalar_lea.vmem %s15125_s1, %s9721_s29  ;;  %s8778_s30 = sshll.u32 %s15140_s22, 2 }
  0x11   : > { %830 = vperm.xlu1 %10113, %v753_v1   ;;  %820 = vperm.xlu0 %10112, %v751_v2   ;;  %v752_v4 = vld [vmem:[%s11805_s26 + $0x8] sm:$0xff]  ;;  %v755_v6 = vld [vmem:[%s11805_s26 + $0x20] sm:$0xff]  ;;  %v758_v7 = vld [vmem:[%s11805_s26 + $0x38] sm:$0xff]  ;;  %s482_s18 = scalar_lea.vmem %s15127_s3, %s8778_s30  ;;  %s493_s13 = scalar_lea.vmem %s15136_s12, %s8778_s30 }
  0x12   : > { %v756_v5 = vld [vmem:[%s11805_s26 + $0x28] sm:$0xff]  ;;  %v757_v8 = vld [vmem:[%s11805_s26 + $0x30] sm:$0xff]  ;;  %v759_v10 = vld [vmem:[%s11805_s26 + $0x40] sm:$0xff] }
  0x13   : > { %v760_v9 = vld [vmem:[%s11805_s26 + $0x48] sm:$0xff]  ;;  %v762_v11 = vld [vmem:[%s11805_s26 + $0x58] sm:$0xff]  ;;  %v761_v12 = vld [vmem:[%s11805_s26 + $0x50] sm:$0xff] }
  0x14   : > { %v764_v13 = vld [vmem:[%s11805_s26 + $0x68] sm:$0xff]  ;;  %v763_v14 = vld [vmem:[%s11805_s26 + $0x60] sm:$0xff]  ;;  %v766_v15 = vld [vmem:[%s11805_s26 + $0x78] sm:$0xff] }
  0x15   : > { %835 = vperm.xlu1 %10113, %v754_v3   ;;  %825 = vperm.xlu0 %10112, %v752_v4   ;;  %v765_v16 = vld [vmem:[%s11805_s26 + $0x70] sm:$0xff]  ;;  %v768_v17 = vld [vmem:[%s11805_s26 + $0x88] sm:$0xff]  ;;  %v767_v18 = vld [vmem:[%s11805_s26 + $0x80] sm:$0xff] }
  0x16   : > { %v770_v19 = vld [vmem:[%s11805_s26 + $0x98] sm:$0xff]  ;;  %v769_v20 = vld [vmem:[%s11805_s26 + $0x90] sm:$0xff]  ;;  %v772_v21 = vld [vmem:[%s11805_s26 + $0xa8] sm:$0xff] }
  0x17   : > { %v771_v22 = vld [vmem:[%s11805_s26 + $0xa0] sm:$0xff]  ;;  %v774_v23 = vld [vmem:[%s11805_s26 + $0xb8] sm:$0xff]  ;;  %v773_v24 = vld [vmem:[%s11805_s26 + $0xb0] sm:$0xff] }
  0x18   : > { %v776_v25 = vld [vmem:[%s11805_s26 + $0xc8] sm:$0xff]  ;;  %v775_v26 = vld [vmem:[%s11805_s26 + $0xc0] sm:$0xff]  ;;  %v778_v27 = vld [vmem:[%s11805_s26 + $0xd8] sm:$0xff] }
  0x19   : > { %845 = vperm.xlu1 %10113, %v756_v5   ;;  %840 = vperm.xlu0 %10112, %v755_v6   ;;  %v777_v28 = vld [vmem:[%s11805_s26 + $0xd0] sm:$0xff]  ;;  %v780_v29 = vld [vmem:[%s11805_s26 + $0xe8] sm:$0xff]  ;;  %v779_v30 = vld [vmem:[%s11805_s26 + $0xe0] sm:$0xff] }
  0x1a   : > { %v782_v31 = vld [vmem:[%s11805_s26 + $0xf8] sm:$0xff]  ;;  %v781_v32 = vld [vmem:[%s11805_s26 + $0xf0] sm:$0xff]  ;;  %v784_v33 = vld [vmem:[%s11805_s26 + $0x108] sm:$0xff] }
  0x1b   : > { %v783_v34 = vld [vmem:[%s11805_s26 + $0x100] sm:$0xff]  ;;  %v786_v35 = vld [vmem:[%s11805_s26 + $0x118] sm:$0xff]  ;;  %v785_v36 = vld [vmem:[%s11805_s26 + $0x110] sm:$0xff] }
  0x1c   : > { %v788_v37 = vld [vmem:[%s11805_s26 + $0x128] sm:$0xff]  ;;  %v787_v38 = vld [vmem:[%s11805_s26 + $0x120] sm:$0xff]  ;;  %v790_v39 = vld [vmem:[%s11805_s26 + $0x138] sm:$0xff] }
  0x1d   : > { %855 = vperm.xlu1 %10113, %v758_v7   ;;  %850 = vperm.xlu0 %10112, %v757_v8   ;;  %v789_v40 = vld [vmem:[%s11805_s26 + $0x130] sm:$0xff]  ;;  %v792_v41 = vld [vmem:[%s11805_s26 + $0x148] sm:$0xff]  ;;  %v791_v42 = vld [vmem:[%s11805_s26 + $0x140] sm:$0xff] }
  0x1e   : > { %v794_v44 = vld [vmem:[%s11805_s26 + $0x158] sm:$0xff]  ;;  %v793_v45 = vld [vmem:[%s11805_s26 + $0x150] sm:$0xff]  ;;  %v796_v49 = vld [vmem:[%s11805_s26 + $0x168] sm:$0xff] }
  0x1f   : > { %v795_v50 = vld [vmem:[%s11805_s26 + $0x160] sm:$0xff]  ;;  %v798_v52 = vld [vmem:[%s11805_s26 + $0x178] sm:$0xff]  ;;  %v797_v53 = vld [vmem:[%s11805_s26 + $0x170] sm:$0xff] }
  0x20   : > { %v800_v54 = vld [vmem:[%s11805_s26 + $0x188] sm:$0xff]  ;;  %v799_v55 = vld [vmem:[%s11805_s26 + $0x180] sm:$0xff]  ;;  %v802_v56 = vld [vmem:[%s11805_s26 + $0x198] sm:$0xff] }
  0x21   : > { %865 = vperm.xlu1 %10113, %v760_v9   ;;  %860 = vperm.xlu0 %10112, %v759_v10   ;;  %v801_v57 = vld [vmem:[%s11805_s26 + $0x190] sm:$0xff]  ;;  %v804_v58 = vld [vmem:[%s11805_s26 + $0x1a8] sm:$0xff]  ;;  %v803_v59 = vld [vmem:[%s11805_s26 + $0x1a0] sm:$0xff] }
  0x22   : > { %v806_v60 = vld [vmem:[%s11805_s26 + $0x1b8] sm:$0xff]  ;;  %v805_v61 = vld [vmem:[%s11805_s26 + $0x1b0] sm:$0xff]  ;;  %v808_v62 = vld [vmem:[%s11805_s26 + $0x1c8] sm:$0xff] }
  0x23   : > { %v807_v63 = vld [vmem:[%s11805_s26 + $0x1c0] sm:$0xff]  ;;  %v810_v1 = vld [vmem:[%s11805_s26 + $0x1d8] sm:$0xff]  ;;  %v809_v2 = vld [vmem:[%s11805_s26 + $0x1d0] sm:$0xff] }
  0x24   : > { %v812_v3 = vld [vmem:[%s11805_s26 + $0x1e8] sm:$0xff]  ;;  %v811_v4 = vld [vmem:[%s11805_s26 + $0x1e0] sm:$0xff]  ;;  %v814_v5 = vld [vmem:[%s11805_s26 + $0x1f8] sm:$0xff] }
  0x25   : > { %875 = vperm.xlu1 %10113, %v762_v11   ;;  %870 = vperm.xlu0 %10112, %v761_v12   ;;  %v813_v6 = vld [vmem:[%s11805_s26 + $0x1f0] sm:$0xff]  ;;  %v500_v7 = vld [vmem:[%s11887_s14 + $0x28] sm:$0xff]  ;;  %v495_v8 = vld [vmem:[%s11887_s14] sm:$0xff]  ;;  %s485_s26 = scalar_lea.vmem %s15128_s4, %s15140_s22 }
  0x26   : > { %v496_v11 = vld [vmem:[%s11887_s14 + $0x8] sm:$0xff]  ;;  %v497_v12 = vld [vmem:[%s11887_s14 + $0x10] sm:$0xff] }
  0x27   : > { %v512_v48 = vld [vmem:[%s11887_s14 + $0x88] sm:$0xff] }
  0x29   : > { %885 = vperm.xlu1 %10113, %v764_v13   ;;  %880 = vperm.xlu0 %10112, %v763_v14   ;;  %v498_v13 = vld [vmem:[%s11887_s14 + $0x18] sm:$0xff] }
  0x2d   : > { %895 = vperm.xlu1 %10113, %v766_v15   ;;  %890 = vperm.xlu0 %10112, %v765_v16   ;;  %v502_v15 = vld [vmem:[%s11887_s14 + $0x38] sm:$0xff]  ;;  %v499_v16 = vld [vmem:[%s11887_s14 + $0x20] sm:$0xff] }
  0x31   : > { %905 = vperm.xlu1 %10113, %v768_v17   ;;  %900 = vperm.xlu0 %10112, %v767_v18  }
  0x35   : > { %915 = vperm.xlu1 %10113, %v770_v19   ;;  %910 = vperm.xlu0 %10112, %v769_v20   ;;  %v501_v20 = vld [vmem:[%s11887_s14 + $0x30] sm:$0xff] }
  0x39   : > { %925 = vperm.xlu1 %10113, %v772_v21   ;;  %920 = vperm.xlu0 %10112, %v771_v22  }
  0x3d   : > { %935 = vperm.xlu1 %10113, %v774_v23   ;;  %930 = vperm.xlu0 %10112, %v773_v24   ;;  %v506_v23 = vld [vmem:[%s11887_s14 + $0x58] sm:$0xff] }
  0x41   : > { %945 = vperm.xlu1 %10113, %v776_v25   ;;  %940 = vperm.xlu0 %10112, %v775_v26   ;;  %v504_v25 = vld [vmem:[%s11887_s14 + $0x48] sm:$0xff] }
  0x45   : > { %955 = vperm.xlu1 %10113, %v778_v27   ;;  %950 = vperm.xlu0 %10112, %v777_v28   ;;  %v505_v27 = vld [vmem:[%s11887_s14 + $0x50] sm:$0xff] }
  0x49   : > { %965 = vperm.xlu1 %10113, %v780_v29   ;;  %960 = vperm.xlu0 %10112, %v779_v30  }
  0x4d   : > { %975 = vperm.xlu1 %10113, %v782_v31   ;;  %970 = vperm.xlu0 %10112, %v781_v32   ;;  %v503_v31 = vld [vmem:[%s11887_s14 + $0x40] sm:$0xff] }
  0x51   : > { %985 = vperm.xlu1 %10113, %v784_v33   ;;  %980 = vperm.xlu0 %10112, %v783_v34   ;;  %v510_v33 = vld [vmem:[%s11887_s14 + $0x78] sm:$0xff] }
  0x55   : > { %995 = vperm.xlu1 %10113, %v786_v35   ;;  %990 = vperm.xlu0 %10112, %v785_v36   ;;  %v508_v35 = vld [vmem:[%s11887_s14 + $0x68] sm:$0xff] }
  0x59   : > { %1005 = vperm.xlu1 %10113, %v788_v37   ;;  %1000 = vperm.xlu0 %10112, %v787_v38   ;;  %v509_v37 = vld [vmem:[%s11887_s14 + $0x70] sm:$0xff] }
  0x5d   : > { %1015 = vperm.xlu1 %10113, %v790_v39   ;;  %1010 = vperm.xlu0 %10112, %v789_v40  }
  0x61   : > { %1025 = vperm.xlu1 %10113, %v792_v41   ;;  %1020 = vperm.xlu0 %10112, %v791_v42   ;;  %v507_v41 = vld [vmem:[%s11887_s14 + $0x60] sm:$0xff] }
  0x65   : > { %1035 = vperm.xlu1 %10113, %v794_v44   ;;  %1030 = vperm.xlu0 %10112, %v793_v45   ;;  %v514_v44 = vld [vmem:[%s11887_s14 + $0x98] sm:$0xff] }
  0x69   : > { %1045 = vperm.xlu1 %10113, %v796_v49   ;;  %1040 = vperm.xlu0 %10112, %v795_v50   ;;  %v513_v50 = vld [vmem:[%s11887_s14 + $0x90] sm:$0xff] }
  0x6d   : > { %1055 = vperm.xlu1 %10113, %v798_v52   ;;  %1050 = vperm.xlu0 %10112, %v797_v53  }
  0x71   : > { %1065 = vperm.xlu1 %10113, %v800_v54   ;;  %1060 = vperm.xlu0 %10112, %v799_v55   ;;  %v511_v55 = vld [vmem:[%s11887_s14 + $0x80] sm:$0xff] }
  0x75   : > { %1075 = vperm.xlu1 %10113, %v802_v56   ;;  %1070 = vperm.xlu0 %10112, %v801_v57  }
  0x79   : > { %1085 = vperm.xlu1 %10113, %v804_v58   ;;  %1080 = vperm.xlu0 %10112, %v803_v59   ;;  %v518_v58 = vld [vmem:[%s11887_s14 + $0xb8] sm:$0xff] }
  0x7d   : > { %1095 = vperm.xlu1 %10113, %v806_v60   ;;  %1090 = vperm.xlu0 %10112, %v805_v61   ;;  %v516_v61 = vld [vmem:[%s11887_s14 + $0xa8] sm:$0xff] }
  0x81   : > { %1105 = vperm.xlu1 %10113, %v808_v62   ;;  %1100 = vperm.xlu0 %10112, %v807_v63  }
  0x85   : > { %1115 = vperm.xlu1 %10113, %v810_v1   ;;  %1110 = vperm.xlu0 %10112, %v809_v2   ;;  %v517_v1 = vld [vmem:[%s11887_s14 + $0xb0] sm:$0xff] }
  0x89   : > { %1125 = vperm.xlu1 %10113, %v812_v3   ;;  %1120 = vperm.xlu0 %10112, %v811_v4  }
  0x8d   : > { %1135 = vperm.xlu1 %10113, %v814_v5   ;;  %1130 = vperm.xlu0 %10112, %v813_v6   ;;  %v515_v6 = vld [vmem:[%s11887_s14 + $0xa0] sm:$0xff] }
  0x90   : > { %v831_v9 = vpop.permute.xlu1 %830  ;;  %v821_v10 = vpop.permute.xlu0 %820 }
  0x91   : > { %v1143_v14 = vadd.f32 %v831_v9, %v500_v7  ;;  %v1138_v17 = vadd.f32 %v821_v10, %v495_v8  ;;  %v1139_v18 = vadd.f32 %v821_v10, %v496_v11  ;;  %v1142_v28 = vadd.f32 %v831_v9, %v499_v16  ;;  %v522_v10 = vld [vmem:[%s11887_s14 + $0xd8] sm:$0xff] }
  0x93   : > { %11410 = vtanh.f32 %v1143_v14  ;;  %v520_v14 = vld [vmem:[%s11887_s14 + $0xc8] sm:$0xff] }
  0x94   : > { %v836_v19 = vpop.permute.xlu1 %835  ;;  %v826_v21 = vpop.permute.xlu0 %825  ;;  %11412 = vtanh.f32 %v1138_v17  ;;  %v521_v17 = vld [vmem:[%s11887_s14 + $0xd0] sm:$0xff] }
  0x95   : > { %v1140_v22 = vadd.f32 %v826_v21, %v497_v12  ;;  %v1141_v24 = vadd.f32 %v826_v21, %v498_v13  ;;  %v1145_v26 = vadd.f32 %v836_v19, %v502_v15  ;;  %11414 = vtanh.f32 %v1139_v18 }
  0x96   : > { %v1144_v32 = vadd.f32 %v836_v19, %v501_v20 }
  0x97   : > { %11416 = vtanh.f32 %v1140_v22 }
  0x98   : > { %v846_v29 = vpop.permute.xlu1 %845  ;;  %v841_v30 = vpop.permute.xlu0 %840  ;;  %11418 = vtanh.f32 %v1141_v24 }
  0x99   : > { %v1149_v34 = vadd.f32 %v846_v29, %v506_v23  ;;  %11420 = vtanh.f32 %v1145_v26  ;;  %v1147_v36 = vadd.f32 %v841_v30, %v504_v25  ;;  %v1148_v38 = vadd.f32 %v846_v29, %v505_v27  ;;  %v519_v23 = vld [vmem:[%s11887_s14 + $0xc0] sm:$0xff]  ;;  %v526_v26 = vld [vmem:[%s11887_s14 + $0xf8] sm:$0xff]  ;;  %v524_v29 = vld [vmem:[%s11887_s14 + $0xe8] sm:$0xff] }
  0x9a   : > { %11422 = vtanh.f32 %v1142_v28  ;;  %v1146_v42 = vadd.f32 %v841_v30, %v503_v31 }
  0x9b   : > { %11424 = vtanh.f32 %v1144_v32 }
  0x9c   : > { %v856_v39 = vpop.permute.xlu1 %855  ;;  %v851_v40 = vpop.permute.xlu0 %850  ;;  %11426 = vtanh.f32 %v1149_v34 }
  0x9d   : > { %v1153_v45 = vadd.f32 %v856_v39, %v510_v33  ;;  %11428 = vtanh.f32 %v1147_v36  ;;  %v1151_v49 = vadd.f32 %v851_v40, %v508_v35  ;;  %v11411_v51 = vpop.eup %11410  ;;  %v1152_v52 = vadd.f32 %v856_v39, %v509_v37  ;;  %v525_v33 = vld [vmem:[%s11887_s14 + $0xf0] sm:$0xff]  ;;  %v523_v39 = vld [vmem:[%s11887_s14 + $0xe0] sm:$0xff] }
  0x9e   : > { %11430 = vtanh.f32 %v1148_v38  ;;  %v11413_v56 = vpop.eup %11412  ;;  %v1150_v57 = vadd.f32 %v851_v40, %v507_v41 }
  0x9f   : > { %11432 = vtanh.f32 %v1146_v42  ;;  %v11415_v59 = vpop.eup %11414  ;;  %v530_v42 = vld [vmem:[%s11887_s14 + $0x118] sm:$0xff] }
  0xa0   : > { %v866_v53 = vpop.permute.xlu1 %865  ;;  %v861_v54 = vpop.permute.xlu0 %860  ;;  %11434 = vtanh.f32 %v1153_v45 }
  0xa1   : > { %v1157_v60 = vadd.f32 %v866_v53, %v514_v44  ;;  %v11417_v62 = vpop.eup %11416  ;;  %11436 = vtanh.f32 %v1151_v49  ;;  %v1155_v63 = vadd.f32 %v861_v54, %v512_v48  ;;  %v1156_v3 = vadd.f32 %v866_v53, %v513_v50  ;;  %v528_v48 = vld [vmem:[%s11887_s14 + $0x108] sm:$0xff] }
  0xa2   : > { %v11419_v2 = vpop.eup %11418  ;;  %11438 = vtanh.f32 %v1152_v52  ;;  %v1154_v8 = vadd.f32 %v861_v54, %v511_v55  ;;  %v9726_v9 = vpack.c.bf16 %v11417_v62, %v11413_v56  ;;  %v529_v52 = vld [vmem:[%s11887_s14 + $0x110] sm:$0xff] }
  0xa3   : > { %v11421_v7 = vpop.eup %11420  ;;  %11440 = vtanh.f32 %v1150_v57  ;;  %v9724_v13 = vpack.c.bf16 %v11419_v2, %v11415_v59 }
  0xa4   : > { %v876_v4 = vpop.permute.xlu1 %875  ;;  %v871_v5 = vpop.permute.xlu0 %870  ;;  %11442 = vtanh.f32 %v1157_v60  ;;  %v9728_v20 = vpack.c.bf16 %v11421_v7, %v11411_v51 }
  0xa5   : > { %v11423_v11 = vpop.eup %11422  ;;  %v1161_v12 = vadd.f32 %v876_v4, %v518_v58  ;;  %11444 = vtanh.f32 %v1155_v63  ;;  %v1159_v16 = vadd.f32 %v871_v5, %v516_v61  ;;  %v1160_v19 = vadd.f32 %v876_v4, %v517_v1  ;;  %9725 = vmatprep.subr.bf16.mxu0 %v9724_v13  ;;  %v527_v58 = vld [vmem:[%s11887_s14 + $0x100] sm:$0xff]  ;;  %v534_v61 = vld [vmem:[%s11887_s14 + $0x138] sm:$0xff]  ;;  %v532_v1 = vld [vmem:[%s11887_s14 + $0x128] sm:$0xff] }
  0xa6   : > { %v11425_v15 = vpop.eup %11424  ;;  %11446 = vtanh.f32 %v1156_v3  ;;  %v1158_v25 = vadd.f32 %v871_v5, %v515_v6  ;;  %9727 = vmatpush1.bf16.msra.mxu0 %v9726_v9  ;;  %v533_v5 = vld [vmem:[%s11887_s14 + $0x130] sm:$0xff] }
  0xa7   : > { %v11427_v18 = vpop.eup %11426  ;;  %11448 = vtanh.f32 %v1154_v8  ;;  %9729 = vmatprep.subr.bf16.mxu0 %v9728_v20  ;;  %v9730_v32 = vpack.c.bf16 %v11425_v15, %v11423_v11  ;;  %v531_v11 = vld [vmem:[%s11887_s14 + $0x120] sm:$0xff] }
  0xa8   : > { %v886_v21 = vpop.permute.xlu1 %885  ;;  %v881_v22 = vpop.permute.xlu0 %880  ;;  %11450 = vtanh.f32 %v1161_v12 }
  0xa9   : > { %v11429_v24 = vpop.eup %11428  ;;  %v1165_v28 = vadd.f32 %v886_v21, %v522_v10  ;;  %11452 = vtanh.f32 %v1159_v16  ;;  %v1163_v31 = vadd.f32 %v881_v22, %v520_v14  ;;  %v1164_v35 = vadd.f32 %v886_v21, %v521_v17  ;;  %v538_v14 = vld [vmem:[%s11887_s14 + $0x158] sm:$0xff]  ;;  %v536_v17 = vld [vmem:[%s11887_s14 + $0x148] sm:$0xff]  ;;  %v537_v21 = vld [vmem:[%s11887_s14 + $0x150] sm:$0xff] }
  0xaa   : > { %v11431_v27 = vpop.eup %11430  ;;  %11454 = vtanh.f32 %v1160_v19  ;;  %v9732_v36 = vpack.c.bf16 %v11427_v18, %v11429_v24  ;;  %v1162_v41 = vadd.f32 %v881_v22, %v519_v23  ;;  %9731 = vmatpush1.bf16.msra.mxu0 %v9730_v32 }
  0xab   : > { %v11433_v30 = vpop.eup %11432  ;;  %11456 = vtanh.f32 %v1158_v25 }
  0xac   : > { %v11435_v34 = vpop.eup %11434  ;;  %v896_v37 = vpop.permute.xlu1 %895  ;;  %11458 = vtanh.f32 %v1165_v28  ;;  %9733 = vmatprep.subr.bf16.mxu0 %v9732_v36  ;;  %v9734_v51 = vpack.c.bf16 %v11431_v27, %v11433_v30  ;;  %v535_v27 = vld [vmem:[%s11887_s14 + $0x140] sm:$0xff]  ;;  %v542_v30 = vld [vmem:[%s11887_s14 + $0x178] sm:$0xff] }
  0xad   : > { %v891_v38 = vpop.permute.xlu0 %890  ;;  %v11437_v40 = vpop.eup %11436  ;;  %v1169_v45 = vadd.f32 %v896_v37, %v526_v26  ;;  %11460 = vtanh.f32 %v1163_v31  ;;  %v1168_v54 = vadd.f32 %v896_v37, %v525_v33  ;;  %v540_v33 = vld [vmem:[%s11887_s14 + $0x168] sm:$0xff]  ;;  %v541_v37 = vld [vmem:[%s11887_s14 + $0x170] sm:$0xff] }
  0xae   : > { %v11439_v44 = vpop.eup %11438  ;;  %v1167_v50 = vadd.f32 %v891_v38, %v524_v29  ;;  %11462 = vtanh.f32 %v1164_v35  ;;  %v9736_v55 = vpack.c.bf16 %v11435_v34, %v11437_v40  ;;  %v1166_v60 = vadd.f32 %v891_v38, %v523_v39  ;;  %9735 = vmatpush1.bf16.msra.mxu0 %v9734_v51 }
  0xaf   : > { %v11441_v49 = vpop.eup %11440  ;;  %11464 = vtanh.f32 %v1162_v41 }
  0xb0   : > { %v11443_v53 = vpop.eup %11442  ;;  %v906_v56 = vpop.permute.xlu1 %905  ;;  %11466 = vtanh.f32 %v1169_v45  ;;  %9737 = vmatprep.subr.bf16.mxu0 %v9736_v55  ;;  %v9738_v4 = vpack.c.bf16 %v11439_v44, %v11441_v49  ;;  %v539_v44 = vld [vmem:[%s11887_s14 + $0x160] sm:$0xff]  ;;  %v546_v49 = vld [vmem:[%s11887_s14 + $0x198] sm:$0xff] }
  0xb1   : > { %v901_v57 = vpop.permute.xlu0 %900  ;;  %v11445_v59 = vpop.eup %11444  ;;  %v1173_v63 = vadd.f32 %v906_v56, %v530_v42  ;;  %11468 = vtanh.f32 %v1167_v50  ;;  %v1172_v7 = vadd.f32 %v906_v56, %v529_v52  ;;  %v544_v52 = vld [vmem:[%s11887_s14 + $0x188] sm:$0xff]  ;;  %v545_v56 = vld [vmem:[%s11887_s14 + $0x190] sm:$0xff] }
  0xb2   : > { %v11447_v62 = vpop.eup %11446  ;;  %v1171_v3 = vadd.f32 %v901_v57, %v528_v48  ;;  %11470 = vtanh.f32 %v1168_v54  ;;  %v9740_v8 = vpack.c.bf16 %v11443_v53, %v11445_v59  ;;  %v1170_v13 = vadd.f32 %v901_v57, %v527_v58  ;;  %9739 = vmatpush1.bf16.msra.mxu0 %v9738_v4 }
  0xb3   : > { %v11449_v2 = vpop.eup %11448  ;;  %11472 = vtanh.f32 %v1166_v60 }
  0xb4   : > { %v11451_v6 = vpop.eup %11450  ;;  %v916_v9 = vpop.permute.xlu1 %915  ;;  %11474 = vtanh.f32 %v1173_v63  ;;  %9741 = vmatprep.subr.bf16.mxu0 %v9740_v8  ;;  %v9742_v20 = vpack.c.bf16 %v11447_v62, %v11449_v2  ;;  %v543_v62 = vld [vmem:[%s11887_s14 + $0x180] sm:$0xff]  ;;  %v550_v2 = vld [vmem:[%s11887_s14 + $0x1b8] sm:$0xff] }
  0xb5   : > { %v911_v10 = vpop.permute.xlu0 %910  ;;  %v11453_v12 = vpop.eup %11452  ;;  %v1177_v16 = vadd.f32 %v916_v9, %v534_v61  ;;  %11476 = vtanh.f32 %v1171_v3  ;;  %v1176_v23 = vadd.f32 %v916_v9, %v533_v5  ;;  %v548_v5 = vld [vmem:[%s11887_s14 + $0x1a8] sm:$0xff]  ;;  %v549_v9 = vld [vmem:[%s11887_s14 + $0x1b0] sm:$0xff] }
  0xb6   : > { %v11455_v15 = vpop.eup %11454  ;;  %v1175_v19 = vadd.f32 %v911_v10, %v532_v1  ;;  %11478 = vtanh.f32 %v1172_v7  ;;  %v9744_v24 = vpack.c.bf16 %v11451_v6, %v11453_v12  ;;  %v1174_v29 = vadd.f32 %v911_v10, %v531_v11  ;;  %9743 = vmatpush1.bf16.msra.mxu0 %v9742_v20 }
  0xb7   : > { %v11457_v18 = vpop.eup %11456  ;;  %11480 = vtanh.f32 %v1170_v13 }
  0xb8   : > { %v11459_v22 = vpop.eup %11458  ;;  %v926_v25 = vpop.permute.xlu1 %925  ;;  %11482 = vtanh.f32 %v1177_v16  ;;  %9745 = vmatprep.subr.bf16.mxu0 %v9744_v24  ;;  %v9746_v36 = vpack.c.bf16 %v11455_v15, %v11457_v18  ;;  %v547_v15 = vld [vmem:[%s11887_s14 + $0x1a0] sm:$0xff]  ;;  %v554_v18 = vld [vmem:[%s11887_s14 + $0x1d8] sm:$0xff] }
  0xb9   : > { %v921_v26 = vpop.permute.xlu0 %920  ;;  %v11461_v28 = vpop.eup %11460  ;;  %v1181_v32 = vadd.f32 %v926_v25, %v538_v14  ;;  %11484 = vtanh.f32 %v1175_v19  ;;  %v1180_v39 = vadd.f32 %v926_v25, %v537_v21  ;;  %v552_v21 = vld [vmem:[%s11887_s14 + $0x1c8] sm:$0xff]  ;;  %v553_v25 = vld [vmem:[%s11887_s14 + $0x1d0] sm:$0xff] }
  0xba   : > { %v11463_v31 = vpop.eup %11462  ;;  %v1179_v35 = vadd.f32 %v921_v26, %v536_v17  ;;  %11486 = vtanh.f32 %v1176_v23  ;;  %v9748_v40 = vpack.c.bf16 %v11459_v22, %v11461_v28  ;;  %v1178_v48 = vadd.f32 %v921_v26, %v535_v27  ;;  %9747 = vmatpush1.bf16.msra.mxu0 %v9746_v36 }
  0xbb   : > { %v11465_v34 = vpop.eup %11464  ;;  %11488 = vtanh.f32 %v1174_v29 }
  0xbc   : > { %v11467_v38 = vpop.eup %11466  ;;  %v936_v41 = vpop.permute.xlu1 %935  ;;  %11490 = vtanh.f32 %v1181_v32  ;;  %9749 = vmatprep.subr.bf16.mxu0 %v9748_v40  ;;  %v9750_v55 = vpack.c.bf16 %v11463_v31, %v11465_v34  ;;  %v551_v31 = vld [vmem:[%s11887_s14 + $0x1c0] sm:$0xff]  ;;  %v558_v34 = vld [vmem:[%s11887_s14 + $0x1f8] sm:$0xff] }
  0xbd   : > { %v931_v42 = vpop.permute.xlu0 %930  ;;  %v11469_v45 = vpop.eup %11468  ;;  %v1185_v51 = vadd.f32 %v936_v41, %v542_v30  ;;  %11492 = vtanh.f32 %v1179_v35  ;;  %v1184_v58 = vadd.f32 %v936_v41, %v541_v37  ;;  %v556_v37 = vld [vmem:[%s11887_s14 + $0x1e8] sm:$0xff]  ;;  %v557_v41 = vld [vmem:[%s11887_s14 + $0x1f0] sm:$0xff] }
  0xbe   : > { %v11471_v50 = vpop.eup %11470  ;;  %v1183_v54 = vadd.f32 %v931_v42, %v540_v33  ;;  %11494 = vtanh.f32 %v1180_v39  ;;  %v9752_v59 = vpack.c.bf16 %v11467_v38, %v11469_v45  ;;  %v1182_v1 = vadd.f32 %v931_v42, %v539_v44  ;;  %9751 = vmatpush1.bf16.msra.mxu0 %v9750_v55 }
  0xbf   : > { %v11473_v53 = vpop.eup %11472  ;;  %11496 = vtanh.f32 %v1178_v48 }
  0xc0   : > { %v11475_v57 = vpop.eup %11474  ;;  %v946_v60 = vpop.permute.xlu1 %945  ;;  %11498 = vtanh.f32 %v1185_v51  ;;  %9753 = vmatprep.subr.bf16.mxu0 %v9752_v59  ;;  %v9754_v8 = vpack.c.bf16 %v11471_v50, %v11473_v53  ;;  %v555_v50 = vld [vmem:[%s11887_s14 + $0x1e0] sm:$0xff]  ;;  %v562_v53 = vld [vmem:[%s11887_s14 + $0x218] sm:$0xff] }
  0xc1   : > { %v941_v61 = vpop.permute.xlu0 %940  ;;  %v11477_v63 = vpop.eup %11476  ;;  %v1189_v4 = vadd.f32 %v946_v60, %v546_v49  ;;  %11500 = vtanh.f32 %v1183_v54  ;;  %v1188_v11 = vadd.f32 %v946_v60, %v545_v56  ;;  %v560_v56 = vld [vmem:[%s11887_s14 + $0x208] sm:$0xff]  ;;  %v561_v60 = vld [vmem:[%s11887_s14 + $0x210] sm:$0xff] }
  0xc2   : > { %v11479_v3 = vpop.eup %11478  ;;  %v1187_v7 = vadd.f32 %v941_v61, %v544_v52  ;;  %11502 = vtanh.f32 %v1184_v58  ;;  %v9756_v12 = vpack.c.bf16 %v11475_v57, %v11477_v63  ;;  %v1186_v17 = vadd.f32 %v941_v61, %v543_v62  ;;  %9755 = vmatpush1.bf16.msra.mxu0 %v9754_v8 }
  0xc3   : > { %v11481_v6 = vpop.eup %11480  ;;  %11504 = vtanh.f32 %v1182_v1 }
  0xc4   : > { %v11483_v10 = vpop.eup %11482  ;;  %v956_v13 = vpop.permute.xlu1 %955  ;;  %11506 = vtanh.f32 %v1189_v4  ;;  %9757 = vmatprep.subr.bf16.mxu0 %v9756_v12  ;;  %v9758_v24 = vpack.c.bf16 %v11479_v3, %v11481_v6  ;;  %v559_v3 = vld [vmem:[%s11887_s14 + $0x200] sm:$0xff]  ;;  %v566_v6 = vld [vmem:[%s11887_s14 + $0x238] sm:$0xff] }
  0xc5   : > { %v951_v14 = vpop.permute.xlu0 %950  ;;  %v11485_v16 = vpop.eup %11484  ;;  %v1193_v20 = vadd.f32 %v956_v13, %v550_v2  ;;  %11508 = vtanh.f32 %v1187_v7  ;;  %v1192_v27 = vadd.f32 %v956_v13, %v549_v9  ;;  %v564_v9 = vld [vmem:[%s11887_s14 + $0x228] sm:$0xff]  ;;  %v565_v13 = vld [vmem:[%s11887_s14 + $0x230] sm:$0xff] }
  0xc6   : > { %v11487_v19 = vpop.eup %11486  ;;  %v1191_v23 = vadd.f32 %v951_v14, %v548_v5  ;;  %11510 = vtanh.f32 %v1188_v11  ;;  %v9760_v28 = vpack.c.bf16 %v11483_v10, %v11485_v16  ;;  %v1190_v33 = vadd.f32 %v951_v14, %v547_v15  ;;  %9759 = vmatpush1.bf16.msra.mxu0 %v9758_v24 }
  0xc7   : > { %v11489_v22 = vpop.eup %11488  ;;  %11512 = vtanh.f32 %v1186_v17 }
  0xc8   : > { %v11491_v26 = vpop.eup %11490  ;;  %v966_v29 = vpop.permute.xlu1 %965  ;;  %11514 = vtanh.f32 %v1193_v20  ;;  %9761 = vmatprep.subr.bf16.mxu0 %v9760_v28  ;;  %v9762_v40 = vpack.c.bf16 %v11487_v19, %v11489_v22  ;;  %v563_v19 = vld [vmem:[%s11887_s14 + $0x220] sm:$0xff]  ;;  %v570_v22 = vld [vmem:[%s11887_s14 + $0x258] sm:$0xff] }
  0xc9   : > { %v961_v30 = vpop.permute.xlu0 %960  ;;  %v11493_v32 = vpop.eup %11492  ;;  %v1197_v36 = vadd.f32 %v966_v29, %v554_v18  ;;  %11516 = vtanh.f32 %v1191_v23  ;;  %v1196_v44 = vadd.f32 %v966_v29, %v553_v25  ;;  %v568_v25 = vld [vmem:[%s11887_s14 + $0x248] sm:$0xff]  ;;  %v569_v29 = vld [vmem:[%s11887_s14 + $0x250] sm:$0xff] }
  0xca   : > { %v11495_v35 = vpop.eup %11494  ;;  %v1195_v39 = vadd.f32 %v961_v30, %v552_v21  ;;  %11518 = vtanh.f32 %v1192_v27  ;;  %v9764_v45 = vpack.c.bf16 %v11491_v26, %v11493_v32  ;;  %v1194_v52 = vadd.f32 %v961_v30, %v551_v31  ;;  %9763 = vmatpush1.bf16.msra.mxu0 %v9762_v40 }
  0xcb   : > { %v11497_v38 = vpop.eup %11496  ;;  %11520 = vtanh.f32 %v1190_v33 }
  0xcc   : > { %v11499_v42 = vpop.eup %11498  ;;  %v976_v48 = vpop.permute.xlu1 %975  ;;  %11522 = vtanh.f32 %v1197_v36  ;;  %9765 = vmatprep.subr.bf16.mxu0 %v9764_v45  ;;  %v9766_v59 = vpack.c.bf16 %v11495_v35, %v11497_v38  ;;  %v567_v35 = vld [vmem:[%s11887_s14 + $0x240] sm:$0xff]  ;;  %v574_v38 = vld [vmem:[%s11887_s14 + $0x278] sm:$0xff] }
  0xcd   : > { %v971_v49 = vpop.permute.xlu0 %970  ;;  %v11501_v51 = vpop.eup %11500  ;;  %v1201_v55 = vadd.f32 %v976_v48, %v558_v34  ;;  %11524 = vtanh.f32 %v1195_v39  ;;  %v1200_v62 = vadd.f32 %v976_v48, %v557_v41  ;;  %v572_v41 = vld [vmem:[%s11887_s14 + $0x268] sm:$0xff]  ;;  %v573_v48 = vld [vmem:[%s11887_s14 + $0x270] sm:$0xff] }
  0xce   : > { %v11503_v54 = vpop.eup %11502  ;;  %v1199_v58 = vadd.f32 %v971_v49, %v556_v37  ;;  %11526 = vtanh.f32 %v1196_v44  ;;  %v9768_v63 = vpack.c.bf16 %v11499_v42, %v11501_v51  ;;  %v1198_v5 = vadd.f32 %v971_v49, %v555_v50  ;;  %9767 = vmatpush1.bf16.msra.mxu0 %v9766_v59 }
  0xcf   : > { %v11505_v57 = vpop.eup %11504  ;;  %11528 = vtanh.f32 %v1194_v52 }
  0xd0   : > { %v11507_v61 = vpop.eup %11506  ;;  %v986_v1 = vpop.permute.xlu1 %985  ;;  %11530 = vtanh.f32 %v1201_v55  ;;  %9769 = vmatprep.subr.bf16.mxu0 %v9768_v63  ;;  %v9770_v12 = vpack.c.bf16 %v11503_v54, %v11505_v57  ;;  %v571_v54 = vld [vmem:[%s11887_s14 + $0x260] sm:$0xff]  ;;  %v578_v57 = vld [vmem:[%s11887_s14 + $0x298] sm:$0xff] }
  0xd1   : > { %v981_v2 = vpop.permute.xlu0 %980  ;;  %v11509_v4 = vpop.eup %11508  ;;  %v1205_v8 = vadd.f32 %v986_v1, %v562_v53  ;;  %11532 = vtanh.f32 %v1199_v58  ;;  %v1204_v15 = vadd.f32 %v986_v1, %v561_v60  ;;  %v576_v60 = vld [vmem:[%s11887_s14 + $0x288] sm:$0xff]  ;;  %v577_v1 = vld [vmem:[%s11887_s14 + $0x290] sm:$0xff] }
  0xd2   : > { %v11511_v7 = vpop.eup %11510  ;;  %v1203_v11 = vadd.f32 %v981_v2, %v560_v56  ;;  %11534 = vtanh.f32 %v1200_v62  ;;  %v9772_v16 = vpack.c.bf16 %v11507_v61, %v11509_v4  ;;  %v1202_v21 = vadd.f32 %v981_v2, %v559_v3  ;;  %9771 = vmatpush1.bf16.msra.mxu0 %v9770_v12 }
  0xd3   : > { %v11513_v10 = vpop.eup %11512  ;;  %11536 = vtanh.f32 %v1198_v5  ;;  %v11978_v12 = vsub.s32 3, %v11852_v46 }
  0xd4   : > { %v11515_v14 = vpop.eup %11514  ;;  %v996_v17 = vpop.permute.xlu1 %995  ;;  %11538 = vtanh.f32 %v1205_v8  ;;  %9773 = vmatprep.subr.bf16.mxu0 %v9772_v16  ;;  %v9774_v28 = vpack.c.bf16 %v11511_v7, %v11513_v10  ;;  %v575_v7 = vld [vmem:[%s11887_s14 + $0x280] sm:$0xff]  ;;  %v11974_v8 = vsub.s32 0, %v11852_v46 }
  0xd5   : > { %v991_v18 = vpop.permute.xlu0 %990  ;;  %v11517_v20 = vpop.eup %11516  ;;  %v1209_v24 = vadd.f32 %v996_v17, %v566_v6  ;;  %11540 = vtanh.f32 %v1203_v11  ;;  %v1208_v31 = vadd.f32 %v996_v17, %v565_v13  ;;  %v582_v11 = vld [vmem:[%s11887_s14 + $0x2b8] sm:$0xff] }
  0xd6   : > { %v11519_v23 = vpop.eup %11518  ;;  %v1207_v27 = vadd.f32 %v991_v18, %v564_v9  ;;  %11542 = vtanh.f32 %v1204_v15  ;;  %v9776_v32 = vpack.c.bf16 %v11515_v14, %v11517_v20  ;;  %v1206_v37 = vadd.f32 %v991_v18, %v563_v19  ;;  %9775 = vmatpush1.bf16.msra.mxu0 %v9774_v28  ;;  %v580_v15 = vld [vmem:[%s11887_s14 + $0x2a8] sm:$0xff]  ;;  %v581_v19 = vld [vmem:[%s11887_s14 + $0x2b0] sm:$0xff] }
  0xd7   : > { %v11521_v26 = vpop.eup %11520  ;;  %11544 = vtanh.f32 %v1202_v21 }
  0xd8   : > { %v11523_v30 = vpop.eup %11522  ;;  %v1006_v33 = vpop.permute.xlu1 %1005  ;;  %11546 = vtanh.f32 %v1209_v24  ;;  %9777 = vmatprep.subr.bf16.mxu0 %v9776_v32  ;;  %v9778_v45 = vpack.c.bf16 %v11519_v23, %v11521_v26  ;;  %v11986_v26 = vld [vmem:[%s15129_s5] sm:$0xf] }
  0xd9   : > { %v1001_v34 = vpop.permute.xlu0 %1000  ;;  %v11525_v36 = vpop.eup %11524  ;;  %v1213_v40 = vadd.f32 %v1006_v33, %v570_v22  ;;  %11548 = vtanh.f32 %v1207_v27  ;;  %v1212_v50 = vadd.f32 %v1006_v33, %v569_v29  ;;  %v1398_v27 = vrot.slane %v11986_v26, %v11974_v8 }
  0xda   : > { %v11527_v39 = vpop.eup %11526  ;;  %v1211_v44 = vadd.f32 %v1001_v34, %v568_v25  ;;  %11550 = vtanh.f32 %v1208_v31  ;;  %v9780_v51 = vpack.c.bf16 %v11523_v30, %v11525_v36  ;;  %v1210_v56 = vadd.f32 %v1001_v34, %v567_v35  ;;  %9779 = vmatpush1.bf16.msra.mxu0 %v9778_v45  ;;  %v579_v25 = vld [vmem:[%s11887_s14 + $0x2a0] sm:$0xff]  ;;  %v586_v30 = vld [vmem:[%s11887_s14 + $0x2d8] sm:$0xff]  ;;  %v584_v34 = vld [vmem:[%s11887_s14 + $0x2c8] sm:$0xff] }
  0xdb   : > { %v11529_v42 = vpop.eup %11528  ;;  %11552 = vtanh.f32 %v1206_v37  ;;  %v1410_v31 = vrot.slane %v11986_v26, %v11978_v12  ;;  %v583_v45 = vld [vmem:[%s11887_s14 + $0x2c0] sm:$0xff] }
  0xdc   : > { %v11531_v49 = vpop.eup %11530  ;;  %v1016_v52 = vpop.permute.xlu1 %1015  ;;  %11554 = vtanh.f32 %v1213_v40  ;;  %9781 = vmatprep.subr.bf16.mxu0 %v9780_v51  ;;  %v9782_v63 = vpack.c.bf16 %v11527_v39, %v11529_v42 }
  0xdd   : > { %v1011_v53 = vpop.permute.xlu0 %1010  ;;  %v11533_v55 = vpop.eup %11532  ;;  %v1217_v59 = vadd.f32 %v1016_v52, %v574_v38  ;;  %11556 = vtanh.f32 %v1211_v44  ;;  %v1216_v3 = vadd.f32 %v1016_v52, %v573_v48  ;;  %v585_v38 = vld [vmem:[%s11887_s14 + $0x2d0] sm:$0xff] }
  0xde   : > { %v11535_v58 = vpop.eup %11534  ;;  %v1215_v62 = vadd.f32 %v1011_v53, %v572_v41  ;;  %11558 = vtanh.f32 %v1212_v50  ;;  %v9784_v4 = vpack.c.bf16 %v11531_v49, %v11533_v55  ;;  %v1214_v10 = vadd.f32 %v1011_v53, %v571_v54  ;;  %9783 = vmatpush1.bf16.msra.mxu0 %v9782_v63  ;;  %v590_v50 = vld [vmem:[%s11887_s14 + $0x2f8] sm:$0xff]  ;;  %v588_v53 = vld [vmem:[%s11887_s14 + $0x2e8] sm:$0xff]  ;;  %v587_v63 = vld [vmem:[%s11887_s14 + $0x2e0] sm:$0xff] }
  0xdf   : > { %v11537_v61 = vpop.eup %11536  ;;  %11560 = vtanh.f32 %v1210_v56 }
  0xe0   : > { %v11539_v2 = vpop.eup %11538  ;;  %v1026_v5 = vpop.permute.xlu1 %1025  ;;  %11562 = vtanh.f32 %v1217_v59  ;;  %9785 = vmatprep.subr.bf16.mxu0 %v9784_v4  ;;  %v9786_v18 = vpack.c.bf16 %v11535_v58, %v11537_v61 }
  0xe1   : > { %v1021_v6 = vpop.permute.xlu0 %1020  ;;  %v11541_v9 = vpop.eup %11540  ;;  %v1221_v14 = vadd.f32 %v1026_v5, %v578_v57  ;;  %11564 = vtanh.f32 %v1215_v62  ;;  %v1220_v21 = vadd.f32 %v1026_v5, %v577_v1  ;;  %v589_v57 = vld [vmem:[%s11887_s14 + $0x2f0] sm:$0xff] }
  0xe2   : > { %v11543_v13 = vpop.eup %11542  ;;  %v1219_v17 = vadd.f32 %v1021_v6, %v576_v60  ;;  %11566 = vtanh.f32 %v1216_v3  ;;  %v9788_v22 = vpack.c.bf16 %v11539_v2, %v11541_v9  ;;  %v1218_v29 = vadd.f32 %v1021_v6, %v575_v7  ;;  %9787 = vmatpush1.bf16.msra.mxu0 %v9786_v18  ;;  %v594_v3 = vld [vmem:[%s11887_s14 + $0x318] sm:$0xff]  ;;  %v592_v6 = vld [vmem:[%s11887_s14 + $0x308] sm:$0xff]  ;;  %v591_v18 = vld [vmem:[%s11887_s14 + $0x300] sm:$0xff] }
  0xe3   : > { %v11545_v16 = vpop.eup %11544  ;;  %11568 = vtanh.f32 %v1214_v10 }
  0xe4   : > { %v11547_v20 = vpop.eup %11546  ;;  %v1036_v23 = vpop.permute.xlu1 %1035  ;;  %11570 = vtanh.f32 %v1221_v14  ;;  %9789 = vmatprep.subr.bf16.mxu0 %v9788_v22  ;;  %v9790_v37 = vpack.c.bf16 %v11543_v13, %v11545_v16 }
  0xe5   : > { %v1031_v24 = vpop.permute.xlu0 %1030  ;;  %v11549_v28 = vpop.eup %11548  ;;  %v1225_v33 = vadd.f32 %v1036_v23, %v582_v11  ;;  %11572 = vtanh.f32 %v1219_v17  ;;  %v1224_v40 = vadd.f32 %v1036_v23, %v581_v19  ;;  %1480 = vmatmul.mubr.f32.vlgmr.msra.gmra.mrb[0].mxu0 %v1398_v27  ;;  %v593_v11 = vld [vmem:[%s11887_s14 + $0x310] sm:$0xff] }
  0xe6   : > { %v11551_v32 = vpop.eup %11550  ;;  %v1223_v36 = vadd.f32 %v1031_v24, %v580_v15  ;;  %11574 = vtanh.f32 %v1220_v21  ;;  %v9792_v41 = vpack.c.bf16 %v11547_v20, %v11549_v28  ;;  %v1222_v49 = vadd.f32 %v1031_v24, %v579_v25  ;;  %9791 = vmatpush1.bf16.msra.mxu0 %v9790_v37  ;;  %1550 = vmatprep.mubr.f32.mxu0 %v1410_v31  ;;  %v598_v21 = vld [vmem:[%s11887_s14 + $0x338] sm:$0xff]  ;;  %v596_v24 = vld [vmem:[%s11887_s14 + $0x328] sm:$0xff] }
  0xe7   : > { %v11553_v35 = vpop.eup %11552  ;;  %11576 = vtanh.f32 %v1218_v29  ;;  %v597_v29 = vld [vmem:[%s11887_s14 + $0x330] sm:$0xff] }
  0xe8   : > { %v11555_v39 = vpop.eup %11554  ;;  %v1046_v42 = vpop.permute.xlu1 %1045  ;;  %11578 = vtanh.f32 %v1225_v33  ;;  %9793 = vmatprep.subr.bf16.mxu0 %v9792_v41  ;;  %v9794_v56 = vpack.c.bf16 %v11551_v32, %v11553_v35  ;;  %v595_v35 = vld [vmem:[%s11887_s14 + $0x320] sm:$0xff]  ;;  %v600_v41 = vld [vmem:[%s11887_s14 + $0x348] sm:$0xff] }
  0xe9   : > { %v1041_v44 = vpop.permute.xlu0 %1040  ;;  %v11557_v48 = vpop.eup %11556  ;;  %v1229_v52 = vadd.f32 %v1046_v42, %v586_v30  ;;  %11580 = vtanh.f32 %v1223_v36  ;;  %v1228_v59 = vadd.f32 %v1046_v42, %v585_v38  ;;  %v602_v38 = vld [vmem:[%s11887_s14 + $0x358] sm:$0xff] }
  0xea   : > { %v11559_v51 = vpop.eup %11558  ;;  %v1227_v55 = vadd.f32 %v1041_v44, %v584_v34  ;;  %11582 = vtanh.f32 %v1224_v40  ;;  %v9796_v60 = vpack.c.bf16 %v11555_v39, %v11557_v48  ;;  %v1226_v2 = vadd.f32 %v1041_v44, %v583_v45  ;;  %9795 = vmatpush1.bf16.msra.mxu0 %v9794_v56  ;;  %v601_v48 = vld [vmem:[%s11887_s14 + $0x350] sm:$0xff] }
  0xeb   : > { %v11561_v54 = vpop.eup %11560  ;;  %11584 = vtanh.f32 %v1222_v49 }
  0xec   : > { %v11563_v58 = vpop.eup %11562  ;;  %v1056_v61 = vpop.permute.xlu1 %1055  ;;  %11586 = vtanh.f32 %v1229_v52  ;;  %9797 = vmatprep.subr.bf16.mxu0 %v9796_v60  ;;  %v9798_v10 = vpack.c.bf16 %v11559_v51, %v11561_v54  ;;  %v599_v54 = vld [vmem:[%s11887_s14 + $0x340] sm:$0xff]  ;;  %v604_v60 = vld [vmem:[%s11887_s14 + $0x368] sm:$0xff] }
  0xed   : > { %v1051_v62 = vpop.permute.xlu0 %1050  ;;  %v11565_v1 = vpop.eup %11564  ;;  %v1233_v5 = vadd.f32 %v1056_v61, %v590_v50  ;;  %11588 = vtanh.f32 %v1227_v55  ;;  %v1232_v14 = vadd.f32 %v1056_v61, %v589_v57  ;;  %v606_v57 = vld [vmem:[%s11887_s14 + $0x378] sm:$0xff] }
  0xee   : > { %v11567_v4 = vpop.eup %11566  ;;  %v1231_v9 = vadd.f32 %v1051_v62, %v588_v53  ;;  %11590 = vtanh.f32 %v1228_v59  ;;  %v9800_v15 = vpack.c.bf16 %v11563_v58, %v11565_v1  ;;  %v1230_v20 = vadd.f32 %v1051_v62, %v587_v63  ;;  %9799 = vmatpush1.bf16.msra.mxu0 %v9798_v10  ;;  %v605_v1 = vld [vmem:[%s11887_s14 + $0x370] sm:$0xff] }
  0xef   : > { %v11569_v7 = vpop.eup %11568  ;;  %11592 = vtanh.f32 %v1226_v2 }
  0xf0   : > { %v11571_v13 = vpop.eup %11570  ;;  %v1066_v16 = vpop.permute.xlu1 %1065  ;;  %11594 = vtanh.f32 %v1233_v5  ;;  %9801 = vmatprep.subr.bf16.mxu0 %v9800_v15  ;;  %v9802_v28 = vpack.c.bf16 %v11567_v4, %v11569_v7  ;;  %v603_v7 = vld [vmem:[%s11887_s14 + $0x360] sm:$0xff]  ;;  %v608_v15 = vld [vmem:[%s11887_s14 + $0x388] sm:$0xff] }
  0xf1   : > { %v1061_v17 = vpop.permute.xlu0 %1060  ;;  %v11573_v19 = vpop.eup %11572  ;;  %v1237_v23 = vadd.f32 %v1066_v16, %v594_v3  ;;  %11596 = vtanh.f32 %v1231_v9  ;;  %v1236_v31 = vadd.f32 %v1066_v16, %v593_v11  ;;  %v610_v11 = vld [vmem:[%s11887_s14 + $0x398] sm:$0xff] }
  0xf2   : > { %v11575_v22 = vpop.eup %11574  ;;  %v1235_v27 = vadd.f32 %v1061_v17, %v592_v6  ;;  %11598 = vtanh.f32 %v1232_v14  ;;  %v9804_v32 = vpack.c.bf16 %v11571_v13, %v11573_v19  ;;  %v1234_v37 = vadd.f32 %v1061_v17, %v591_v18  ;;  %9803 = vmatpush1.bf16.msra.mxu0 %v9802_v28  ;;  %v609_v19 = vld [vmem:[%s11887_s14 + $0x390] sm:$0xff] }
  0xf3   : > { %v11577_v25 = vpop.eup %11576  ;;  %11600 = vtanh.f32 %v1230_v20 }
  0xf4   : > { %v11579_v30 = vpop.eup %11578  ;;  %v1076_v33 = vpop.permute.xlu1 %1075  ;;  %11602 = vtanh.f32 %v1237_v23  ;;  %9805 = vmatprep.subr.bf16.mxu0 %v9804_v32  ;;  %v9806_v45 = vpack.c.bf16 %v11575_v22, %v11577_v25  ;;  %v607_v25 = vld [vmem:[%s11887_s14 + $0x380] sm:$0xff]  ;;  %v612_v32 = vld [vmem:[%s11887_s14 + $0x3a8] sm:$0xff] }
  0xf5   : > { %v1071_v34 = vpop.permute.xlu0 %1070  ;;  %v11581_v36 = vpop.eup %11580  ;;  %v1241_v40 = vadd.f32 %v1076_v33, %v598_v21  ;;  %11604 = vtanh.f32 %v1235_v27  ;;  %v1240_v50 = vadd.f32 %v1076_v33, %v597_v29  ;;  %v614_v29 = vld [vmem:[%s11887_s14 + $0x3b8] sm:$0xff] }
  0xf6   : > { %v11583_v39 = vpop.eup %11582  ;;  %v1239_v44 = vadd.f32 %v1071_v34, %v596_v24  ;;  %11606 = vtanh.f32 %v1236_v31  ;;  %v9808_v51 = vpack.c.bf16 %v11579_v30, %v11581_v36  ;;  %v1238_v56 = vadd.f32 %v1071_v34, %v595_v35  ;;  %9807 = vmatpush1.bf16.msra.mxu0 %v9806_v45  ;;  %v613_v36 = vld [vmem:[%s11887_s14 + $0x3b0] sm:$0xff] }
  0xf7   : > { %v11585_v42 = vpop.eup %11584  ;;  %11608 = vtanh.f32 %v1234_v37 }
  0xf8   : > { %v11587_v49 = vpop.eup %11586  ;;  %v1086_v52 = vpop.permute.xlu1 %1085  ;;  %11610 = vtanh.f32 %v1241_v40  ;;  %9809 = vmatprep.subr.bf16.mxu0 %v9808_v51  ;;  %v9810_v63 = vpack.c.bf16 %v11583_v39, %v11585_v42  ;;  %v611_v42 = vld [vmem:[%s11887_s14 + $0x3a0] sm:$0xff]  ;;  %v616_v51 = vld [vmem:[%s11887_s14 + $0x3c8] sm:$0xff] }
  0xf9   : > { %v1081_v53 = vpop.permute.xlu0 %1080  ;;  %v11589_v55 = vpop.eup %11588  ;;  %v1245_v59 = vadd.f32 %v1086_v52, %v602_v38  ;;  %11612 = vtanh.f32 %v1239_v44  ;;  %v1244_v3 = vadd.f32 %v1086_v52, %v601_v48  ;;  %v618_v48 = vld [vmem:[%s11887_s14 + $0x3d8] sm:$0xff] }
  0xfa   : > { %v11591_v58 = vpop.eup %11590  ;;  %v1243_v62 = vadd.f32 %v1081_v53, %v600_v41  ;;  %11614 = vtanh.f32 %v1240_v50  ;;  %v9812_v4 = vpack.c.bf16 %v11587_v49, %v11589_v55  ;;  %v1242_v10 = vadd.f32 %v1081_v53, %v599_v54  ;;  %9811 = vmatpush1.bf16.msra.mxu0 %v9810_v63  ;;  %v617_v55 = vld [vmem:[%s11887_s14 + $0x3d0] sm:$0xff] }
  0xfb   : > { %v11593_v61 = vpop.eup %11592  ;;  %11616 = vtanh.f32 %v1238_v56 }
  0xfc   : > { %v11595_v2 = vpop.eup %11594  ;;  %v1096_v5 = vpop.permute.xlu1 %1095  ;;  %11618 = vtanh.f32 %v1245_v59  ;;  %9813 = vmatprep.subr.bf16.mxu0 %v9812_v4  ;;  %v9814_v18 = vpack.c.bf16 %v11591_v58, %v11593_v61  ;;  %v615_v61 = vld [vmem:[%s11887_s14 + $0x3c0] sm:$0xff]  ;;  %v620_v4 = vld [vmem:[%s11887_s14 + $0x3e8] sm:$0xff] }
  0xfd   : > { %v1091_v6 = vpop.permute.xlu0 %1090  ;;  %v11597_v9 = vpop.eup %11596  ;;  %v1249_v14 = vadd.f32 %v1096_v5, %v606_v57  ;;  %11620 = vtanh.f32 %v1243_v62  ;;  %v1248_v21 = vadd.f32 %v1096_v5, %v605_v1  ;;  %v622_v1 = vld [vmem:[%s11887_s14 + $0x3f8] sm:$0xff] }
  0xfe   : > { %v11599_v13 = vpop.eup %11598  ;;  %v1247_v17 = vadd.f32 %v1091_v6, %v604_v60  ;;  %11622 = vtanh.f32 %v1244_v3  ;;  %v9816_v22 = vpack.c.bf16 %v11595_v2, %v11597_v9  ;;  %v1246_v28 = vadd.f32 %v1091_v6, %v603_v7  ;;  %9815 = vmatpush1.bf16.msra.mxu0 %v9814_v18  ;;  %v619_v18 = vld [vmem:[%s11887_s14 + $0x3e0] sm:$0xff] }
  0xff   : > { %v11601_v16 = vpop.eup %11600  ;;  %11624 = vtanh.f32 %v1242_v10 }
 0x100   : > { %v11603_v20 = vpop.eup %11602  ;;  %v1106_v23 = vpop.permute.xlu1 %1105  ;;  %11626 = vtanh.f32 %v1249_v14  ;;  %9817 = vmatprep.subr.bf16.mxu0 %v9816_v22  ;;  %v9818_v35 = vpack.c.bf16 %v11599_v13, %v11601_v16  ;;  %v621_v14 = vld [vmem:[%s11887_s14 + $0x3f0] sm:$0xff] }
 0x101   : > { %v1101_v24 = vpop.permute.xlu0 %1100  ;;  %v11605_v27 = vpop.eup %11604  ;;  %v1253_v31 = vadd.f32 %v1106_v23, %v610_v11  ;;  %11628 = vtanh.f32 %v1247_v17  ;;  %v1252_v38 = vadd.f32 %v1106_v23, %v609_v19 }
 0x102   : > { %v11607_v30 = vpop.eup %11606  ;;  %v1251_v34 = vadd.f32 %v1101_v24, %v608_v15  ;;  %11630 = vtanh.f32 %v1248_v21  ;;  %v9820_v39 = vpack.c.bf16 %v11603_v20, %v11605_v27  ;;  %v1250_v45 = vadd.f32 %v1101_v24, %v607_v25  ;;  %9819 = vmatpush1.bf16.msra.mxu0 %v9818_v35 }
 0x103   : > { %v11609_v33 = vpop.eup %11608  ;;  %11632 = vtanh.f32 %v1246_v28 }
 0x104   : > { %v11611_v37 = vpop.eup %11610  ;;  %v1116_v40 = vpop.permute.xlu1 %1115  ;;  %11634 = vtanh.f32 %v1253_v31  ;;  %9821 = vmatprep.subr.bf16.mxu0 %v9820_v39  ;;  %v9822_v54 = vpack.c.bf16 %v11607_v30, %v11609_v33 }
 0x105   : > { %v1111_v41 = vpop.permute.xlu0 %1110  ;;  %v11613_v44 = vpop.eup %11612  ;;  %v1257_v50 = vadd.f32 %v1116_v40, %v614_v29  ;;  %11636 = vtanh.f32 %v1251_v34  ;;  %v1256_v57 = vadd.f32 %v1116_v40, %v613_v36 }
 0x106   : > { %v11615_v49 = vpop.eup %11614  ;;  %v1255_v53 = vadd.f32 %v1111_v41, %v612_v32  ;;  %11638 = vtanh.f32 %v1252_v38  ;;  %v9824_v58 = vpack.c.bf16 %v11611_v37, %v11613_v44  ;;  %v1254_v63 = vadd.f32 %v1111_v41, %v611_v42  ;;  %9823 = vmatpush1.bf16.msra.mxu0 %v9822_v54 }
 0x107   : > { %v11617_v52 = vpop.eup %11616  ;;  %11640 = vtanh.f32 %v1250_v45 }
 0x108   : > { %v11619_v56 = vpop.eup %11618  ;;  %v1126_v59 = vpop.permute.xlu1 %1125  ;;  %11642 = vtanh.f32 %v1257_v50  ;;  %9825 = vmatprep.subr.bf16.mxu0 %v9824_v58  ;;  %v9826_v7 = vpack.c.bf16 %v11615_v49, %v11617_v52 }
 0x109   : > { %v1121_v60 = vpop.permute.xlu0 %1120  ;;  %v11621_v62 = vpop.eup %11620  ;;  %v1261_v3 = vadd.f32 %v1126_v59, %v618_v48  ;;  %11644 = vtanh.f32 %v1255_v53  ;;  %v1260_v10 = vadd.f32 %v1126_v59, %v617_v55  ;;  %v12033_v55 = vsub.s32 2, %v11852_v46 }
 0x10a   : > { %v11623_v2 = vpop.eup %11622  ;;  %v1259_v6 = vadd.f32 %v1121_v60, %v616_v51  ;;  %11646 = vtanh.f32 %v1256_v57  ;;  %v9828_v11 = vpack.c.bf16 %v11619_v56, %v11621_v62  ;;  %v1258_v17 = vadd.f32 %v1121_v60, %v615_v61  ;;  %9827 = vmatpush1.bf16.msra.mxu0 %v9826_v7  ;;  %v630_v7 = vld [vmem:[%s12050_s19 + $0x38] sm:$0xff] }
 0x10b   : > { %v11625_v5 = vpop.eup %11624  ;;  %11648 = vtanh.f32 %v1254_v63  ;;  %v1406_v57 = vrot.slane %v11986_v26, %v12033_v55  ;;  %v624_v26 = vld [vmem:[%s12050_s19 + $0x8] sm:$0xff]  ;;  %v626_v63 = vld [vmem:[%s12050_s19 + $0x18] sm:$0xff] }
 0x10c   : > { %v11627_v9 = vpop.eup %11626  ;;  %v1136_v13 = vpop.permute.xlu1 %1135  ;;  %11650 = vtanh.f32 %v1261_v3  ;;  %9829 = vmatprep.subr.bf16.mxu0 %v9828_v11  ;;  %v9830_v23 = vpack.c.bf16 %v11623_v2, %v11625_v5  ;;  %v9852_v2 = vpack.c.bf16 %v626_v63, %v624_v26  ;;  %v628_v5 = vld [vmem:[%s12050_s19 + $0x28] sm:$0xff]  ;;  %v629_v11 = vld [vmem:[%s12050_s19 + $0x30] sm:$0xff]  ;;  %v662_v26 = vld [vmem:[%s12050_s19 + $0x138] sm:$0xff] }
 0x10d   : > { %v1131_v15 = vpop.permute.xlu0 %1130  ;;  %v11629_v16 = vpop.eup %11628  ;;  %v1265_v20 = vadd.f32 %v1136_v13, %v622_v1  ;;  %11652 = vtanh.f32 %v1259_v6  ;;  %v1264_v28 = vadd.f32 %v1136_v13, %v621_v14  ;;  %v623_v1 = vld [vmem:[%s12050_s19] sm:$0xff]  ;;  %v632_v13 = vld [vmem:[%s12050_s19 + $0x48] sm:$0xff]  ;;  %v634_v14 = vld [vmem:[%s12050_s19 + $0x58] sm:$0xff] }
 0x10e   : > { %v11631_v19 = vpop.eup %11630  ;;  %v1263_v22 = vadd.f32 %v1131_v15, %v620_v4  ;;  %11654 = vtanh.f32 %v1260_v10  ;;  %v9832_v25 = vpack.c.bf16 %v11627_v9, %v11629_v16  ;;  %9831 = vmatpush1.bf16.msra.mxu0 %v9830_v23  ;;  %v1262_v30 = vadd.f32 %v1131_v15, %v619_v18  ;;  %v625_v4 = vld [vmem:[%s12050_s19 + $0x10] sm:$0xff]  ;;  %v627_v10 = vld [vmem:[%s12050_s19 + $0x20] sm:$0xff] }
 0x10f   : > { %v11633_v21 = vpop.eup %11632  ;;  %11656 = vtanh.f32 %v1258_v17  ;;  %v9855_v6 = vpack.c.bf16 %v625_v4, %v623_v1  ;;  %v9857_v9 = vpack.c.bf16 %v630_v7, %v628_v5  ;;  %v9860_v15 = vpack.c.bf16 %v629_v11, %v627_v10  ;;  %v631_v17 = vld [vmem:[%s12050_s19 + $0x40] sm:$0xff]  ;;  %v633_v18 = vld [vmem:[%s12050_s19 + $0x50] sm:$0xff]  ;;  %v664_v5 = vld [vmem:[%s12050_s19 + $0x148] sm:$0xff] }
 0x110   : > { %v11635_v24 = vpop.eup %11634  ;;  %11658 = vtanh.f32 %v1265_v20  ;;  %9833 = vmatprep.subr.bf16.mxu0 %v9832_v25  ;;  %v9834_v32 = vpack.c.bf16 %v11631_v19, %v11633_v21  ;;  %v9862_v16 = vpack.c.bf16 %v634_v14, %v632_v13  ;;  %v636_v19 = vld [vmem:[%s12050_s19 + $0x68] sm:$0xff]  ;;  %v638_v20 = vld [vmem:[%s12050_s19 + $0x78] sm:$0xff]  ;;  %v9865_v21 = vpack.c.bf16 %v633_v18, %v631_v17  ;;  %v635_v23 = vld [vmem:[%s12050_s19 + $0x60] sm:$0xff] }
 0x111   : > { %v11637_v27 = vpop.eup %11636  ;;  %11660 = vtanh.f32 %v1263_v22  ;;  %v9867_v22 = vpack.c.bf16 %v638_v20, %v636_v19  ;;  %v640_v25 = vld [vmem:[%s12050_s19 + $0x88] sm:$0xff]  ;;  %v661_v4 = vld [vmem:[%s12050_s19 + $0x130] sm:$0xff]  ;;  %v663_v10 = vld [vmem:[%s12050_s19 + $0x140] sm:$0xff] }
 0x112   : > { %v11639_v29 = vpop.eup %11638  ;;  %v9836_v34 = vpack.c.bf16 %v11635_v24, %v11637_v27  ;;  %11662 = vtanh.f32 %v1264_v28  ;;  %9835 = vmatpush1.bf16.msra.mxu0 %v9834_v32  ;;  %v637_v24 = vld [vmem:[%s12050_s19 + $0x70] sm:$0xff]  ;;  %v642_v27 = vld [vmem:[%s12050_s19 + $0x98] sm:$0xff]  ;;  %v644_v32 = vld [vmem:[%s12050_s19 + $0xa8] sm:$0xff] }
 0x113   : > { %v11641_v31 = vpop.eup %11640  ;;  %11664 = vtanh.f32 %v1262_v30  ;;  %v9870_v28 = vpack.c.bf16 %v637_v24, %v635_v23  ;;  %v639_v30 = vld [vmem:[%s12050_s19 + $0x80] sm:$0xff]  ;;  %v665_v11 = vld [vmem:[%s12050_s19 + $0x150] sm:$0xff]  ;;  %v668_v13 = vld [vmem:[%s12050_s19 + $0x168] sm:$0xff] }
 0x114   : > { %v11643_v33 = vpop.eup %11642  ;;  %9837 = vmatprep.subr.bf16.mxu0 %v9836_v34  ;;  %v9838_v38 = vpack.c.bf16 %v11639_v29, %v11641_v31  ;;  %v9872_v29 = vpack.c.bf16 %v642_v27, %v640_v25  ;;  %v641_v31 = vld [vmem:[%s12050_s19 + $0x90] sm:$0xff]  ;;  %v670_v14 = vld [vmem:[%s12050_s19 + $0x178] sm:$0xff]  ;;  %v667_v17 = vld [vmem:[%s12050_s19 + $0x160] sm:$0xff] }
 0x115   : > { %v11645_v35 = vpop.eup %11644  ;;  %v9875_v34 = vpack.c.bf16 %v641_v31, %v639_v30  ;;  %v669_v18 = vld [vmem:[%s12050_s19 + $0x170] sm:$0xff]  ;;  %v672_v19 = vld [vmem:[%s12050_s19 + $0x188] sm:$0xff]  ;;  %v674_v20 = vld [vmem:[%s12050_s19 + $0x198] sm:$0xff] }
 0x116   : > { %v11647_v36 = vpop.eup %11646  ;;  %v9840_v40 = vpack.c.bf16 %v11643_v33, %v11645_v35  ;;  %9839 = vmatpush1.bf16.msra.mxu0 %v9838_v38  ;;  %v646_v33 = vld [vmem:[%s12050_s19 + $0xb8] sm:$0xff]  ;;  %v648_v38 = vld [vmem:[%s12050_s19 + $0xc8] sm:$0xff]  ;;  %v671_v23 = vld [vmem:[%s12050_s19 + $0x180] sm:$0xff] }
 0x117   : > { %v11649_v37 = vpop.eup %11648  ;;  %v9877_v35 = vpack.c.bf16 %v646_v33, %v644_v32  ;;  %v673_v24 = vld [vmem:[%s12050_s19 + $0x190] sm:$0xff]  ;;  %v676_v25 = vld [vmem:[%s12050_s19 + $0x1a8] sm:$0xff]  ;;  %v678_v27 = vld [vmem:[%s12050_s19 + $0x1b8] sm:$0xff] }
 0x118   : > { %v11651_v39 = vpop.eup %11650  ;;  %9841 = vmatprep.subr.bf16.mxu0 %v9840_v40  ;;  %v9842_v45 = vpack.c.bf16 %v11647_v36, %v11649_v37  ;;  %v643_v36 = vld [vmem:[%s12050_s19 + $0xa0] sm:$0xff]  ;;  %v645_v37 = vld [vmem:[%s12050_s19 + $0xb0] sm:$0xff]  ;;  %v680_v32 = vld [vmem:[%s12050_s19 + $0x1c8] sm:$0xff] }
 0x119   : > { %v11653_v41 = vpop.eup %11652  ;;  %v9880_v40 = vpack.c.bf16 %v645_v37, %v643_v36  ;;  %v675_v30 = vld [vmem:[%s12050_s19 + $0x1a0] sm:$0xff]  ;;  %v677_v31 = vld [vmem:[%s12050_s19 + $0x1b0] sm:$0xff]  ;;  %v682_v33 = vld [vmem:[%s12050_s19 + $0x1d8] sm:$0xff] }
 0x11a   : > { %v11655_v42 = vpop.eup %11654  ;;  %v9844_v49 = vpack.c.bf16 %v11651_v39, %v11653_v41  ;;  %9843 = vmatpush1.bf16.msra.mxu0 %v9842_v45  ;;  %v650_v39 = vld [vmem:[%s12050_s19 + $0xd8] sm:$0xff]  ;;  %v652_v45 = vld [vmem:[%s12050_s19 + $0xe8] sm:$0xff]  ;;  %v10224_v3 = vld [vmem:[%s15131_s7 + $0x84] ss:$48 sps:$4 sm:$0xff]  }
 0x11b   : > { %v11657_v44 = vpop.eup %11656  ;;  %v9882_v41 = vpack.c.bf16 %v650_v39, %v648_v38  ;;  %v679_v39 = vld [vmem:[%s12050_s19 + $0x1c0] sm:$0xff] }
 0x11c   : > { %v11659_v48 = vpop.eup %11658  ;;  %9845 = vmatprep.subr.bf16.mxu0 %v9844_v49  ;;  %v9846_v52 = vpack.c.bf16 %v11655_v42, %v11657_v44  ;;  %v647_v42 = vld [vmem:[%s12050_s19 + $0xc0] sm:$0xff]  ;;  %v649_v44 = vld [vmem:[%s12050_s19 + $0xd0] sm:$0xff] }
 0x11d   : > { %v11661_v50 = vpop.eup %11660  ;;  %v9885_v49 = vpack.c.bf16 %v649_v44, %v647_v42 }
 0x11e   : > { %v11663_v51 = vpop.eup %11662  ;;  %v9848_v54 = vpack.c.bf16 %v11659_v48, %v11661_v50  ;;  %9847 = vmatpush1.bf16.msra.mxu0 %v9846_v52  ;;  %v654_v48 = vld [vmem:[%s12050_s19 + $0xf8] sm:$0xff]  ;;  %v653_v52 = vld [vmem:[%s12050_s19 + $0xf0] sm:$0xff] }
 0x11f   : > { %v11665_v53 = vpop.eup %11664  ;;  %v9887_v50 = vpack.c.bf16 %v654_v48, %v652_v45 }
 0x120   : > { %9849 = vmatprep.subr.bf16.mxu0 %v9848_v54  ;;  %v9850_v56 = vpack.c.bf16 %v11663_v51, %v11665_v53  ;;  %v651_v51 = vld [vmem:[%s12050_s19 + $0xe0] sm:$0xff]  ;;  %v656_v53 = vld [vmem:[%s12050_s19 + $0x108] sm:$0xff]  ;;  %v658_v54 = vld [vmem:[%s12050_s19 + $0x118] sm:$0xff] }
 0x122   : > { %9851 = vmatpush1.bf16.msra.mxu0 %v9850_v56  ;;  %v9890_v56 = vpack.c.bf16 %v653_v52, %v651_v51  ;;  %v686_v51 = vld [vmem:[%s12050_s19 + $0x1f8] sm:$0xff]  ;;  %v683_v52 = vld [vmem:[%s12050_s19 + $0x1e0] sm:$0xff] }
 0x123   : > { %9854 = vmatprep.subr.msk.bf16.mxu0 %vm12057_vm3, %v9852_v2  ;;  %v659_v2 = vld [vmem:[%s12050_s19 + $0x120] sm:$0xff] }
 0x124   : > { %v9900_v7 = vpack.c.bf16 %v661_v4, %v659_v2  ;;  %v10120_v2 = vld [vmem:[%s15131_s7 + $0xc4] ss:$48 sps:$4 sm:$0xff]   ;;  %v10122_v4 = vld [vmem:[%s15131_s7 + $0xc0] ss:$48 sps:$4 sm:$0xff]  }
 0x125   : > { %1551 = vmatmul.mubr.f32.vlgmr.msra.gmra.mrb[0].mxu0 %v1406_v57  ;;  %v9892_v57 = vpack.c.bf16 %v658_v54, %v656_v53  ;;  %v685_v54 = vld [vmem:[%s12050_s19 + $0x1f0] sm:$0xff] }
 0x12b   : > { %9856 = vmatpush1.bf16.xpose.msra.mxu0 %v9855_v6  ;;  %v666_v6 = vld [vmem:[%s12050_s19 + $0x158] sm:$0xff] }
 0x12c   : > { %9859 = vmatprep.subr.msk.bf16.mxu0 %vm12057_vm3, %v9857_v9  ;;  %v9902_v9 = vpack.c.bf16 %v666_v6, %v664_v5  ;;  %v10123_v5 = vld [vmem:[%s15131_s7 + $0x124] ss:$48 sps:$4 sm:$0xff]   ;;  %v10125_v6 = vld [vmem:[%s15131_s7 + $0x120] ss:$48 sps:$4 sm:$0xff]  }
 0x133   : > { %9861 = vmatpush1.bf16.xpose.msra.mxu0 %v9860_v15  ;;  %v9905_v15 = vpack.c.bf16 %v665_v11, %v663_v10  ;;  %v10129_v10 = vld [vmem:[%s15131_s7 + $0x1e4] ss:$48 sps:$4 sm:$0xff]   ;;  %v10131_v11 = vld [vmem:[%s15131_s7 + $0x1e0] ss:$48 sps:$4 sm:$0xff]  }
 0x134   : > { %9864 = vmatprep.subr.msk.bf16.mxu0 %vm12057_vm3, %v9862_v16  ;;  %v9907_v16 = vpack.c.bf16 %v670_v14, %v668_v13  ;;  %v10132_v13 = vld [vmem:[%s15131_s7 + $0x244] ss:$48 sps:$4 sm:$0xff]   ;;  %v10134_v14 = vld [vmem:[%s15131_s7 + $0x240] ss:$48 sps:$4 sm:$0xff]  }
 0x13b   : > { %9866 = vmatpush1.bf16.xpose.msra.mxu0 %v9865_v21  ;;  %v9910_v21 = vpack.c.bf16 %v669_v18, %v667_v17  ;;  %v10140_v17 = vld [vmem:[%s15131_s7 + $0xc] ss:$48 sps:$4 sm:$0xff]   ;;  %v816_v18 = vld [vmem:[%s485_s26] sm:$0x1]  ;;  %s8779_s26 = sshll.u32 %s15140_s22, 1 }
 0x13c   : > { %9869 = vmatprep.subr.msk.bf16.mxu0 %vm12057_vm3, %v9867_v22  ;;  %v9912_v22 = vpack.c.bf16 %v674_v20, %v672_v19  ;;  %v10138_v19 = vld [vmem:[%s15131_s7 + $0x8] ss:$48 sps:$4 sm:$0xff]   ;;  %v12226_v20 = vpack.c.bf16 %v816_v18, %v816_v18  ;;  %s489_s15 = scalar_lea.vmem %s15135_s11, %s8779_s26 }
 0x143   : > { %9871 = vmatpush1.bf16.xpose.msra.mxu0 %v9870_v28  ;;  %v9915_v28 = vpack.c.bf16 %v673_v24, %v671_v23  ;;  %v10146_v23 = vld [vmem:[%s15131_s7 + $0xcc] ss:$48 sps:$4 sm:$0xff]   ;;  %v10144_v24 = vld [vmem:[%s15131_s7 + $0xc8] ss:$48 sps:$4 sm:$0xff]  }
 0x144   : > { %9874 = vmatprep.subr.msk.bf16.mxu0 %vm12057_vm3, %v9872_v29  ;;  %v9917_v29 = vpack.c.bf16 %v678_v27, %v676_v25  ;;  %v10149_v25 = vld [vmem:[%s15131_s7 + $0x12c] ss:$48 sps:$4 sm:$0xff]   ;;  %v10147_v27 = vld [vmem:[%s15131_s7 + $0x128] ss:$48 sps:$4 sm:$0xff]  }
 0x14b   : > { %9876 = vmatpush1.bf16.xpose.msra.mxu0 %v9875_v34  ;;  %v9920_v34 = vpack.c.bf16 %v677_v31, %v675_v30  ;;  %v10155_v30 = vld [vmem:[%s15131_s7 + $0x1ec] ss:$48 sps:$4 sm:$0xff]   ;;  %v10153_v31 = vld [vmem:[%s15131_s7 + $0x1e8] ss:$48 sps:$4 sm:$0xff]  }
 0x14c   : > { %9879 = vmatprep.subr.msk.bf16.mxu0 %vm12057_vm3, %v9877_v35  ;;  %v9922_v35 = vpack.c.bf16 %v682_v33, %v680_v32  ;;  %v10158_v32 = vld [vmem:[%s15131_s7 + $0x24c] ss:$48 sps:$4 sm:$0xff]   ;;  %v10156_v33 = vld [vmem:[%s15131_s7 + $0x248] ss:$48 sps:$4 sm:$0xff]  }
 0x153   : > { %9881 = vmatpush1.bf16.xpose.msra.mxu0 %v9880_v40  ;;  %v681_v40 = vld [vmem:[%s12050_s19 + $0x1d0] sm:$0xff] }
 0x154   : > { %9884 = vmatprep.subr.msk.bf16.mxu0 %vm12057_vm3, %v9882_v41  ;;  %v9925_v44 = vpack.c.bf16 %v681_v40, %v679_v39  ;;  %v10165_v39 = vld [vmem:[%s15131_s7 + $0x70] ss:$48 sps:$4 sm:$0xff]   ;;  %v10170_v40 = vld [vmem:[%s15131_s7 + $0xd4] ss:$48 sps:$4 sm:$0xff]  }
 0x15b   : > { %9886 = vmatpush1.bf16.xpose.msra.mxu0 %v9885_v49 }
 0x15c   : > { %9889 = vmatprep.subr.msk.bf16.mxu0 %vm12057_vm3, %v9887_v50  ;;  %v684_v50 = vld [vmem:[%s12050_s19 + $0x1e8] sm:$0xff] }
 0x15d   : > { %v9927_v53 = vpack.c.bf16 %v686_v51, %v684_v50  ;;  %v10177_v50 = vld [vmem:[%s15131_s7 + $0x1f0] ss:$48 sps:$4 sm:$0xff]   ;;  %v10182_v51 = vld [vmem:[%s15131_s7 + $0x254] ss:$48 sps:$4 sm:$0xff]  }
 0x163   : > { %9891 = vmatpush1.bf16.xpose.msra.mxu0 %v9890_v56  ;;  %v10114_v56 = vld [vmem:[%s15131_s7 + $0x4] ss:$48 sps:$4 sm:$0xff]  }
 0x164   : > { %9894 = vmatprep.subr.msk.bf16.mxu0 %vm12057_vm3, %v9892_v57  ;;  %v10116_v57 = vld [vmem:[%s15131_s7] ss:$48 sps:$4 sm:$0xff]   ;;  %2928 = vmatprep.subr.bf16.mxu1 %v10114_v56  ;;  %v10188_v56 = vld [vmem:[%s15131_s7 + $0x1c] ss:$48 sps:$4 sm:$0xff]  }
 0x165   : > { %2929 = vmatpush1.bf16.msra.mxu1 %v10116_v57  ;;  %v10186_v57 = vld [vmem:[%s15131_s7 + $0x18] ss:$48 sps:$4 sm:$0xff]  }
 0x1f8   : > { %v12037_v58 = vpop.f32.mrb[0].mxu0 }
 0x1f9   : > { %v1558_v59 = vsel %vm1557_vm0, %v12037_v58, -inf  ;;  %v12041_v60 = vpop.f32.mrb[1].mxu0 }
 0x1fa   : > { %v1560_v61 = vsel %vm1559_vm1, %v12041_v60, -inf }
 0x1fb   : > { %v1561_v62 = vmax.f32 %v1558_v59, %v1560_v61  ;;  %v655_v59 = vld [vmem:[%s12050_s19 + $0x100] sm:$0xff]  ;;  %v657_v61 = vld [vmem:[%s12050_s19 + $0x110] sm:$0xff] }
 0x1fc   : > { %v9895_v63 = vpack.c.bf16 %v657_v61, %v655_v59  ;;  %v9930_v59 = vpack.c.bf16 %v685_v54, %v683_v52  ;;  %v10117_v61 = vld [vmem:[%s15131_s7 + $0x64] ss:$48 sps:$4 sm:$0xff]   ;;  %v10180_v52 = vld [vmem:[%s15131_s7 + $0x250] ss:$48 sps:$4 sm:$0xff]  }
 0x1fd   : > { %1562 = vmax.xlane.f32.xlu0 %v1561_v62  ;;  %v660_v62 = vld [vmem:[%s12050_s19 + $0x128] sm:$0xff]  ;;  %2930 = vmatprep.subr.bf16.mxu1 %v10117_v61  ;;  %v10183_v54 = vld [vmem:[%s15131_s7 + $0x2b0] ss:$48 sps:$4 sm:$0xff]  }
 0x1fe   : > { %v9897_v1 = vpack.c.bf16 %v662_v26, %v660_v62  ;;  %9896 = vmatpush1.bf16.xpose.msra.mxu0 %v9895_v63  ;;  %v10119_v62 = vld [vmem:[%s15131_s7 + $0x60] ss:$48 sps:$4 sm:$0xff]   ;;  %v688_v26 = vld [vmem:[%s12050_s19 + $0x208] sm:$0xff]  ;;  %v690_v63 = vld [vmem:[%s12050_s19 + $0x218] sm:$0xff] }
 0x1ff   : > { %2931 = vmatpush1.bf16.msra.mxu1 %v10119_v62  ;;  %v10189_v61 = vld [vmem:[%s15131_s7 + $0x78] ss:$48 sps:$4 sm:$0xff]   ;;  %v10194_v62 = vld [vmem:[%s15131_s7 + $0xdc] ss:$48 sps:$4 sm:$0xff]  }
 0x200   : > { %9899 = vmatprep.subr.msk.bf16.mxu0 %vm12057_vm3, %v9897_v1  ;;  %v9932_v1 = vpack.c.bf16 %v690_v63, %v688_v26  ;;  %2932 = vmatprep.subr.bf16.mxu1 %v10120_v2  ;;  %v10192_v26 = vld [vmem:[%s15131_s7 + $0xd8] ss:$48 sps:$4 sm:$0xff]   ;;  %v10197_v63 = vld [vmem:[%s15131_s7 + $0x13c] ss:$48 sps:$4 sm:$0xff]  }
 0x201   : > { %v10200_v2 = vld [vmem:[%s15131_s7 + $0x19c] ss:$48 sps:$4 sm:$0xff]  }
 0x203   : > { %2933 = vmatpush1.bf16.msra.mxu1 %v10122_v4  ;;  %v10198_v4 = vld [vmem:[%s15131_s7 + $0x198] ss:$48 sps:$4 sm:$0xff]  }
 0x204   : > { %2934 = vmatprep.subr.bf16.mxu1 %v10123_v5  ;;  %v10203_v5 = vld [vmem:[%s15131_s7 + $0x1fc] ss:$48 sps:$4 sm:$0xff]  }
 0x206   : > { %9901 = vmatpush1.bf16.xpose.msra.mxu0 %v9900_v7  ;;  %v10126_v7 = vld [vmem:[%s15131_s7 + $0x184] ss:$48 sps:$4 sm:$0xff]  }
 0x207   : > { %9904 = vmatprep.subr.msk.bf16.mxu0 %vm12057_vm3, %v9902_v9  ;;  %2935 = vmatpush1.bf16.msra.mxu1 %v10125_v6  ;;  %v10128_v9 = vld [vmem:[%s15131_s7 + $0x180] ss:$48 sps:$4 sm:$0xff]   ;;  %v10201_v6 = vld [vmem:[%s15131_s7 + $0x1f8] ss:$48 sps:$4 sm:$0xff]  }
 0x208   : > { %2936 = vmatprep.subr.bf16.mxu1 %v10126_v7  ;;  %v10206_v7 = vld [vmem:[%s15131_s7 + $0x25c] ss:$48 sps:$4 sm:$0xff]  }
 0x20b   : > { %2937 = vmatpush1.bf16.msra.mxu1 %v10128_v9  ;;  %v10204_v9 = vld [vmem:[%s15131_s7 + $0x258] ss:$48 sps:$4 sm:$0xff]  }
 0x20c   : > { %2938 = vmatprep.subr.bf16.mxu1 %v10129_v10 }
 0x20e   : > { %9906 = vmatpush1.bf16.xpose.msra.mxu0 %v9905_v15  ;;  %v10135_v15 = vld [vmem:[%s15131_s7 + $0x2a4] ss:$48 sps:$4 sm:$0xff]  }
 0x20f   : > { %9909 = vmatprep.subr.msk.bf16.mxu0 %vm12057_vm3, %v9907_v16  ;;  %2939 = vmatpush1.bf16.msra.mxu1 %v10131_v11  ;;  %v10137_v16 = vld [vmem:[%s15131_s7 + $0x2a0] ss:$48 sps:$4 sm:$0xff]   ;;  %v10209_v11 = vld [vmem:[%s15131_s7 + $0x2bc] ss:$48 sps:$4 sm:$0xff]  }
 0x210   : > { %2940 = vmatprep.subr.bf16.mxu1 %v10132_v13  ;;  %v10207_v13 = vld [vmem:[%s15131_s7 + $0x2b8] ss:$48 sps:$4 sm:$0xff]  }
 0x213   : > { %2941 = vmatpush1.bf16.msra.mxu1 %v10134_v14  ;;  %v11722_v14 = vmov 1966171168  }
 0x214   : > { %2942 = vmatprep.subr.bf16.mxu1 %v10135_v15  ;;  %v1582_v15 = vunpack.c.l.s4 %v11722_v14  ;;  %v710_v14 = vld [vmem:[%s12050_s19 + $0x2b8] sm:$0xff] }
 0x216   : > { %9911 = vmatpush1.bf16.xpose.msra.mxu0 %v9910_v21  ;;  %v10143_v21 = vld [vmem:[%s15131_s7 + $0x6c] ss:$48 sps:$4 sm:$0xff]   ;;  %v1583_v18 = vunpack.c.0.s8 %v1582_v15 }
 0x217   : > { %9914 = vmatprep.subr.msk.bf16.mxu0 %vm12057_vm3, %v9912_v22  ;;  %2943 = vmatpush1.bf16.msra.mxu1 %v10137_v16  ;;  %v10141_v22 = vld [vmem:[%s15131_s7 + $0x68] ss:$48 sps:$4 sm:$0xff]   ;;  %v10212_v16 = vld [vmem:[%s15131_s7 + $0x2c] ss:$48 sps:$4 sm:$0xff]  }
 0x218   : > { %2969 = vmatprep.subr.bf16.mxu1 %v10140_v17  ;;  %v10210_v17 = vld [vmem:[%s15131_s7 + $0x28] ss:$48 sps:$4 sm:$0xff]   ;;  %v10263_v15 = vld [vmem:[%s15130_s6 + $0x6c] ss:$48 sps:$4 sm:$0xff]  }
 0x21a   : > { %2961 = vmatmul.mubr.bf16.vlgmr.msra.gmra.mrb[0].mxu1 %v12226_v20 }
 0x21b   : > { %2970 = vmatpush1.bf16.msra.mxu1 %v10138_v19  ;;  %3001 = vmatprep.mubr.bf16.mxu1 %v11721_v0  ;;  %v10215_v19 = vld [vmem:[%s15131_s7 + $0x8c] ss:$48 sps:$4 sm:$0xff]  }
 0x21c   : > { %2971 = vmatprep.subr.bf16.mxu1 %v10143_v21  ;;  %v687_v21 = vld [vmem:[%s12050_s19 + $0x200] sm:$0xff] }
 0x21e   : > { %9916 = vmatpush1.bf16.xpose.msra.mxu0 %v9915_v28  ;;  %v10152_v28 = vld [vmem:[%s15131_s7 + $0x18c] ss:$48 sps:$4 sm:$0xff]  }
 0x21f   : > { %9919 = vmatprep.subr.msk.bf16.mxu0 %vm12057_vm3, %v9917_v29  ;;  %2972 = vmatpush1.bf16.msra.mxu1 %v10141_v22  ;;  %v10150_v29 = vld [vmem:[%s15131_s7 + $0x188] ss:$48 sps:$4 sm:$0xff]   ;;  %v689_v22 = vld [vmem:[%s12050_s19 + $0x210] sm:$0xff] }
 0x220   : > { %2973 = vmatprep.subr.bf16.mxu1 %v10146_v23  ;;  %v692_v23 = vld [vmem:[%s12050_s19 + $0x228] sm:$0xff] }
 0x223   : > { %2974 = vmatpush1.bf16.msra.mxu1 %v10144_v24  ;;  %v694_v24 = vld [vmem:[%s12050_s19 + $0x238] sm:$0xff] }
 0x224   : > { %2975 = vmatprep.subr.bf16.mxu1 %v10149_v25  ;;  %v10213_v25 = vld [vmem:[%s15131_s7 + $0x88] ss:$48 sps:$4 sm:$0xff]  }
 0x226   : > { %9921 = vmatpush1.bf16.xpose.msra.mxu0 %v9920_v34  ;;  %v10161_v34 = vld [vmem:[%s15131_s7 + $0x2ac] ss:$48 sps:$4 sm:$0xff]  }
 0x227   : > { %9924 = vmatprep.subr.msk.bf16.mxu0 %vm12057_vm3, %v9922_v35  ;;  %2976 = vmatpush1.bf16.msra.mxu1 %v10147_v27  ;;  %v10159_v35 = vld [vmem:[%s15131_s7 + $0x2a8] ss:$48 sps:$4 sm:$0xff]  }
 0x228   : > { %2977 = vmatprep.subr.bf16.mxu1 %v10152_v28 }
 0x22b   : > { %2978 = vmatpush1.bf16.msra.mxu1 %v10150_v29 }
 0x22c   : > { %2979 = vmatprep.subr.bf16.mxu1 %v10155_v30  ;;  %v12395_v30 = vsub.s32 %v1583_v18, %v11852_v46 }
 0x22e   : > { %9926 = vmatpush1.bf16.xpose.msra.mxu0 %v9925_v44  ;;  %v10171_v44 = vld [vmem:[%s15131_s7 + $0x130] ss:$48 sps:$4 sm:$0xff]  }
 0x22f   : > { %9929 = vmatprep.subr.msk.bf16.mxu0 %vm12057_vm3, %v9927_v53  ;;  %2980 = vmatpush1.bf16.msra.mxu1 %v10153_v31  ;;  %v10185_v53 = vld [vmem:[%s15131_s7 + $0x2b4] ss:$48 sps:$4 sm:$0xff]   ;;  %v9935_v31 = vpack.c.bf16 %v689_v22, %v687_v21  ;;  %v10267_v21 = vld [vmem:[%s15130_s6 + $0xc8] ss:$48 sps:$4 sm:$0xff]  }
 0x230   : > { %2981 = vmatprep.subr.bf16.mxu1 %v10158_v32  ;;  %v9937_v32 = vpack.c.bf16 %v694_v24, %v692_v23  ;;  %v707_v22 = vld [vmem:[%s12050_s19 + $0x2a0] sm:$0xff]  ;;  %v709_v23 = vld [vmem:[%s12050_s19 + $0x2b0] sm:$0xff]  ;;  %v712_v24 = vld [vmem:[%s12050_s19 + $0x2c8] sm:$0xff] }
 0x233   : > { %2982 = vmatpush1.bf16.msra.mxu1 %v10156_v33 }
 0x234   : > { %2983 = vmatprep.subr.bf16.mxu1 %v10161_v34 }
 0x236   : > { %9931 = vmatpush1.bf16.xpose.msra.mxu0 %v9930_v59  ;;  %v10191_v59 = vld [vmem:[%s15131_s7 + $0x7c] ss:$48 sps:$4 sm:$0xff]  }
 0x237   : > { %9934 = vmatprep.subr.msk.bf16.mxu0 %vm12057_vm3, %v9932_v1  ;;  %2984 = vmatpush1.bf16.msra.mxu1 %v10159_v35  ;;  %v10195_v1 = vld [vmem:[%s15131_s7 + $0x138] ss:$48 sps:$4 sm:$0xff]   ;;  %v691_v35 = vld [vmem:[%s12050_s19 + $0x220] sm:$0xff] }
 0x23a   : > { %3002 = vmatmul.mubr.bf16.vlgmr.msra.gmra.mrb[4].mxu1 %v12226_v20 }
 0x23b   : > { %3042 = vmatprep.mubr.bf16.mxu1 %v11721_v0 }
 0x28a   : > { %v1563_v36 = vpop.xlane.xlu0 %1562 }
 0x28b   : > { %v1564_v37 = vsub.f32 %v12037_v58, %v1563_v36  ;;  %v1565_v38 = vsub.f32 %v12041_v60, %v1563_v36  ;;  %v10164_v36 = vld [vmem:[%s15131_s7 + $0x14] ss:$48 sps:$4 sm:$0xff]  }
 0x28c   : > { %3010 = vmatprep.subr.bf16.mxu1 %v10164_v36  ;;  %v693_v36 = vld [vmem:[%s12050_s19 + $0x230] sm:$0xff] }
 0x28d   : > { %v1566_v41 = vmul.f32 1.442695, %v1564_v37  ;;  %v1568_v42 = vmul.f32 1.442695, %v1565_v38  ;;  %v10162_v37 = vld [vmem:[%s15131_s7 + $0x10] ss:$48 sps:$4 sm:$0xff]  }
 0x28e   : > { %v10167_v38 = vld [vmem:[%s15131_s7 + $0x74] ss:$48 sps:$4 sm:$0xff]   ;;  %3011 = vmatpush1.bf16.msra.mxu1 %v10162_v37 }
 0x28f   : > { %11666 = vpow2.f32 %v1566_v41  ;;  %3012 = vmatprep.subr.bf16.mxu1 %v10167_v38  ;;  %v10168_v41 = vld [vmem:[%s15131_s7 + $0xd0] ss:$48 sps:$4 sm:$0xff]   ;;  %v696_v38 = vld [vmem:[%s12050_s19 + $0x248] sm:$0xff] }
 0x290   : > { %11668 = vpow2.f32 %v1568_v42  ;;  %v10173_v42 = vld [vmem:[%s15131_s7 + $0x134] ss:$48 sps:$4 sm:$0xff]  }
 0x292   : > { %3013 = vmatpush1.bf16.msra.mxu1 %v10165_v39  ;;  %v698_v39 = vld [vmem:[%s12050_s19 + $0x258] sm:$0xff] }
 0x293   : > { %3014 = vmatprep.subr.bf16.mxu1 %v10170_v40  ;;  %v10227_v40 = vld [vmem:[%s15131_s7 + $0x14c] ss:$48 sps:$4 sm:$0xff]  }
 0x296   : > { %3015 = vmatpush1.bf16.msra.mxu1 %v10168_v41  ;;  %v10225_v41 = vld [vmem:[%s15131_s7 + $0x148] ss:$48 sps:$4 sm:$0xff]  }
 0x297   : > { %3016 = vmatprep.subr.bf16.mxu1 %v10173_v42  ;;  %v9940_v42 = vpack.c.bf16 %v693_v36, %v691_v35  ;;  %v716_v35 = vld [vmem:[%s12050_s19 + $0x2e8] sm:$0xff]  ;;  %v718_v36 = vld [vmem:[%s12050_s19 + $0x2f8] sm:$0xff] }
 0x299   : > { %v12150_v45 = vpop.eup %11666 }
 0x29a   : > { %v12152_v58 = vpop.eup %11668  ;;  %v1570_v60 = vsel %vm1557_vm0, %v12150_v45, 0.0  ;;  %3017 = vmatpush1.bf16.msra.mxu1 %v10171_v44  ;;  %v9942_v44 = vpack.c.bf16 %v698_v39, %v696_v38  ;;  %v10285_v38 = vld [vmem:[%s15130_s6 + $0x1e8] ss:$48 sps:$4 sm:$0xff]  }
 0x29b   : > { %v1571_v48 = vsel %vm1559_vm1, %v12152_v58, 0.0 }
 0x29c   : > { %v1572_v49 = vadd.f32 %v1571_v48, %v1570_v60  ;;  %v10176_v60 = vld [vmem:[%s15131_s7 + $0x194] ss:$48 sps:$4 sm:$0xff]   ;;  %v10174_v48 = vld [vmem:[%s15131_s7 + $0x190] ss:$48 sps:$4 sm:$0xff]  }
 0x29d   : > { %3018 = vmatprep.subr.bf16.mxu1 %v10176_v60  ;;  %v10233_v60 = vld [vmem:[%s15131_s7 + $0x1ac] ss:$48 sps:$4 sm:$0xff]  }
 0x29e   : > { %1573 = vadd.xlane.f32.xlu1 %v1572_v49  ;;  %v10179_v49 = vld [vmem:[%s15131_s7 + $0x1f4] ss:$48 sps:$4 sm:$0xff]   ;;  %3019 = vmatpush1.bf16.msra.mxu1 %v10174_v48  ;;  %v10231_v48 = vld [vmem:[%s15131_s7 + $0x1a8] ss:$48 sps:$4 sm:$0xff]  }
 0x29f   : > { %3020 = vmatprep.subr.bf16.mxu1 %v10179_v49  ;;  %v695_v49 = vld [vmem:[%s12050_s19 + $0x240] sm:$0xff] }
 0x2a2   : > { %3021 = vmatpush1.bf16.msra.mxu1 %v10177_v50  ;;  %v697_v50 = vld [vmem:[%s12050_s19 + $0x250] sm:$0xff] }
 0x2a3   : > { %3022 = vmatprep.subr.bf16.mxu1 %v10182_v51  ;;  %v700_v51 = vld [vmem:[%s12050_s19 + $0x268] sm:$0xff] }
 0x2a6   : > { %3023 = vmatpush1.bf16.msra.mxu1 %v10180_v52  ;;  %v702_v52 = vld [vmem:[%s12050_s19 + $0x278] sm:$0xff] }
 0x2a7   : > { %3024 = vmatprep.subr.bf16.mxu1 %v10185_v53  ;;  %v10239_v53 = vld [vmem:[%s15131_s7 + $0x20c] ss:$48 sps:$4 sm:$0xff]  }
 0x2aa   : > { %3025 = vmatpush1.bf16.msra.mxu1 %v10183_v54  ;;  %v10237_v54 = vld [vmem:[%s15131_s7 + $0x208] ss:$48 sps:$4 sm:$0xff]  }
 0x2ab   : > { %3051 = vmatprep.subr.bf16.mxu1 %v10188_v56  ;;  %v9945_v56 = vpack.c.bf16 %v697_v50, %v695_v49  ;;  %v722_v49 = vld [vmem:[%s12050_s19 + $0x318] sm:$0xff] }
 0x2ac   : > { %v10299_v50 = vld [vmem:[%s15130_s6 + $0x2ac] ss:$48 sps:$4 sm:$0xff]  }
 0x2ad   : > { %3043 = vmatmul.mubr.bf16.vlgmr.msra.gmra.mrb[8].mxu1 %v12226_v20 }
 0x2ae   : > { %3052 = vmatpush1.bf16.msra.mxu1 %v10186_v57  ;;  %3083 = vmatprep.mubr.bf16.mxu1 %v11721_v0  ;;  %v9947_v57 = vpack.c.bf16 %v702_v52, %v700_v51  ;;  %v10297_v51 = vld [vmem:[%s15130_s6 + $0x2a8] ss:$48 sps:$4 sm:$0xff]  }
 0x2af   : > { %3053 = vmatprep.subr.bf16.mxu1 %v10191_v59  ;;  %v10245_v59 = vld [vmem:[%s15131_s7 + $0x26c] ss:$48 sps:$4 sm:$0xff]  }
 0x2b2   : > { %3054 = vmatpush1.bf16.msra.mxu1 %v10189_v61  ;;  %v10243_v61 = vld [vmem:[%s15131_s7 + $0x268] ss:$48 sps:$4 sm:$0xff]  }
 0x2b3   : > { %3055 = vmatprep.subr.bf16.mxu1 %v10194_v62  ;;  %v699_v62 = vld [vmem:[%s12050_s19 + $0x260] sm:$0xff] }
 0x2b6   : > { %3056 = vmatpush1.bf16.msra.mxu1 %v10192_v26  ;;  %v701_v26 = vld [vmem:[%s12050_s19 + $0x270] sm:$0xff] }
 0x2b7   : > { %3057 = vmatprep.subr.bf16.mxu1 %v10197_v63  ;;  %v704_v63 = vld [vmem:[%s12050_s19 + $0x288] sm:$0xff] }
 0x2ba   : > { %3058 = vmatpush1.bf16.msra.mxu1 %v10195_v1  ;;  %v706_v1 = vld [vmem:[%s12050_s19 + $0x298] sm:$0xff] }
 0x2bb   : > { %3059 = vmatprep.subr.bf16.mxu1 %v10200_v2  ;;  %v10251_v2 = vld [vmem:[%s15131_s7 + $0x2cc] ss:$48 sps:$4 sm:$0xff]  }
 0x2be   : > { %3060 = vmatpush1.bf16.msra.mxu1 %v10198_v4  ;;  %v10249_v4 = vld [vmem:[%s15131_s7 + $0x2c8] ss:$48 sps:$4 sm:$0xff]  }
 0x2bf   : > { %3061 = vmatprep.subr.bf16.mxu1 %v10203_v5  ;;  %v9950_v5 = vpack.c.bf16 %v701_v26, %v699_v62  ;;  %v726_v62 = vld [vmem:[%s12050_s19 + $0x338] sm:$0xff] }
 0x2c0   : > { %v10311_v26 = vld [vmem:[%s15130_s6 + $0x36c] ss:$48 sps:$4 sm:$0xff]  }
 0x2c2   : > { %3062 = vmatpush1.bf16.msra.mxu1 %v10201_v6  ;;  %v9952_v6 = vpack.c.bf16 %v706_v1, %v704_v63  ;;  %v10309_v63 = vld [vmem:[%s15130_s6 + $0x368] ss:$48 sps:$4 sm:$0xff]  }
 0x2c3   : > { %3063 = vmatprep.subr.bf16.mxu1 %v10206_v7  ;;  %v10257_v7 = vld [vmem:[%s15130_s6 + $0xc] ss:$48 sps:$4 sm:$0xff]  }
 0x2c6   : > { %3064 = vmatpush1.bf16.msra.mxu1 %v10204_v9  ;;  %v10255_v9 = vld [vmem:[%s15130_s6 + $0x8] ss:$48 sps:$4 sm:$0xff]  }
 0x2c7   : > { %3065 = vmatprep.subr.bf16.mxu1 %v10209_v11  ;;  %v705_v11 = vld [vmem:[%s12050_s19 + $0x290] sm:$0xff] }
 0x2ca   : > { %3066 = vmatpush1.bf16.msra.mxu1 %v10207_v13  ;;  %v708_v13 = vld [vmem:[%s12050_s19 + $0x2a8] sm:$0xff] }
 0x2cb   : > { %3133 = vmatprep.subr.bf16.mxu1 %v10212_v16  ;;  %v10261_v16 = vld [vmem:[%s15130_s6 + $0x68] ss:$48 sps:$4 sm:$0xff]   ;;  %v9957_v18 = vpack.c.bf16 %v710_v14, %v708_v13 }
 0x2cc   : > { %v10321_v13 = vld [vmem:[%s15130_s6 + $0x428] ss:$48 sps:$4 sm:$0xff]  }
 0x2cd   : > { %3084 = vmatmul.mubr.bf16.vlgmr.msra.gmra.mrb[12].mxu1 %v12226_v20 }
 0x2ce   : > { %3134 = vmatpush1.bf16.msra.mxu1 %v10210_v17  ;;  %3165 = vmatprep.mubr.bf16.mxu1 %v11721_v0 }
 0x2cf   : > { %3135 = vmatprep.subr.bf16.mxu1 %v10215_v19  ;;  %v10269_v19 = vld [vmem:[%s15130_s6 + $0xcc] ss:$48 sps:$4 sm:$0xff]  }
 0x2d2   : > { %3136 = vmatpush1.bf16.msra.mxu1 %v10213_v25  ;;  %v714_v25 = vld [vmem:[%s12050_s19 + $0x2d8] sm:$0xff] }
 0x32b   : > { %v1574_v10 = vpop.xlane.xlu1 %1573 }
 0x32c   : > { %11670 = vrcp.f32 %v1574_v10  ;;  %v703_v10 = vld [vmem:[%s12050_s19 + $0x280] sm:$0xff] }
 0x32d   : > { %v9955_v17 = vpack.c.bf16 %v705_v11, %v703_v10  ;;  %v730_v10 = vld [vmem:[%s12050_s19 + $0x358] sm:$0xff] }
 0x32e   : > { %v10323_v11 = vld [vmem:[%s15130_s6 + $0x42c] ss:$48 sps:$4 sm:$0xff]  }
 0x336   : > { %v11671_v27 = vpop.eup %11670 }
 0x337   : > { %v1577_v28 = vmul.f32 %v11671_v27, %v12152_v58  ;;  %v12392_v29 = vmul.f32 %v11671_v27, %v12150_v45  ;;  %v10221_v45 = vld [vmem:[%s15131_s7 + $0xec] ss:$48 sps:$4 sm:$0xff]   ;;  %v10219_v58 = vld [vmem:[%s15131_s7 + $0xe8] ss:$48 sps:$4 sm:$0xff]  }
 0x338   : > { %3137 = vmatprep.subr.bf16.mxu1 %v10221_v45  ;;  %v10275_v27 = vld [vmem:[%s15130_s6 + $0x12c] ss:$48 sps:$4 sm:$0xff]   ;;  %v10279_v45 = vld [vmem:[%s15130_s6 + $0x188] ss:$48 sps:$4 sm:$0xff]  }
 0x339   : > { %8813 = vmatprep.mubr.msk.f32.mxu0 %vm1601_vm2, %v1577_v28  ;;  %v1580_v33 = vcombine.low %v12392_v29, %v1577_v28  ;;  %3138 = vmatpush1.bf16.msra.mxu1 %v10219_v58  ;;  %v711_v58 = vld [vmem:[%s12050_s19 + $0x2c0] sm:$0xff] }
 0x33a   : > { %1861 = vmatmul.mubr.f32.vlgmr.msra.gmra.mrb[2].mxu0 %v12392_v29  ;;  %3139 = vmatprep.subr.bf16.mxu1 %v10227_v40  ;;  %v9967_v40 = vpack.c.bf16 %v718_v36, %v716_v35  ;;  %v10345_v35 = vld [vmem:[%s15130_s6 + $0x5a8] ss:$48 sps:$4 sm:$0xff]  }
 0x33b   : > { %v1587_v34 = vrot.slane %v1580_v33, %v12395_v30  ;;  %9936 = vmatpush1.bf16.xpose.msra.mxu0 %v9935_v31  ;;  %8846 = vmatprep.mubr.msk.f32.mxu0 %vm1601_vm2, %v1577_v28  ;;  %v10273_v28 = vld [vmem:[%s15130_s6 + $0x128] ss:$48 sps:$4 sm:$0xff]   ;;  %v9960_v31 = vpack.c.bf16 %v709_v23, %v707_v22  ;;  %v10281_v33 = vld [vmem:[%s15130_s6 + $0x18c] ss:$48 sps:$4 sm:$0xff]  }
 0x33c   : > { %9939 = vmatprep.subr.msk.bf16.mxu0 %vm12057_vm3, %v9937_v32  ;;  %v9962_v32 = vpack.c.bf16 %v714_v25, %v712_v24  ;;  %v734_v22 = vld [vmem:[%s12050_s19 + $0x378] sm:$0xff] }
 0x33d   : > { %v1594_v37 = vrot.slane %v1587_v34, %v12395_v30  ;;  %3140 = vmatpush1.bf16.msra.mxu1 %v10225_v41  ;;  %v713_v34 = vld [vmem:[%s12050_s19 + $0x2d0] sm:$0xff]  ;;  %v10293_v41 = vld [vmem:[%s15130_s6 + $0x24c] ss:$48 sps:$4 sm:$0xff]   ;;  %v10333_v24 = vld [vmem:[%s15130_s6 + $0x4e8] ss:$48 sps:$4 sm:$0xff]  }
 0x33e   : > { %3141 = vmatprep.subr.bf16.mxu1 %v10233_v60  ;;  %v9965_v39 = vpack.c.bf16 %v713_v34, %v711_v58  ;;  %v717_v60 = vld [vmem:[%s12050_s19 + $0x2f0] sm:$0xff]  ;;  %v10335_v23 = vld [vmem:[%s15130_s6 + $0x4ec] ss:$48 sps:$4 sm:$0xff]  }
 0x33f   : > { %1600 = vst.msk [vmem:[%s489_s15] sm:$0x3] %vm1598_vm4, %v1594_v37  ;;  %v10287_v37 = vld [vmem:[%s15130_s6 + $0x1ec] ss:$48 sps:$4 sm:$0xff]  }
 0x340   : > { %v738_v58 = vld [vmem:[%s12050_s19 + $0x398] sm:$0xff] }
 0x341   : > { %3142 = vmatpush1.bf16.msra.mxu1 %v10231_v48  ;;  %v720_v48 = vld [vmem:[%s12050_s19 + $0x308] sm:$0xff] }
 0x342   : > { %3143 = vmatprep.subr.bf16.mxu1 %v10239_v53  ;;  %v9972_v53 = vpack.c.bf16 %v722_v49, %v720_v48  ;;  %v10347_v34 = vld [vmem:[%s15130_s6 + $0x5ac] ss:$48 sps:$4 sm:$0xff]   ;;  %v739_v48 = vld [vmem:[%s12050_s19 + $0x3a0] sm:$0xff]  ;;  %v741_v49 = vld [vmem:[%s12050_s19 + $0x3b0] sm:$0xff] }
 0x343   : > { %9941 = vmatpush1.bf16.xpose.msra.mxu0 %v9940_v42  ;;  %v10291_v42 = vld [vmem:[%s15130_s6 + $0x248] ss:$48 sps:$4 sm:$0xff]  }
 0x344   : > { %9944 = vmatprep.subr.msk.bf16.mxu0 %vm12057_vm3, %v9942_v44  ;;  %v715_v44 = vld [vmem:[%s12050_s19 + $0x2e0] sm:$0xff] }
 0x345   : > { %3144 = vmatpush1.bf16.msra.mxu1 %v10237_v54  ;;  %v9970_v52 = vpack.c.bf16 %v717_v60, %v715_v44  ;;  %v10305_v54 = vld [vmem:[%s15130_s6 + $0x30c] ss:$48 sps:$4 sm:$0xff]  }
 0x346   : > { %3145 = vmatprep.subr.bf16.mxu1 %v10245_v59  ;;  %v721_v59 = vld [vmem:[%s12050_s19 + $0x310] sm:$0xff]  ;;  %v10359_v60 = vld [vmem:[%s15130_s6 + $0x60c] ss:$48 sps:$4 sm:$0xff]  }
 0x349   : > { %3146 = vmatpush1.bf16.msra.mxu1 %v10243_v61  ;;  %v724_v61 = vld [vmem:[%s12050_s19 + $0x328] sm:$0xff] }
 0x34a   : > { %3147 = vmatprep.subr.bf16.mxu1 %v10251_v2  ;;  %v9977_v2 = vpack.c.bf16 %v726_v62, %v724_v61 }
 0x34b   : > { %9946 = vmatpush1.bf16.xpose.msra.mxu0 %v9945_v56  ;;  %v10303_v56 = vld [vmem:[%s15130_s6 + $0x308] ss:$48 sps:$4 sm:$0xff]  }
 0x34c   : > { %9949 = vmatprep.subr.msk.bf16.mxu0 %vm12057_vm3, %v9947_v57  ;;  %v719_v57 = vld [vmem:[%s12050_s19 + $0x300] sm:$0xff] }
 0x34d   : > { %3148 = vmatpush1.bf16.msra.mxu1 %v10249_v4  ;;  %v9975_v1 = vpack.c.bf16 %v721_v59, %v719_v57  ;;  %v10317_v4 = vld [vmem:[%s15130_s6 + $0x3cc] ss:$48 sps:$4 sm:$0xff]  }
 0x34e   : > { %5176 = vmatprep.subr.bf16.mxu1 %v10257_v7  ;;  %v725_v7 = vld [vmem:[%s12050_s19 + $0x330] sm:$0xff]  ;;  %v748_v57 = vld [vmem:[%s12050_s19 + $0x3e8] sm:$0xff]  ;;  %v750_v59 = vld [vmem:[%s12050_s19 + $0x3f8] sm:$0xff] }
 0x34f   : > { %v10007_v62 = vpack.c.bf16 %v750_v59, %v748_v57 }
 0x350   : > { %3166 = vmatmul.mubr.bf16.vlgmr.msra.gmra.mrb[16].mxu1 %v12226_v20 }
 0x351   : > { %5177 = vmatpush1.bf16.msra.mxu1 %v10255_v9  ;;  %v728_v9 = vld [vmem:[%s12050_s19 + $0x348] sm:$0xff] }
 0x352   : > { %5178 = vmatprep.subr.bf16.mxu1 %v10263_v15  ;;  %v9982_v15 = vpack.c.bf16 %v730_v10, %v728_v9  ;;  %v10216_v9 = vld [vmem:[%s15131_s7 + $0x20] ss:$48 sps:$4 sm:$0xff]  }
 0x353   : > { %9951 = vmatpush1.bf16.xpose.msra.mxu0 %v9950_v5  ;;  %v10315_v5 = vld [vmem:[%s15130_s6 + $0x3c8] ss:$48 sps:$4 sm:$0xff]   ;;  %v10222_v10 = vld [vmem:[%s15131_s7 + $0x80] ss:$48 sps:$4 sm:$0xff]  }
 0x354   : > { %9954 = vmatprep.subr.msk.bf16.mxu0 %vm12057_vm3, %v9952_v6  ;;  %v723_v6 = vld [vmem:[%s12050_s19 + $0x320] sm:$0xff] }
 0x355   : > { %5179 = vmatpush1.bf16.msra.mxu1 %v10261_v16  ;;  %v9980_v14 = vpack.c.bf16 %v725_v7, %v723_v6  ;;  %v10329_v16 = vld [vmem:[%s15130_s6 + $0x48c] ss:$48 sps:$4 sm:$0xff]   ;;  %v10218_v7 = vld [vmem:[%s15131_s7 + $0x24] ss:$48 sps:$4 sm:$0xff]  }
 0x356   : > { %5180 = vmatprep.subr.bf16.mxu1 %v10269_v19  ;;  %v729_v19 = vld [vmem:[%s12050_s19 + $0x350] sm:$0xff] }
 0x359   : > { %5181 = vmatpush1.bf16.msra.mxu1 %v10267_v21  ;;  %v732_v21 = vld [vmem:[%s12050_s19 + $0x368] sm:$0xff] }
 0x35a   : > { %5182 = vmatprep.subr.bf16.mxu1 %v10275_v27  ;;  %v9987_v27 = vpack.c.bf16 %v734_v22, %v732_v21  ;;  %v10260_v21 = vld [vmem:[%s15131_s7 + $0x2c4] ss:$48 sps:$4 sm:$0xff]   ;;  %v10258_v22 = vld [vmem:[%s15131_s7 + $0x2c0] ss:$48 sps:$4 sm:$0xff]  }
 0x35b   : > { %9956 = vmatpush1.bf16.xpose.msra.mxu0 %v9955_v17  ;;  %v10327_v17 = vld [vmem:[%s15130_s6 + $0x488] ss:$48 sps:$4 sm:$0xff]  }
 0x35c   : > { %9959 = vmatprep.subr.msk.bf16.mxu0 %vm12057_vm3, %v9957_v18  ;;  %v727_v18 = vld [vmem:[%s12050_s19 + $0x340] sm:$0xff] }
 0x35d   : > { %5183 = vmatpush1.bf16.msra.mxu1 %v10273_v28  ;;  %v9985_v25 = vpack.c.bf16 %v729_v19, %v727_v18  ;;  %v10341_v28 = vld [vmem:[%s15130_s6 + $0x54c] ss:$48 sps:$4 sm:$0xff]   ;;  %v10254_v18 = vld [vmem:[%s15131_s7 + $0x264] ss:$48 sps:$4 sm:$0xff]   ;;  %v10252_v19 = vld [vmem:[%s15131_s7 + $0x260] ss:$48 sps:$4 sm:$0xff]  }
 0x35e   : > { %5184 = vmatprep.subr.bf16.mxu1 %v10281_v33  ;;  %v733_v33 = vld [vmem:[%s12050_s19 + $0x370] sm:$0xff] }
 0x361   : > { %5185 = vmatpush1.bf16.msra.mxu1 %v10279_v45  ;;  %v736_v45 = vld [vmem:[%s12050_s19 + $0x388] sm:$0xff] }
 0x362   : > { %5186 = vmatprep.subr.bf16.mxu1 %v10287_v37  ;;  %v9992_v37 = vpack.c.bf16 %v738_v58, %v736_v45  ;;  %v10288_v45 = vld [vmem:[%s15130_s6 + $0x180] ss:$48 sps:$4 sm:$0xff]   ;;  %v10296_v58 = vld [vmem:[%s15130_s6 + $0x1e4] ss:$48 sps:$4 sm:$0xff]  }
 0x363   : > { %9961 = vmatpush1.bf16.xpose.msra.mxu0 %v9960_v31  ;;  %v10339_v31 = vld [vmem:[%s15130_s6 + $0x548] ss:$48 sps:$4 sm:$0xff]  }
 0x364   : > { %9964 = vmatprep.subr.msk.bf16.mxu0 %vm12057_vm3, %v9962_v32  ;;  %v731_v32 = vld [vmem:[%s12050_s19 + $0x360] sm:$0xff] }
 0x365   : > { %5187 = vmatpush1.bf16.msra.mxu1 %v10285_v38  ;;  %v9990_v36 = vpack.c.bf16 %v733_v33, %v731_v32  ;;  %v735_v38 = vld [vmem:[%s12050_s19 + $0x380] sm:$0xff] }
 0x366   : > { %5188 = vmatprep.subr.bf16.mxu1 %v10293_v41  ;;  %v742_v41 = vld [vmem:[%s12050_s19 + $0x3b8] sm:$0xff]  ;;  %v10282_v32 = vld [vmem:[%s15130_s6 + $0x120] ss:$48 sps:$4 sm:$0xff]   ;;  %v10290_v33 = vld [vmem:[%s15130_s6 + $0x184] ss:$48 sps:$4 sm:$0xff]  }
 0x369   : > { %5189 = vmatpush1.bf16.msra.mxu1 %v10291_v42 }
 0x36a   : > { %5190 = vmatprep.subr.bf16.mxu1 %v10299_v50  ;;  %v744_v50 = vld [vmem:[%s12050_s19 + $0x3c8] sm:$0xff] }
 0x36b   : > { %9966 = vmatpush1.bf16.xpose.msra.mxu0 %v9965_v39  ;;  %v737_v39 = vld [vmem:[%s12050_s19 + $0x390] sm:$0xff] }
 0x36c   : > { %9969 = vmatprep.subr.msk.bf16.mxu0 %vm12057_vm3, %v9967_v40  ;;  %v740_v40 = vld [vmem:[%s12050_s19 + $0x3a8] sm:$0xff]  ;;  %v9995_v42 = vpack.c.bf16 %v737_v39, %v735_v38  ;;  %v10306_v38 = vld [vmem:[%s15130_s6 + $0x2a0] ss:$48 sps:$4 sm:$0xff]   ;;  %v10314_v39 = vld [vmem:[%s15130_s6 + $0x304] ss:$48 sps:$4 sm:$0xff]  }
 0x36d   : > { %5191 = vmatpush1.bf16.msra.mxu1 %v10297_v51  ;;  %v9997_v44 = vpack.c.bf16 %v742_v41, %v740_v40  ;;  %v746_v51 = vld [vmem:[%s12050_s19 + $0x3d8] sm:$0xff]  ;;  %v10312_v40 = vld [vmem:[%s15130_s6 + $0x300] ss:$48 sps:$4 sm:$0xff]   ;;  %v10320_v41 = vld [vmem:[%s15130_s6 + $0x364] ss:$48 sps:$4 sm:$0xff]  }
 0x36e   : > { %5192 = vmatprep.subr.bf16.mxu1 %v10305_v54  ;;  %v743_v54 = vld [vmem:[%s12050_s19 + $0x3c0] sm:$0xff] }
 0x371   : > { %5193 = vmatpush1.bf16.msra.mxu1 %v10303_v56  ;;  %v745_v56 = vld [vmem:[%s12050_s19 + $0x3d0] sm:$0xff] }
 0x372   : > { %5194 = vmatprep.subr.bf16.mxu1 %v10311_v26  ;;  %v10005_v61 = vpack.c.bf16 %v745_v56, %v743_v54  ;;  %v12628_v26 = vpop.f32.mrb[0].mxu1  ;;  %v10350_v54 = vld [vmem:[%s15130_s6 + $0x544] ss:$48 sps:$4 sm:$0xff]  }
 0x373   : > { %9971 = vmatpush1.bf16.xpose.msra.mxu0 %v9970_v52  ;;  %v10000_v52 = vpack.c.bf16 %v741_v49, %v739_v48  ;;  %v10332_v48 = vld [vmem:[%s15130_s6 + $0x424] ss:$48 sps:$4 sm:$0xff]   ;;  %v10330_v49 = vld [vmem:[%s15130_s6 + $0x420] ss:$48 sps:$4 sm:$0xff]  }
 0x374   : > { %9974 = vmatprep.subr.msk.bf16.mxu0 %vm12057_vm3, %v9972_v53  ;;  %v10002_v53 = vpack.c.bf16 %v746_v51, %v744_v50  ;;  %v10338_v50 = vld [vmem:[%s15130_s6 + $0x484] ss:$48 sps:$4 sm:$0xff]   ;;  %v10336_v51 = vld [vmem:[%s15130_s6 + $0x480] ss:$48 sps:$4 sm:$0xff]  }
 0x375   : > { %5195 = vmatpush1.bf16.msra.mxu1 %v10309_v63  ;;  %v12630_v63 = vpop.f32.mrb[1].mxu1 }
 0x376   : > { %5196 = vmatprep.subr.bf16.mxu1 %v10317_v4  ;;  %v2966_v4 = vpop.f32.mrb[2].mxu1 }
 0x377   : > { %v10365_v4 = vld [vmem:[%s15130_s6 + $0x66c] ss:$48 sps:$4 sm:$0xff]  }
 0x379   : > { %5197 = vmatpush1.bf16.msra.mxu1 %v10315_v5  ;;  %v2967_v5 = vpop.f32.mrb[3].mxu1 }
 0x37a   : > { %5198 = vmatprep.subr.bf16.mxu1 %v10323_v11  ;;  %v10230_v11 = vld [vmem:[%s15131_s7 + $0xe4] ss:$48 sps:$4 sm:$0xff]   ;;  %v10351_v5 = vld [vmem:[%s15130_s6 + $0x5a0] ss:$48 sps:$4 sm:$0xff]  }
 0x37b   : > { %9976 = vmatpush1.bf16.xpose.msra.mxu0 %v9975_v1  ;;  %v747_v1 = vld [vmem:[%s12050_s19 + $0x3e0] sm:$0xff] }
 0x37c   : > { %9979 = vmatprep.subr.msk.bf16.mxu0 %vm12057_vm3, %v9977_v2  ;;  %v749_v2 = vld [vmem:[%s12050_s19 + $0x3f0] sm:$0xff] }
 0x37d   : > { %5199 = vmatpush1.bf16.msra.mxu1 %v10321_v13  ;;  %v10010_v6 = vpack.c.bf16 %v749_v2, %v747_v1  ;;  %v10228_v13 = vld [vmem:[%s15131_s7 + $0xe0] ss:$48 sps:$4 sm:$0xff]   ;;  %v10353_v2 = vld [vmem:[%s15130_s6 + $0x5a4] ss:$48 sps:$4 sm:$0xff]  }
 0x37e   : > { %5200 = vmatprep.subr.bf16.mxu1 %v10329_v16  ;;  %v10248_v16 = vld [vmem:[%s15131_s7 + $0x204] ss:$48 sps:$4 sm:$0xff]  }
 0x381   : > { %5201 = vmatpush1.bf16.msra.mxu1 %v10327_v17  ;;  %v10246_v17 = vld [vmem:[%s15131_s7 + $0x200] ss:$48 sps:$4 sm:$0xff]  }
 0x382   : > { %5202 = vmatprep.subr.bf16.mxu1 %v10335_v23  ;;  %v10266_v23 = vld [vmem:[%s15130_s6 + $0x4] ss:$48 sps:$4 sm:$0xff]  }
 0x383   : > { %9981 = vmatpush1.bf16.xpose.msra.mxu0 %v9980_v14  ;;  %v10242_v14 = vld [vmem:[%s15131_s7 + $0x1a4] ss:$48 sps:$4 sm:$0xff]  }
 0x384   : > { %9984 = vmatprep.subr.msk.bf16.mxu0 %vm12057_vm3, %v9982_v15  ;;  %v10240_v15 = vld [vmem:[%s15131_s7 + $0x1a0] ss:$48 sps:$4 sm:$0xff]  }
 0x385   : > { %5203 = vmatpush1.bf16.msra.mxu1 %v10333_v24  ;;  %v10264_v24 = vld [vmem:[%s15130_s6] ss:$48 sps:$4 sm:$0xff]  }
 0x386   : > { %5204 = vmatprep.subr.bf16.mxu1 %v10341_v28  ;;  %v10278_v28 = vld [vmem:[%s15130_s6 + $0xc4] ss:$48 sps:$4 sm:$0xff]  }
 0x389   : > { %5205 = vmatpush1.bf16.msra.mxu1 %v10339_v31  ;;  %v10276_v31 = vld [vmem:[%s15130_s6 + $0xc0] ss:$48 sps:$4 sm:$0xff]  }
 0x38a   : > { %5206 = vmatprep.subr.bf16.mxu1 %v10347_v34  ;;  %v10294_v34 = vld [vmem:[%s15130_s6 + $0x1e0] ss:$48 sps:$4 sm:$0xff]  }
 0x38b   : > { %9986 = vmatpush1.bf16.xpose.msra.mxu0 %v9985_v25  ;;  %v10272_v25 = vld [vmem:[%s15130_s6 + $0x64] ss:$48 sps:$4 sm:$0xff]  }
 0x38c   : > { %9989 = vmatprep.subr.msk.bf16.mxu0 %vm12057_vm3, %v9987_v27  ;;  %v10270_v27 = vld [vmem:[%s15130_s6 + $0x60] ss:$48 sps:$4 sm:$0xff]  }
 0x38d   : > { %5207 = vmatpush1.bf16.msra.mxu1 %v10345_v35  ;;  %v10302_v35 = vld [vmem:[%s15130_s6 + $0x244] ss:$48 sps:$4 sm:$0xff]  }
 0x38e   : > { %5217 = vmatprep.subr.bf16.mxu1 %v10359_v60  ;;  %v10324_v60 = vld [vmem:[%s15130_s6 + $0x3c0] ss:$48 sps:$4 sm:$0xff]  }
 0x393   : > { %9991 = vmatpush1.bf16.xpose.msra.mxu0 %v9990_v36  ;;  %v10300_v36 = vld [vmem:[%s15130_s6 + $0x240] ss:$48 sps:$4 sm:$0xff]  }
 0x394   : > { %9994 = vmatprep.subr.msk.bf16.mxu0 %vm12057_vm3, %v9992_v37  ;;  %v10308_v37 = vld [vmem:[%s15130_s6 + $0x2a4] ss:$48 sps:$4 sm:$0xff]  }
 0x39b   : > { %9996 = vmatpush1.bf16.xpose.msra.mxu0 %v9995_v42  ;;  %v10318_v42 = vld [vmem:[%s15130_s6 + $0x360] ss:$48 sps:$4 sm:$0xff]  }
 0x39c   : > { %9999 = vmatprep.subr.msk.bf16.mxu0 %vm12057_vm3, %v9997_v44  ;;  %v10326_v44 = vld [vmem:[%s15130_s6 + $0x3c4] ss:$48 sps:$4 sm:$0xff]  }
 0x3a3   : > { %10001 = vmatpush1.bf16.xpose.msra.mxu0 %v10000_v52  ;;  %v10344_v52 = vld [vmem:[%s15130_s6 + $0x4e4] ss:$48 sps:$4 sm:$0xff]  }
 0x3a4   : > { %10004 = vmatprep.subr.msk.bf16.mxu0 %vm12057_vm3, %v10002_v53  ;;  %v10342_v53 = vld [vmem:[%s15130_s6 + $0x4e0] ss:$48 sps:$4 sm:$0xff]  }
 0x3ab   : > { %10006 = vmatpush1.bf16.xpose.msra.mxu0 %v10005_v61  ;;  %v10348_v61 = vld [vmem:[%s15130_s6 + $0x540] ss:$48 sps:$4 sm:$0xff]  }
 0x3ac   : > { %10009 = vmatprep.subr.msk.bf16.mxu0 %vm12057_vm3, %v10007_v62  ;;  %v10357_v62 = vld [vmem:[%s15130_s6 + $0x608] ss:$48 sps:$4 sm:$0xff]  }
 0x3b3   : > { %10011 = vmatpush1.bf16.xpose.msra.mxu0 %v10010_v6  ;;  %v10363_v6 = vld [vmem:[%s15130_s6 + $0x668] ss:$48 sps:$4 sm:$0xff]  }
 0x3b4   : > { %3092 = vmatprep.subr.bf16.mxu0 %v10218_v7  ;;  %v10356_v7 = vld [vmem:[%s15130_s6 + $0x604] ss:$48 sps:$4 sm:$0xff]  }
 0x3ba   : > { %1932 = vmatmul.mubr.f32.vlgmr.msra.gmra.mrb[4].mxu0 %v12392_v29  ;;  %v10236_v29 = vld [vmem:[%s15131_s7 + $0x144] ss:$48 sps:$4 sm:$0xff]  }
 0x3bb   : > { %3093 = vmatpush1.bf16.msra.mxu0 %v10216_v9  ;;  %3124 = vmatprep.mubr.bf16.mxu0 %v11721_v0  ;;  %v10234_v0 = vld [vmem:[%s15131_s7 + $0x140] ss:$48 sps:$4 sm:$0xff]   ;;  %v10371_v9 = vld [vmem:[%s15130_s6 + $0x6cc] ss:$48 sps:$4 sm:$0xff]  }
 0x3bc   : > { %3094 = vmatprep.subr.bf16.mxu0 %v10224_v3  ;;  %v10354_v3 = vld [vmem:[%s15130_s6 + $0x600] ss:$48 sps:$4 sm:$0xff]  }
 0x3bf   : > { %3095 = vmatpush1.bf16.msra.mxu0 %v10222_v10  ;;  %v10369_v10 = vld [vmem:[%s15130_s6 + $0x6c8] ss:$48 sps:$4 sm:$0xff]  }
 0x3c0   : > { %3096 = vmatprep.subr.bf16.mxu0 %v10230_v11  ;;  %v10362_v11 = vld [vmem:[%s15130_s6 + $0x664] ss:$48 sps:$4 sm:$0xff]  }
 0x3c3   : > { %3097 = vmatpush1.bf16.msra.mxu0 %v10228_v13  ;;  %v10377_v13 = vld [vmem:[%s15130_s6 + $0x72c] ss:$48 sps:$4 sm:$0xff]  }
 0x3c4   : > { %3098 = vmatprep.subr.bf16.mxu0 %v10236_v29  ;;  %v10360_v29 = vld [vmem:[%s15130_s6 + $0x660] ss:$48 sps:$4 sm:$0xff]  }
 0x3c7   : > { %3099 = vmatpush1.bf16.msra.mxu0 %v10234_v0  ;;  %v10375_v0 = vld [vmem:[%s15130_s6 + $0x728] ss:$48 sps:$4 sm:$0xff]  }
 0x3c8   : > { %3100 = vmatprep.subr.bf16.mxu0 %v10242_v14  ;;  %v10368_v14 = vld [vmem:[%s15130_s6 + $0x6c4] ss:$48 sps:$4 sm:$0xff]  }
 0x3cb   : > { %3101 = vmatpush1.bf16.msra.mxu0 %v10240_v15  ;;  %v10383_v15 = vld [vmem:[%s15130_s6 + $0x78c] ss:$48 sps:$4 sm:$0xff]  }
 0x3cc   : > { %3102 = vmatprep.subr.bf16.mxu0 %v10248_v16  ;;  %v10366_v16 = vld [vmem:[%s15130_s6 + $0x6c0] ss:$48 sps:$4 sm:$0xff]  }
 0x3cf   : > { %3103 = vmatpush1.bf16.msra.mxu0 %v10246_v17  ;;  %v10381_v17 = vld [vmem:[%s15130_s6 + $0x788] ss:$48 sps:$4 sm:$0xff]  }
 0x3d0   : > { %3104 = vmatprep.subr.bf16.mxu0 %v10254_v18  ;;  %v10374_v18 = vld [vmem:[%s15130_s6 + $0x724] ss:$48 sps:$4 sm:$0xff]  }
 0x3d3   : > { %3105 = vmatpush1.bf16.msra.mxu0 %v10252_v19  ;;  %v10389_v19 = vld [vmem:[%s15130_s6 + $0x7ec] ss:$48 sps:$4 sm:$0xff]  }
 0x3d4   : > { %3106 = vmatprep.subr.bf16.mxu0 %v10260_v21  ;;  %v10372_v21 = vld [vmem:[%s15130_s6 + $0x720] ss:$48 sps:$4 sm:$0xff]  }
 0x3d7   : > { %3107 = vmatpush1.bf16.msra.mxu0 %v10258_v22  ;;  %v10387_v22 = vld [vmem:[%s15130_s6 + $0x7e8] ss:$48 sps:$4 sm:$0xff]  }
 0x3d8   : > { %5094 = vmatprep.subr.bf16.mxu0 %v10266_v23  ;;  %v10380_v23 = vld [vmem:[%s15130_s6 + $0x784] ss:$48 sps:$4 sm:$0xff]  }
 0x3da   : > { %3125 = vmatmul.mubr.bf16.vlgmr.msra.gmra.mrb[8].mxu0 %v12226_v20  ;;  %v10284_v20 = vld [vmem:[%s15130_s6 + $0x124] ss:$48 sps:$4 sm:$0xff]  }
 0x3db   : > { %5095 = vmatpush1.bf16.msra.mxu0 %v10264_v24  ;;  %v10395_v24 = vld [vmem:[%s15130_s6 + $0x84c] ss:$48 sps:$4 sm:$0xff]  }
 0x3dc   : > { %5096 = vmatprep.subr.bf16.mxu0 %v10272_v25  ;;  %v10378_v25 = vld [vmem:[%s15130_s6 + $0x780] ss:$48 sps:$4 sm:$0xff]  }
 0x3df   : > { %5097 = vmatpush1.bf16.msra.mxu0 %v10270_v27  ;;  %v10393_v27 = vld [vmem:[%s15130_s6 + $0x848] ss:$48 sps:$4 sm:$0xff]  }
 0x3e0   : > { %5098 = vmatprep.subr.bf16.mxu0 %v10278_v28  ;;  %v10386_v28 = vld [vmem:[%s15130_s6 + $0x7e4] ss:$48 sps:$4 sm:$0xff]  }
 0x3e3   : > { %5099 = vmatpush1.bf16.msra.mxu0 %v10276_v31  ;;  %v10401_v31 = vld [vmem:[%s15130_s6 + $0x8ac] ss:$48 sps:$4 sm:$0xff]  }
 0x3e4   : > { %5100 = vmatprep.subr.bf16.mxu0 %v10284_v20  ;;  %v10384_v20 = vld [vmem:[%s15130_s6 + $0x7e0] ss:$48 sps:$4 sm:$0xff]  }
 0x3e7   : > { %5101 = vmatpush1.bf16.msra.mxu0 %v10282_v32  ;;  %v10399_v32 = vld [vmem:[%s15130_s6 + $0x8a8] ss:$48 sps:$4 sm:$0xff]  }
 0x3e8   : > { %5102 = vmatprep.subr.bf16.mxu0 %v10290_v33  ;;  %v10392_v33 = vld [vmem:[%s15130_s6 + $0x844] ss:$48 sps:$4 sm:$0xff]  }
 0x3eb   : > { %5103 = vmatpush1.bf16.msra.mxu0 %v10288_v45  ;;  %v10407_v45 = vld [vmem:[%s15130_s6 + $0x90c] ss:$48 sps:$4 sm:$0xff]  }
 0x3ec   : > { %5104 = vmatprep.subr.bf16.mxu0 %v10296_v58  ;;  %v10390_v58 = vld [vmem:[%s15130_s6 + $0x840] ss:$48 sps:$4 sm:$0xff]  }
 0x3ef   : > { %5105 = vmatpush1.bf16.msra.mxu0 %v10294_v34  ;;  %v10405_v34 = vld [vmem:[%s15130_s6 + $0x908] ss:$48 sps:$4 sm:$0xff]  }
 0x3f0   : > { %5106 = vmatprep.subr.bf16.mxu0 %v10302_v35  ;;  %v10398_v35 = vld [vmem:[%s15130_s6 + $0x8a4] ss:$48 sps:$4 sm:$0xff]  }
 0x3f3   : > { %5107 = vmatpush1.bf16.msra.mxu0 %v10300_v36  ;;  %v10413_v36 = vld [vmem:[%s15130_s6 + $0x96c] ss:$48 sps:$4 sm:$0xff]  }
 0x3f4   : > { %5108 = vmatprep.subr.bf16.mxu0 %v10308_v37  ;;  %v10396_v37 = vld [vmem:[%s15130_s6 + $0x8a0] ss:$48 sps:$4 sm:$0xff]  }
 0x3f7   : > { %5109 = vmatpush1.bf16.msra.mxu0 %v10306_v38  ;;  %v10411_v38 = vld [vmem:[%s15130_s6 + $0x968] ss:$48 sps:$4 sm:$0xff]  }
 0x3f8   : > { %5110 = vmatprep.subr.bf16.mxu0 %v10314_v39  ;;  %v10404_v39 = vld [vmem:[%s15130_s6 + $0x904] ss:$48 sps:$4 sm:$0xff]  }
 0x3fb   : > { %5111 = vmatpush1.bf16.msra.mxu0 %v10312_v40  ;;  %v10419_v40 = vld [vmem:[%s15130_s6 + $0x9cc] ss:$48 sps:$4 sm:$0xff]  }
 0x3fc   : > { %5112 = vmatprep.subr.bf16.mxu0 %v10320_v41  ;;  %v10402_v41 = vld [vmem:[%s15130_s6 + $0x900] ss:$48 sps:$4 sm:$0xff]  }
 0x3ff   : > { %5113 = vmatpush1.bf16.msra.mxu0 %v10318_v42  ;;  %v10417_v42 = vld [vmem:[%s15130_s6 + $0x9c8] ss:$48 sps:$4 sm:$0xff]  }
 0x400   : > { %5114 = vmatprep.subr.bf16.mxu0 %v10326_v44  ;;  %v10410_v44 = vld [vmem:[%s15130_s6 + $0x964] ss:$48 sps:$4 sm:$0xff]  }
 0x403   : > { %5115 = vmatpush1.bf16.msra.mxu0 %v10324_v60  ;;  %v10425_v60 = vld [vmem:[%s15130_s6 + $0xa2c] ss:$48 sps:$4 sm:$0xff]  }
 0x404   : > { %5116 = vmatprep.subr.bf16.mxu0 %v10332_v48  ;;  %v10408_v48 = vld [vmem:[%s15130_s6 + $0x960] ss:$48 sps:$4 sm:$0xff]  }
 0x407   : > { %5117 = vmatpush1.bf16.msra.mxu0 %v10330_v49  ;;  %v10423_v49 = vld [vmem:[%s15130_s6 + $0xa28] ss:$48 sps:$4 sm:$0xff]  }
 0x408   : > { %5118 = vmatprep.subr.bf16.mxu0 %v10338_v50  ;;  %v10416_v50 = vld [vmem:[%s15130_s6 + $0x9c4] ss:$48 sps:$4 sm:$0xff]  }
 0x40b   : > { %5119 = vmatpush1.bf16.msra.mxu0 %v10336_v51  ;;  %v10431_v51 = vld [vmem:[%s15130_s6 + $0xa8c] ss:$48 sps:$4 sm:$0xff]  }
 0x40c   : > { %5120 = vmatprep.subr.bf16.mxu0 %v10344_v52  ;;  %v10414_v52 = vld [vmem:[%s15130_s6 + $0x9c0] ss:$48 sps:$4 sm:$0xff]  }
 0x40d   : > { %v1862_v56 = vpop.f32.mrb[2].mxu0 }
 0x40e   : > { %v1864_v57 = vpop.f32.mrb[3].mxu0  ;;  %v12782_v1 = vpack.c.bf16 %v1862_v56, %v1862_v56  ;;  %v10437_v56 = vld [vmem:[%s15130_s6 + $0xaec] ss:$48 sps:$4 sm:$0xff]  }
 0x40f   : > { %v12774_v59 = vpack.c.bf16 %v1864_v57, %v1864_v57  ;;  %5121 = vmatpush1.bf16.msra.mxu0 %v10342_v53  ;;  %v10429_v53 = vld [vmem:[%s15130_s6 + $0xa88] ss:$48 sps:$4 sm:$0xff]   ;;  %v10420_v57 = vld [vmem:[%s15130_s6 + $0xa20] ss:$48 sps:$4 sm:$0xff]  }
 0x410   : > { %5122 = vmatprep.subr.bf16.mxu0 %v10350_v54  ;;  %v10422_v54 = vld [vmem:[%s15130_s6 + $0xa24] ss:$48 sps:$4 sm:$0xff]  }
 0x411   : > { %5126 = vmatprep.mubr.bf16.mxu0 %v12774_v59  ;;  %5208 = vmatprep.mubr.bf16.mxu1 %v12774_v59 }
 0x412   : > { %5209 = vmatmul.mubr.bf16.vlgmr.msra.gmra.mrb[4].mxu1 %v12782_v1 }
 0x413   : > { %5123 = vmatpush1.bf16.msra.mxu0 %v10348_v61  ;;  %5218 = vmatpush1.bf16.msra.mxu1 %v10357_v62  ;;  %v10435_v61 = vld [vmem:[%s15130_s6 + $0xae8] ss:$48 sps:$4 sm:$0xff]   ;;  %v10428_v62 = vld [vmem:[%s15130_s6 + $0xa84] ss:$48 sps:$4 sm:$0xff]  }
 0x414   : > { %5124 = vmatprep.subr.bf16.mxu0 %v10353_v2  ;;  %5219 = vmatprep.subr.bf16.mxu1 %v10365_v4  ;;  %v10443_v2 = vld [vmem:[%s15130_s6 + $0xb4c] ss:$48 sps:$4 sm:$0xff]   ;;  %v10426_v4 = vld [vmem:[%s15130_s6 + $0xa80] ss:$48 sps:$4 sm:$0xff]  }
 0x417   : > { %5125 = vmatpush1.bf16.msra.mxu0 %v10351_v5  ;;  %5220 = vmatpush1.bf16.msra.mxu1 %v10363_v6  ;;  %v10441_v5 = vld [vmem:[%s15130_s6 + $0xb48] ss:$48 sps:$4 sm:$0xff]   ;;  %v10434_v6 = vld [vmem:[%s15130_s6 + $0xae4] ss:$48 sps:$4 sm:$0xff]  }
 0x418   : > { %5135 = vmatprep.subr.bf16.mxu0 %v10356_v7  ;;  %5221 = vmatprep.subr.bf16.mxu1 %v10371_v9  ;;  %v10449_v7 = vld [vmem:[%s15130_s6 + $0xbac] ss:$48 sps:$4 sm:$0xff]   ;;  %v10432_v9 = vld [vmem:[%s15130_s6 + $0xae0] ss:$48 sps:$4 sm:$0xff]  }
 0x41a   : > { %5127 = vmatmul.mubr.bf16.vlgmr.msra.gmra.mrb[12].mxu0 %v12782_v1 }
 0x41b   : > { %5136 = vmatpush1.bf16.msra.mxu0 %v10354_v3  ;;  %5222 = vmatpush1.bf16.msra.mxu1 %v10369_v10  ;;  %v10447_v3 = vld [vmem:[%s15130_s6 + $0xba8] ss:$48 sps:$4 sm:$0xff]   ;;  %v10440_v10 = vld [vmem:[%s15130_s6 + $0xb44] ss:$48 sps:$4 sm:$0xff]  }
 0x41c   : > { %5137 = vmatprep.subr.bf16.mxu0 %v10362_v11  ;;  %5223 = vmatprep.subr.bf16.mxu1 %v10377_v13  ;;  %v10452_v11 = vld [vmem:[%s15130_s6 + $0x14] ss:$48 sps:$4 sm:$0xff]   ;;  %v10438_v13 = vld [vmem:[%s15130_s6 + $0xb40] ss:$48 sps:$4 sm:$0xff]  }
 0x41f   : > { %5138 = vmatpush1.bf16.msra.mxu0 %v10360_v29  ;;  %5224 = vmatpush1.bf16.msra.mxu1 %v10375_v0  ;;  %v10446_v29 = vld [vmem:[%s15130_s6 + $0xba4] ss:$48 sps:$4 sm:$0xff]   ;;  %v10444_v0 = vld [vmem:[%s15130_s6 + $0xba0] ss:$48 sps:$4 sm:$0xff]  }
 0x420   : > { %5139 = vmatprep.subr.bf16.mxu0 %v10368_v14  ;;  %5225 = vmatprep.subr.bf16.mxu1 %v10383_v15  ;;  %v10455_v14 = vld [vmem:[%s15130_s6 + $0x24] ss:$48 sps:$4 sm:$0xff]  }
 0x423   : > { %5140 = vmatpush1.bf16.msra.mxu0 %v10366_v16  ;;  %5226 = vmatpush1.bf16.msra.mxu1 %v10381_v17  ;;  %v12986_v15 = vpop.f32.mrb[16].mxu1 }
 0x424   : > { %5141 = vmatprep.subr.bf16.mxu0 %v10374_v18  ;;  %5227 = vmatprep.subr.bf16.mxu1 %v10389_v19  ;;  %v12988_v16 = vpop.f32.mrb[17].mxu1 }
 0x425   : > { %v3171_v17 = vpop.f32.mrb[18].mxu1 }
 0x426   : > { %v3172_v18 = vpop.f32.mrb[19].mxu1  ;;  %v10519_v17 = vld [vmem:[%s15130_s6 + $0x440] ss:$48 sps:$4 sm:$0xff]  }
 0x427   : > { %5142 = vmatpush1.bf16.msra.mxu0 %v10372_v21  ;;  %5228 = vmatpush1.bf16.msra.mxu1 %v10387_v22  ;;  %v10524_v18 = vld [vmem:[%s15130_s6 + $0x494] ss:$48 sps:$4 sm:$0xff]  }
 0x428   : > { %5143 = vmatprep.subr.bf16.mxu0 %v10380_v23  ;;  %5229 = vmatprep.subr.bf16.mxu1 %v10395_v24  ;;  %v10450_v23 = vld [vmem:[%s15130_s6 + $0x10] ss:$48 sps:$4 sm:$0xff]  }
 0x429   : > { %v10453_v24 = vld [vmem:[%s15130_s6 + $0x20] ss:$48 sps:$4 sm:$0xff]  }
 0x42b   : > { %5144 = vmatpush1.bf16.msra.mxu0 %v10378_v25  ;;  %5230 = vmatpush1.bf16.msra.mxu1 %v10393_v27  ;;  %v10458_v27 = vld [vmem:[%s15130_s6 + $0x74] ss:$48 sps:$4 sm:$0xff]  }
 0x42c   : > { %5145 = vmatprep.subr.bf16.mxu0 %v10386_v28  ;;  %5231 = vmatprep.subr.bf16.mxu1 %v10401_v31  ;;  %v10461_v28 = vld [vmem:[%s15130_s6 + $0x84] ss:$48 sps:$4 sm:$0xff]   ;;  %v10456_v31 = vld [vmem:[%s15130_s6 + $0x70] ss:$48 sps:$4 sm:$0xff]  }
 0x42f   : > { %5146 = vmatpush1.bf16.msra.mxu0 %v10384_v20  ;;  %5232 = vmatpush1.bf16.msra.mxu1 %v10399_v32  ;;  %v10459_v20 = vld [vmem:[%s15130_s6 + $0x80] ss:$48 sps:$4 sm:$0xff]   ;;  %v10464_v32 = vld [vmem:[%s15130_s6 + $0xd4] ss:$48 sps:$4 sm:$0xff]  }
 0x430   : > { %5147 = vmatprep.subr.bf16.mxu0 %v10392_v33  ;;  %5233 = vmatprep.subr.bf16.mxu1 %v10407_v45  ;;  %v10467_v33 = vld [vmem:[%s15130_s6 + $0xe4] ss:$48 sps:$4 sm:$0xff]   ;;  %v10462_v45 = vld [vmem:[%s15130_s6 + $0xd0] ss:$48 sps:$4 sm:$0xff]  }
 0x433   : > { %5148 = vmatpush1.bf16.msra.mxu0 %v10390_v58  ;;  %5234 = vmatpush1.bf16.msra.mxu1 %v10405_v34  ;;  %v10465_v58 = vld [vmem:[%s15130_s6 + $0xe0] ss:$48 sps:$4 sm:$0xff]   ;;  %v10470_v34 = vld [vmem:[%s15130_s6 + $0x134] ss:$48 sps:$4 sm:$0xff]  }
 0x434   : > { %5149 = vmatprep.subr.bf16.mxu0 %v10398_v35  ;;  %5235 = vmatprep.subr.bf16.mxu1 %v10413_v36  ;;  %v10473_v35 = vld [vmem:[%s15130_s6 + $0x144] ss:$48 sps:$4 sm:$0xff]   ;;  %v10468_v36 = vld [vmem:[%s15130_s6 + $0x130] ss:$48 sps:$4 sm:$0xff]  }
 0x437   : > { %5150 = vmatpush1.bf16.msra.mxu0 %v10396_v37  ;;  %5236 = vmatpush1.bf16.msra.mxu1 %v10411_v38  ;;  %v10471_v37 = vld [vmem:[%s15130_s6 + $0x140] ss:$48 sps:$4 sm:$0xff]   ;;  %v10476_v38 = vld [vmem:[%s15130_s6 + $0x194] ss:$48 sps:$4 sm:$0xff]  }
 0x438   : > { %5151 = vmatprep.subr.bf16.mxu0 %v10404_v39  ;;  %5237 = vmatprep.subr.bf16.mxu1 %v10419_v40  ;;  %v10479_v39 = vld [vmem:[%s15130_s6 + $0x1a4] ss:$48 sps:$4 sm:$0xff]   ;;  %v10474_v40 = vld [vmem:[%s15130_s6 + $0x190] ss:$48 sps:$4 sm:$0xff]  }
 0x43b   : > { %5152 = vmatpush1.bf16.msra.mxu0 %v10402_v41  ;;  %5238 = vmatpush1.bf16.msra.mxu1 %v10417_v42  ;;  %v10477_v41 = vld [vmem:[%s15130_s6 + $0x1a0] ss:$48 sps:$4 sm:$0xff]   ;;  %v10482_v42 = vld [vmem:[%s15130_s6 + $0x1f4] ss:$48 sps:$4 sm:$0xff]  }
 0x43c   : > { %5153 = vmatprep.subr.bf16.mxu0 %v10410_v44  ;;  %5239 = vmatprep.subr.bf16.mxu1 %v10425_v60  ;;  %v10485_v44 = vld [vmem:[%s15130_s6 + $0x204] ss:$48 sps:$4 sm:$0xff]   ;;  %v10480_v60 = vld [vmem:[%s15130_s6 + $0x1f0] ss:$48 sps:$4 sm:$0xff]  }
 0x43f   : > { %5154 = vmatpush1.bf16.msra.mxu0 %v10408_v48  ;;  %5240 = vmatpush1.bf16.msra.mxu1 %v10423_v49  ;;  %v10483_v48 = vld [vmem:[%s15130_s6 + $0x200] ss:$48 sps:$4 sm:$0xff]   ;;  %v10488_v49 = vld [vmem:[%s15130_s6 + $0x254] ss:$48 sps:$4 sm:$0xff]  }
 0x440   : > { %5155 = vmatprep.subr.bf16.mxu0 %v10416_v50  ;;  %5241 = vmatprep.subr.bf16.mxu1 %v10431_v51  ;;  %v10491_v50 = vld [vmem:[%s15130_s6 + $0x264] ss:$48 sps:$4 sm:$0xff]   ;;  %v10486_v51 = vld [vmem:[%s15130_s6 + $0x250] ss:$48 sps:$4 sm:$0xff]  }
 0x443   : > { %5156 = vmatpush1.bf16.msra.mxu0 %v10414_v52  ;;  %5242 = vmatpush1.bf16.msra.mxu1 %v10429_v53  ;;  %v10489_v52 = vld [vmem:[%s15130_s6 + $0x260] ss:$48 sps:$4 sm:$0xff]   ;;  %v10494_v53 = vld [vmem:[%s15130_s6 + $0x2b4] ss:$48 sps:$4 sm:$0xff]  }
 0x444   : > { %5157 = vmatprep.subr.bf16.mxu0 %v10422_v54  ;;  %5243 = vmatprep.subr.bf16.mxu1 %v10437_v56  ;;  %v10497_v54 = vld [vmem:[%s15130_s6 + $0x2c4] ss:$48 sps:$4 sm:$0xff]   ;;  %v10492_v56 = vld [vmem:[%s15130_s6 + $0x2b0] ss:$48 sps:$4 sm:$0xff]  }
 0x447   : > { %5158 = vmatpush1.bf16.msra.mxu0 %v10420_v57  ;;  %5244 = vmatpush1.bf16.msra.mxu1 %v10435_v61  ;;  %v10495_v57 = vld [vmem:[%s15130_s6 + $0x2c0] ss:$48 sps:$4 sm:$0xff]   ;;  %v10500_v61 = vld [vmem:[%s15130_s6 + $0x314] ss:$48 sps:$4 sm:$0xff]  }
 0x448   : > { %5159 = vmatprep.subr.bf16.mxu0 %v10428_v62  ;;  %5245 = vmatprep.subr.bf16.mxu1 %v10443_v2  ;;  %v10503_v62 = vld [vmem:[%s15130_s6 + $0x324] ss:$48 sps:$4 sm:$0xff]   ;;  %v10498_v2 = vld [vmem:[%s15130_s6 + $0x310] ss:$48 sps:$4 sm:$0xff]  }
 0x44b   : > { %5160 = vmatpush1.bf16.msra.mxu0 %v10426_v4  ;;  %5246 = vmatpush1.bf16.msra.mxu1 %v10441_v5  ;;  %v10501_v4 = vld [vmem:[%s15130_s6 + $0x320] ss:$48 sps:$4 sm:$0xff]   ;;  %v10506_v5 = vld [vmem:[%s15130_s6 + $0x374] ss:$48 sps:$4 sm:$0xff]  }
 0x44c   : > { %5161 = vmatprep.subr.bf16.mxu0 %v10434_v6  ;;  %5247 = vmatprep.subr.bf16.mxu1 %v10449_v7  ;;  %v10509_v6 = vld [vmem:[%s15130_s6 + $0x384] ss:$48 sps:$4 sm:$0xff]   ;;  %v10504_v7 = vld [vmem:[%s15130_s6 + $0x370] ss:$48 sps:$4 sm:$0xff]  }
 0x44f   : > { %5162 = vmatpush1.bf16.msra.mxu0 %v10432_v9  ;;  %5248 = vmatpush1.bf16.msra.mxu1 %v10447_v3  ;;  %v10507_v9 = vld [vmem:[%s15130_s6 + $0x380] ss:$48 sps:$4 sm:$0xff]   ;;  %v10512_v3 = vld [vmem:[%s15130_s6 + $0x3d4] ss:$48 sps:$4 sm:$0xff]  }
 0x450   : > { %5163 = vmatprep.subr.bf16.mxu0 %v10440_v10  ;;  %5258 = vmatprep.subr.bf16.mxu1 %v10452_v11  ;;  %v10515_v10 = vld [vmem:[%s15130_s6 + $0x3e4] ss:$48 sps:$4 sm:$0xff]   ;;  %v10510_v11 = vld [vmem:[%s15130_s6 + $0x3d0] ss:$48 sps:$4 sm:$0xff]  }
 0x453   : > { %5164 = vmatpush1.bf16.msra.mxu0 %v10438_v13  ;;  %v10513_v13 = vld [vmem:[%s15130_s6 + $0x3e0] ss:$48 sps:$4 sm:$0xff]  }
 0x454   : > { %5165 = vmatprep.subr.bf16.mxu0 %v10446_v29  ;;  %v10518_v29 = vld [vmem:[%s15130_s6 + $0x434] ss:$48 sps:$4 sm:$0xff]  }
 0x457   : > { %5166 = vmatpush1.bf16.msra.mxu0 %v10444_v0  ;;  %v10521_v0 = vld [vmem:[%s15130_s6 + $0x444] ss:$48 sps:$4 sm:$0xff]  }
 0x458   : > { %5422 = vmatprep.subr.bf16.mxu0 %v10455_v14  ;;  %v10516_v14 = vld [vmem:[%s15130_s6 + $0x430] ss:$48 sps:$4 sm:$0xff]  }
 0x48d   : > { %v1933_v19 = vpop.f32.mrb[4].mxu0 }
 0x48e   : > { %v1935_v21 = vpop.f32.mrb[5].mxu0  ;;  %v12998_v25 = vpack.c.bf16 %v1933_v19, %v1933_v19  ;;  %v10527_v19 = vld [vmem:[%s15130_s6 + $0x4a4] ss:$48 sps:$4 sm:$0xff]  }
 0x48f   : > { %v12990_v22 = vpack.c.bf16 %v1935_v21, %v1935_v21  ;;  %v10522_v21 = vld [vmem:[%s15130_s6 + $0x490] ss:$48 sps:$4 sm:$0xff]  }
 0x491   : > { %5167 = vmatprep.mubr.bf16.mxu0 %v12990_v22  ;;  %5249 = vmatprep.mubr.bf16.mxu1 %v12990_v22 }
 0x492   : > { %5168 = vmatmul.mubr.bf16.vlgmr.msra.gmra.mrb[12].mxu0 %v12998_v25  ;;  %5250 = vmatmul.mubr.bf16.vlgmr.msra.gmra.mrb[4].mxu1 %v12998_v25 }
 0x493   : > { %5259 = vmatpush1.bf16.msra.mxu1 %v10450_v23  ;;  %5423 = vmatpush1.bf16.msra.mxu0 %v10453_v24  ;;  %v10525_v23 = vld [vmem:[%s15130_s6 + $0x4a0] ss:$48 sps:$4 sm:$0xff]   ;;  %v10530_v24 = vld [vmem:[%s15130_s6 + $0x4f4] ss:$48 sps:$4 sm:$0xff]  }
 0x494   : > { %5290 = vmatprep.mubr.bf16.mxu1 %v12774_v59  ;;  %5454 = vmatprep.mubr.bf16.mxu0 %v12774_v59 }
 0x495   : > { %5260 = vmatprep.subr.bf16.mxu1 %v10458_v27  ;;  %5424 = vmatprep.subr.bf16.mxu0 %v10461_v28  ;;  %v10533_v27 = vld [vmem:[%s15130_s6 + $0x504] ss:$48 sps:$4 sm:$0xff]   ;;  %v10528_v28 = vld [vmem:[%s15130_s6 + $0x4f0] ss:$48 sps:$4 sm:$0xff]  }
 0x497   : > { %5261 = vmatpush1.bf16.msra.mxu1 %v10456_v31  ;;  %5425 = vmatpush1.bf16.msra.mxu0 %v10459_v20  ;;  %v10531_v31 = vld [vmem:[%s15130_s6 + $0x500] ss:$48 sps:$4 sm:$0xff]   ;;  %v10536_v20 = vld [vmem:[%s15130_s6 + $0x554] ss:$48 sps:$4 sm:$0xff]  }
 0x498   : > { %5262 = vmatprep.subr.bf16.mxu1 %v10464_v32  ;;  %5426 = vmatprep.subr.bf16.mxu0 %v10467_v33  ;;  %v10539_v32 = vld [vmem:[%s15130_s6 + $0x564] ss:$48 sps:$4 sm:$0xff]   ;;  %v10534_v33 = vld [vmem:[%s15130_s6 + $0x550] ss:$48 sps:$4 sm:$0xff]  }
 0x49b   : > { %5263 = vmatpush1.bf16.msra.mxu1 %v10462_v45  ;;  %5427 = vmatpush1.bf16.msra.mxu0 %v10465_v58  ;;  %v10537_v45 = vld [vmem:[%s15130_s6 + $0x560] ss:$48 sps:$4 sm:$0xff]   ;;  %v10542_v58 = vld [vmem:[%s15130_s6 + $0x5b4] ss:$48 sps:$4 sm:$0xff]  }
 0x49c   : > { %5264 = vmatprep.subr.bf16.mxu1 %v10470_v34  ;;  %5428 = vmatprep.subr.bf16.mxu0 %v10473_v35  ;;  %v10545_v34 = vld [vmem:[%s15130_s6 + $0x5c4] ss:$48 sps:$4 sm:$0xff]   ;;  %v10540_v35 = vld [vmem:[%s15130_s6 + $0x5b0] ss:$48 sps:$4 sm:$0xff]  }
 0x49f   : > { %5265 = vmatpush1.bf16.msra.mxu1 %v10468_v36  ;;  %5429 = vmatpush1.bf16.msra.mxu0 %v10471_v37  ;;  %v10543_v36 = vld [vmem:[%s15130_s6 + $0x5c0] ss:$48 sps:$4 sm:$0xff]   ;;  %v10548_v37 = vld [vmem:[%s15130_s6 + $0x614] ss:$48 sps:$4 sm:$0xff]  }
 0x4a0   : > { %5266 = vmatprep.subr.bf16.mxu1 %v10476_v38  ;;  %5430 = vmatprep.subr.bf16.mxu0 %v10479_v39  ;;  %v10551_v38 = vld [vmem:[%s15130_s6 + $0x624] ss:$48 sps:$4 sm:$0xff]   ;;  %v10546_v39 = vld [vmem:[%s15130_s6 + $0x610] ss:$48 sps:$4 sm:$0xff]  }
 0x4a3   : > { %5267 = vmatpush1.bf16.msra.mxu1 %v10474_v40  ;;  %5431 = vmatpush1.bf16.msra.mxu0 %v10477_v41  ;;  %v10549_v40 = vld [vmem:[%s15130_s6 + $0x620] ss:$48 sps:$4 sm:$0xff]   ;;  %v10554_v41 = vld [vmem:[%s15130_s6 + $0x674] ss:$48 sps:$4 sm:$0xff]  }
 0x4a4   : > { %5268 = vmatprep.subr.bf16.mxu1 %v10482_v42  ;;  %5432 = vmatprep.subr.bf16.mxu0 %v10485_v44  ;;  %v10557_v42 = vld [vmem:[%s15130_s6 + $0x684] ss:$48 sps:$4 sm:$0xff]   ;;  %v10552_v44 = vld [vmem:[%s15130_s6 + $0x670] ss:$48 sps:$4 sm:$0xff]  }
 0x4a7   : > { %5269 = vmatpush1.bf16.msra.mxu1 %v10480_v60  ;;  %5433 = vmatpush1.bf16.msra.mxu0 %v10483_v48  ;;  %v10555_v60 = vld [vmem:[%s15130_s6 + $0x680] ss:$48 sps:$4 sm:$0xff]   ;;  %v10560_v48 = vld [vmem:[%s15130_s6 + $0x6d4] ss:$48 sps:$4 sm:$0xff]  }
 0x4a8   : > { %5270 = vmatprep.subr.bf16.mxu1 %v10488_v49  ;;  %5434 = vmatprep.subr.bf16.mxu0 %v10491_v50  ;;  %v10563_v49 = vld [vmem:[%s15130_s6 + $0x6e4] ss:$48 sps:$4 sm:$0xff]   ;;  %v10558_v50 = vld [vmem:[%s15130_s6 + $0x6d0] ss:$48 sps:$4 sm:$0xff]  }
 0x4ab   : > { %5271 = vmatpush1.bf16.msra.mxu1 %v10486_v51  ;;  %5435 = vmatpush1.bf16.msra.mxu0 %v10489_v52  ;;  %v10561_v51 = vld [vmem:[%s15130_s6 + $0x6e0] ss:$48 sps:$4 sm:$0xff]   ;;  %v10566_v52 = vld [vmem:[%s15130_s6 + $0x734] ss:$48 sps:$4 sm:$0xff]  }
 0x4ac   : > { %5272 = vmatprep.subr.bf16.mxu1 %v10494_v53  ;;  %5436 = vmatprep.subr.bf16.mxu0 %v10497_v54  ;;  %v10569_v53 = vld [vmem:[%s15130_s6 + $0x744] ss:$48 sps:$4 sm:$0xff]   ;;  %v10564_v54 = vld [vmem:[%s15130_s6 + $0x730] ss:$48 sps:$4 sm:$0xff]  }
 0x4af   : > { %5273 = vmatpush1.bf16.msra.mxu1 %v10492_v56  ;;  %5437 = vmatpush1.bf16.msra.mxu0 %v10495_v57  ;;  %v10567_v56 = vld [vmem:[%s15130_s6 + $0x740] ss:$48 sps:$4 sm:$0xff]   ;;  %v10572_v57 = vld [vmem:[%s15130_s6 + $0x794] ss:$48 sps:$4 sm:$0xff]  }
 0x4b0   : > { %5274 = vmatprep.subr.bf16.mxu1 %v10500_v61  ;;  %5438 = vmatprep.subr.bf16.mxu0 %v10503_v62  ;;  %v10575_v61 = vld [vmem:[%s15130_s6 + $0x7a4] ss:$48 sps:$4 sm:$0xff]   ;;  %v10570_v62 = vld [vmem:[%s15130_s6 + $0x790] ss:$48 sps:$4 sm:$0xff]  }
 0x4b3   : > { %5275 = vmatpush1.bf16.msra.mxu1 %v10498_v2  ;;  %5439 = vmatpush1.bf16.msra.mxu0 %v10501_v4  ;;  %v10573_v2 = vld [vmem:[%s15130_s6 + $0x7a0] ss:$48 sps:$4 sm:$0xff]   ;;  %v10578_v4 = vld [vmem:[%s15130_s6 + $0x7f4] ss:$48 sps:$4 sm:$0xff]  }
 0x4b4   : > { %5276 = vmatprep.subr.bf16.mxu1 %v10506_v5  ;;  %5440 = vmatprep.subr.bf16.mxu0 %v10509_v6  ;;  %v13253_v5 = vpop.f32.mrb[8].mxu0  ;;  %v10581_v6 = vld [vmem:[%s15130_s6 + $0x804] ss:$48 sps:$4 sm:$0xff]  }
 0x4b7   : > { %5277 = vmatpush1.bf16.msra.mxu1 %v10504_v7  ;;  %5441 = vmatpush1.bf16.msra.mxu0 %v10507_v9  ;;  %v13258_v7 = vpop.f32.mrb[9].mxu0 }
 0x4b8   : > { %5278 = vmatprep.subr.bf16.mxu1 %v10512_v3  ;;  %5442 = vmatprep.subr.bf16.mxu0 %v10515_v10  ;;  %v3130_v9 = vpop.f32.mrb[10].mxu0  ;;  %v10576_v3 = vld [vmem:[%s15130_s6 + $0x7f0] ss:$48 sps:$4 sm:$0xff]  }
 0x4b9   : > { %v3131_v10 = vpop.f32.mrb[11].mxu0  ;;  %v10645_v9 = vld [vmem:[%s15130_s6 + $0x28] ss:$48 sps:$4 sm:$0xff]  }
 0x4ba   : > { %v10653_v10 = vld [vmem:[%s15130_s6 + $0x8c] ss:$48 sps:$4 sm:$0xff]  }
 0x4bb   : > { %5279 = vmatpush1.bf16.msra.mxu1 %v10510_v11  ;;  %5443 = vmatpush1.bf16.msra.mxu0 %v10513_v13  ;;  %v10579_v11 = vld [vmem:[%s15130_s6 + $0x800] ss:$48 sps:$4 sm:$0xff]   ;;  %v10584_v13 = vld [vmem:[%s15130_s6 + $0x854] ss:$48 sps:$4 sm:$0xff]  }
 0x4bc   : > { %5280 = vmatprep.subr.bf16.mxu1 %v10518_v29  ;;  %5444 = vmatprep.subr.bf16.mxu0 %v10521_v0  ;;  %v10587_v29 = vld [vmem:[%s15130_s6 + $0x864] ss:$48 sps:$4 sm:$0xff]   ;;  %v10582_v0 = vld [vmem:[%s15130_s6 + $0x850] ss:$48 sps:$4 sm:$0xff]  }
 0x4bf   : > { %5281 = vmatpush1.bf16.msra.mxu1 %v10516_v14  ;;  %5445 = vmatpush1.bf16.msra.mxu0 %v10519_v17  ;;  %v10585_v14 = vld [vmem:[%s15130_s6 + $0x860] ss:$48 sps:$4 sm:$0xff]   ;;  %v10590_v17 = vld [vmem:[%s15130_s6 + $0x8b4] ss:$48 sps:$4 sm:$0xff]  }
 0x4c0   : > { %5282 = vmatprep.subr.bf16.mxu1 %v10524_v18  ;;  %5446 = vmatprep.subr.bf16.mxu0 %v10527_v19  ;;  %v10593_v18 = vld [vmem:[%s15130_s6 + $0x8c4] ss:$48 sps:$4 sm:$0xff]   ;;  %v10588_v19 = vld [vmem:[%s15130_s6 + $0x8b0] ss:$48 sps:$4 sm:$0xff]  }
 0x4c3   : > { %5283 = vmatpush1.bf16.msra.mxu1 %v10522_v21  ;;  %5447 = vmatpush1.bf16.msra.mxu0 %v10525_v23  ;;  %v10591_v21 = vld [vmem:[%s15130_s6 + $0x8c0] ss:$48 sps:$4 sm:$0xff]   ;;  %v10596_v23 = vld [vmem:[%s15130_s6 + $0x914] ss:$48 sps:$4 sm:$0xff]  }
 0x4c4   : > { %5284 = vmatprep.subr.bf16.mxu1 %v10530_v24  ;;  %5448 = vmatprep.subr.bf16.mxu0 %v10533_v27  ;;  %v10599_v24 = vld [vmem:[%s15130_s6 + $0x924] ss:$48 sps:$4 sm:$0xff]   ;;  %v10594_v27 = vld [vmem:[%s15130_s6 + $0x910] ss:$48 sps:$4 sm:$0xff]  }
 0x4c7   : > { %5285 = vmatpush1.bf16.msra.mxu1 %v10528_v28  ;;  %5449 = vmatpush1.bf16.msra.mxu0 %v10531_v31  ;;  %v10597_v28 = vld [vmem:[%s15130_s6 + $0x920] ss:$48 sps:$4 sm:$0xff]   ;;  %v10602_v31 = vld [vmem:[%s15130_s6 + $0x974] ss:$48 sps:$4 sm:$0xff]  }
 0x4c8   : > { %5286 = vmatprep.subr.bf16.mxu1 %v10536_v20  ;;  %5450 = vmatprep.subr.bf16.mxu0 %v10539_v32  ;;  %v10605_v20 = vld [vmem:[%s15130_s6 + $0x984] ss:$48 sps:$4 sm:$0xff]   ;;  %v10600_v32 = vld [vmem:[%s15130_s6 + $0x970] ss:$48 sps:$4 sm:$0xff]  }
 0x4cb   : > { %5287 = vmatpush1.bf16.msra.mxu1 %v10534_v33  ;;  %5451 = vmatpush1.bf16.msra.mxu0 %v10537_v45  ;;  %v10603_v33 = vld [vmem:[%s15130_s6 + $0x980] ss:$48 sps:$4 sm:$0xff]   ;;  %v10608_v45 = vld [vmem:[%s15130_s6 + $0x9d4] ss:$48 sps:$4 sm:$0xff]  }
 0x4cc   : > { %5288 = vmatprep.subr.bf16.mxu1 %v10542_v58  ;;  %5452 = vmatprep.subr.bf16.mxu0 %v10545_v34  ;;  %v10611_v58 = vld [vmem:[%s15130_s6 + $0x9e4] ss:$48 sps:$4 sm:$0xff]   ;;  %v10606_v34 = vld [vmem:[%s15130_s6 + $0x9d0] ss:$48 sps:$4 sm:$0xff]  }
 0x4cf   : > { %5289 = vmatpush1.bf16.msra.mxu1 %v10540_v35  ;;  %5453 = vmatpush1.bf16.msra.mxu0 %v10543_v36  ;;  %v10609_v35 = vld [vmem:[%s15130_s6 + $0x9e0] ss:$48 sps:$4 sm:$0xff]   ;;  %v10614_v36 = vld [vmem:[%s15130_s6 + $0xa34] ss:$48 sps:$4 sm:$0xff]  }
 0x4d0   : > { %5299 = vmatprep.subr.bf16.mxu1 %v10548_v37  ;;  %5463 = vmatprep.subr.bf16.mxu0 %v10551_v38  ;;  %v10617_v37 = vld [vmem:[%s15130_s6 + $0xa44] ss:$48 sps:$4 sm:$0xff]   ;;  %v10612_v38 = vld [vmem:[%s15130_s6 + $0xa30] ss:$48 sps:$4 sm:$0xff]  }
 0x4d2   : > { %5291 = vmatmul.mubr.bf16.vlgmr.msra.gmra.mrb[8].mxu1 %v12782_v1  ;;  %5455 = vmatmul.mubr.bf16.vlgmr.msra.gmra.mrb[16].mxu0 %v12782_v1 }
 0x4d3   : > { %5300 = vmatpush1.bf16.msra.mxu1 %v10546_v39  ;;  %5331 = vmatprep.mubr.bf16.mxu1 %v12990_v22  ;;  %v10615_v39 = vld [vmem:[%s15130_s6 + $0xa40] ss:$48 sps:$4 sm:$0xff]  }
 0x4d4   : > { %5464 = vmatpush1.bf16.msra.mxu0 %v10549_v40  ;;  %5495 = vmatprep.mubr.bf16.mxu0 %v12990_v22  ;;  %v10620_v40 = vld [vmem:[%s15130_s6 + $0xa94] ss:$48 sps:$4 sm:$0xff]  }
 0x4d5   : > { %5301 = vmatprep.subr.bf16.mxu1 %v10554_v41  ;;  %5465 = vmatprep.subr.bf16.mxu0 %v10557_v42  ;;  %v10623_v41 = vld [vmem:[%s15130_s6 + $0xaa4] ss:$48 sps:$4 sm:$0xff]   ;;  %v10618_v42 = vld [vmem:[%s15130_s6 + $0xa90] ss:$48 sps:$4 sm:$0xff]  }
 0x4d7   : > { %5302 = vmatpush1.bf16.msra.mxu1 %v10552_v44  ;;  %v10621_v44 = vld [vmem:[%s15130_s6 + $0xaa0] ss:$48 sps:$4 sm:$0xff]  }
 0x4d8   : > { %5466 = vmatpush1.bf16.msra.mxu0 %v10555_v60  ;;  %5303 = vmatprep.subr.bf16.mxu1 %v10560_v48  ;;  %v10626_v60 = vld [vmem:[%s15130_s6 + $0xaf4] ss:$48 sps:$4 sm:$0xff]  }
 0x4d9   : > { %5467 = vmatprep.subr.bf16.mxu0 %v10563_v49  ;;  %v10629_v48 = vld [vmem:[%s15130_s6 + $0xb04] ss:$48 sps:$4 sm:$0xff]   ;;  %v10624_v49 = vld [vmem:[%s15130_s6 + $0xaf0] ss:$48 sps:$4 sm:$0xff]  }
 0x4db   : > { %5304 = vmatpush1.bf16.msra.mxu1 %v10558_v50  ;;  %v10627_v50 = vld [vmem:[%s15130_s6 + $0xb00] ss:$48 sps:$4 sm:$0xff]  }
 0x4dc   : > { %5468 = vmatpush1.bf16.msra.mxu0 %v10561_v51  ;;  %5305 = vmatprep.subr.bf16.mxu1 %v10566_v52  ;;  %v10632_v51 = vld [vmem:[%s15130_s6 + $0xb54] ss:$48 sps:$4 sm:$0xff]  }
 0x4dd   : > { %5469 = vmatprep.subr.bf16.mxu0 %v10569_v53  ;;  %v10635_v52 = vld [vmem:[%s15130_s6 + $0xb64] ss:$48 sps:$4 sm:$0xff]   ;;  %v10630_v53 = vld [vmem:[%s15130_s6 + $0xb50] ss:$48 sps:$4 sm:$0xff]  }
 0x4df   : > { %5306 = vmatpush1.bf16.msra.mxu1 %v10564_v54  ;;  %v10633_v54 = vld [vmem:[%s15130_s6 + $0xb60] ss:$48 sps:$4 sm:$0xff]  }
 0x4e0   : > { %5470 = vmatpush1.bf16.msra.mxu0 %v10567_v56  ;;  %5307 = vmatprep.subr.bf16.mxu1 %v10572_v57  ;;  %v10638_v56 = vld [vmem:[%s15130_s6 + $0xbb4] ss:$48 sps:$4 sm:$0xff]  }
 0x4e1   : > { %5471 = vmatprep.subr.bf16.mxu0 %v10575_v61  ;;  %v10641_v57 = vld [vmem:[%s15130_s6 + $0xbc4] ss:$48 sps:$4 sm:$0xff]   ;;  %v10636_v61 = vld [vmem:[%s15130_s6 + $0xbb0] ss:$48 sps:$4 sm:$0xff]  }
 0x4e3   : > { %5308 = vmatpush1.bf16.msra.mxu1 %v10570_v62  ;;  %v10639_v62 = vld [vmem:[%s15130_s6 + $0xbc0] ss:$48 sps:$4 sm:$0xff]  }
 0x4e4   : > { %5472 = vmatpush1.bf16.msra.mxu0 %v10573_v2  ;;  %5309 = vmatprep.subr.bf16.mxu1 %v10578_v4  ;;  %v10644_v2 = vld [vmem:[%s15130_s6 + $0x1c] ss:$48 sps:$4 sm:$0xff]  }
 0x4e5   : > { %5473 = vmatprep.subr.bf16.mxu0 %v10581_v6  ;;  %v10647_v4 = vld [vmem:[%s15130_s6 + $0x2c] ss:$48 sps:$4 sm:$0xff]   ;;  %v10642_v6 = vld [vmem:[%s15130_s6 + $0x18] ss:$48 sps:$4 sm:$0xff]  }
 0x4e7   : > { %5310 = vmatpush1.bf16.msra.mxu1 %v10576_v3  ;;  %v10650_v3 = vld [vmem:[%s15130_s6 + $0x7c] ss:$48 sps:$4 sm:$0xff]  }
 0x4e8   : > { %5474 = vmatpush1.bf16.msra.mxu0 %v10579_v11  ;;  %5311 = vmatprep.subr.bf16.mxu1 %v10584_v13  ;;  %v10648_v11 = vld [vmem:[%s15130_s6 + $0x78] ss:$48 sps:$4 sm:$0xff]  }
 0x4e9   : > { %5475 = vmatprep.subr.bf16.mxu0 %v10587_v29  ;;  %v10651_v13 = vld [vmem:[%s15130_s6 + $0x88] ss:$48 sps:$4 sm:$0xff]   ;;  %v10656_v29 = vld [vmem:[%s15130_s6 + $0xdc] ss:$48 sps:$4 sm:$0xff]  }
 0x4eb   : > { %5312 = vmatpush1.bf16.msra.mxu1 %v10582_v0  ;;  %v10659_v0 = vld [vmem:[%s15130_s6 + $0xec] ss:$48 sps:$4 sm:$0xff]  }
 0x4ec   : > { %5476 = vmatpush1.bf16.msra.mxu0 %v10585_v14  ;;  %5313 = vmatprep.subr.bf16.mxu1 %v10590_v17  ;;  %v10654_v14 = vld [vmem:[%s15130_s6 + $0xd8] ss:$48 sps:$4 sm:$0xff]  }
 0x4ed   : > { %5477 = vmatprep.subr.bf16.mxu0 %v10593_v18  ;;  %v10657_v17 = vld [vmem:[%s15130_s6 + $0xe8] ss:$48 sps:$4 sm:$0xff]   ;;  %v10665_v18 = vld [vmem:[%s15130_s6 + $0x14c] ss:$48 sps:$4 sm:$0xff]  }
 0x4ef   : > { %5314 = vmatpush1.bf16.msra.mxu1 %v10588_v19  ;;  %v10660_v19 = vld [vmem:[%s15130_s6 + $0x138] ss:$48 sps:$4 sm:$0xff]  }
 0x4f0   : > { %5478 = vmatpush1.bf16.msra.mxu0 %v10591_v21  ;;  %5315 = vmatprep.subr.bf16.mxu1 %v10596_v23  ;;  %v10663_v21 = vld [vmem:[%s15130_s6 + $0x148] ss:$48 sps:$4 sm:$0xff]   ;;  %v10668_v23 = vld [vmem:[%s15130_s6 + $0x19c] ss:$48 sps:$4 sm:$0xff]  }
 0x4f1   : > { %5479 = vmatprep.subr.bf16.mxu0 %v10599_v24  ;;  %v10671_v24 = vld [vmem:[%s15130_s6 + $0x1ac] ss:$48 sps:$4 sm:$0xff]  }
 0x4f3   : > { %5316 = vmatpush1.bf16.msra.mxu1 %v10594_v27  ;;  %v10666_v27 = vld [vmem:[%s15130_s6 + $0x198] ss:$48 sps:$4 sm:$0xff]  }
 0x4f4   : > { %5480 = vmatpush1.bf16.msra.mxu0 %v10597_v28  ;;  %5317 = vmatprep.subr.bf16.mxu1 %v10602_v31  ;;  %v10669_v28 = vld [vmem:[%s15130_s6 + $0x1a8] ss:$48 sps:$4 sm:$0xff]   ;;  %v10674_v31 = vld [vmem:[%s15130_s6 + $0x1fc] ss:$48 sps:$4 sm:$0xff]  }
 0x4f5   : > { %5481 = vmatprep.subr.bf16.mxu0 %v10605_v20  ;;  %v10677_v20 = vld [vmem:[%s15130_s6 + $0x20c] ss:$48 sps:$4 sm:$0xff]  }
 0x4f7   : > { %5318 = vmatpush1.bf16.msra.mxu1 %v10600_v32  ;;  %v10672_v32 = vld [vmem:[%s15130_s6 + $0x1f8] ss:$48 sps:$4 sm:$0xff]  }
 0x4f8   : > { %5482 = vmatpush1.bf16.msra.mxu0 %v10603_v33  ;;  %5319 = vmatprep.subr.bf16.mxu1 %v10608_v45  ;;  %v10675_v33 = vld [vmem:[%s15130_s6 + $0x208] ss:$48 sps:$4 sm:$0xff]   ;;  %v10680_v45 = vld [vmem:[%s15130_s6 + $0x25c] ss:$48 sps:$4 sm:$0xff]  }
 0x4f9   : > { %5483 = vmatprep.subr.bf16.mxu0 %v10611_v58  ;;  %v10683_v58 = vld [vmem:[%s15130_s6 + $0x26c] ss:$48 sps:$4 sm:$0xff]  }
 0x4fb   : > { %5320 = vmatpush1.bf16.msra.mxu1 %v10606_v34  ;;  %v10678_v34 = vld [vmem:[%s15130_s6 + $0x258] ss:$48 sps:$4 sm:$0xff]  }
 0x4fc   : > { %5484 = vmatpush1.bf16.msra.mxu0 %v10609_v35  ;;  %5321 = vmatprep.subr.bf16.mxu1 %v10614_v36  ;;  %v10681_v35 = vld [vmem:[%s15130_s6 + $0x268] ss:$48 sps:$4 sm:$0xff]   ;;  %v10686_v36 = vld [vmem:[%s15130_s6 + $0x2bc] ss:$48 sps:$4 sm:$0xff]  }
 0x4fd   : > { %5485 = vmatprep.subr.bf16.mxu0 %v10617_v37  ;;  %v10689_v37 = vld [vmem:[%s15130_s6 + $0x2cc] ss:$48 sps:$4 sm:$0xff]  }
 0x4ff   : > { %5322 = vmatpush1.bf16.msra.mxu1 %v10612_v38  ;;  %v10684_v38 = vld [vmem:[%s15130_s6 + $0x2b8] ss:$48 sps:$4 sm:$0xff]  }
 0x500   : > { %5486 = vmatpush1.bf16.msra.mxu0 %v10615_v39  ;;  %5323 = vmatprep.subr.bf16.mxu1 %v10620_v40  ;;  %v10687_v39 = vld [vmem:[%s15130_s6 + $0x2c8] ss:$48 sps:$4 sm:$0xff]   ;;  %v10692_v40 = vld [vmem:[%s15130_s6 + $0x31c] ss:$48 sps:$4 sm:$0xff]  }
 0x501   : > { %5487 = vmatprep.subr.bf16.mxu0 %v10623_v41  ;;  %v10695_v41 = vld [vmem:[%s15130_s6 + $0x32c] ss:$48 sps:$4 sm:$0xff]  }
 0x503   : > { %5324 = vmatpush1.bf16.msra.mxu1 %v10618_v42  ;;  %v10690_v42 = vld [vmem:[%s15130_s6 + $0x318] ss:$48 sps:$4 sm:$0xff]  }
 0x504   : > { %5488 = vmatpush1.bf16.msra.mxu0 %v10621_v44  ;;  %5325 = vmatprep.subr.bf16.mxu1 %v10626_v60  ;;  %v10693_v44 = vld [vmem:[%s15130_s6 + $0x328] ss:$48 sps:$4 sm:$0xff]   ;;  %v10698_v60 = vld [vmem:[%s15130_s6 + $0x37c] ss:$48 sps:$4 sm:$0xff]  }
 0x505   : > { %5489 = vmatprep.subr.bf16.mxu0 %v10629_v48  ;;  %v10701_v48 = vld [vmem:[%s15130_s6 + $0x38c] ss:$48 sps:$4 sm:$0xff]  }
 0x507   : > { %5326 = vmatpush1.bf16.msra.mxu1 %v10624_v49  ;;  %v10696_v49 = vld [vmem:[%s15130_s6 + $0x378] ss:$48 sps:$4 sm:$0xff]  }
 0x508   : > { %5490 = vmatpush1.bf16.msra.mxu0 %v10627_v50  ;;  %5327 = vmatprep.subr.bf16.mxu1 %v10632_v51  ;;  %v10699_v50 = vld [vmem:[%s15130_s6 + $0x388] ss:$48 sps:$4 sm:$0xff]   ;;  %v10704_v51 = vld [vmem:[%s15130_s6 + $0x3dc] ss:$48 sps:$4 sm:$0xff]  }
 0x509   : > { %5491 = vmatprep.subr.bf16.mxu0 %v10635_v52  ;;  %v10707_v52 = vld [vmem:[%s15130_s6 + $0x3ec] ss:$48 sps:$4 sm:$0xff]  }
 0x50b   : > { %5328 = vmatpush1.bf16.msra.mxu1 %v10630_v53  ;;  %v10702_v53 = vld [vmem:[%s15130_s6 + $0x3d8] ss:$48 sps:$4 sm:$0xff]  }
 0x50c   : > { %5492 = vmatpush1.bf16.msra.mxu0 %v10633_v54  ;;  %5329 = vmatprep.subr.bf16.mxu1 %v10638_v56  ;;  %v10705_v54 = vld [vmem:[%s15130_s6 + $0x3e8] ss:$48 sps:$4 sm:$0xff]   ;;  %v10710_v56 = vld [vmem:[%s15130_s6 + $0x43c] ss:$48 sps:$4 sm:$0xff]  }
 0x50d   : > { %5493 = vmatprep.subr.bf16.mxu0 %v10641_v57  ;;  %v10713_v57 = vld [vmem:[%s15130_s6 + $0x44c] ss:$48 sps:$4 sm:$0xff]  }
 0x50f   : > { %5330 = vmatpush1.bf16.msra.mxu1 %v10636_v61  ;;  %v10708_v61 = vld [vmem:[%s15130_s6 + $0x438] ss:$48 sps:$4 sm:$0xff]  }
 0x510   : > { %5494 = vmatpush1.bf16.msra.mxu0 %v10639_v62  ;;  %5340 = vmatprep.subr.bf16.mxu1 %v10644_v2  ;;  %v10711_v62 = vld [vmem:[%s15130_s6 + $0x448] ss:$48 sps:$4 sm:$0xff]   ;;  %v10716_v2 = vld [vmem:[%s15130_s6 + $0x49c] ss:$48 sps:$4 sm:$0xff]  }
 0x511   : > { %5504 = vmatprep.subr.bf16.mxu0 %v10647_v4  ;;  %v10719_v4 = vld [vmem:[%s15130_s6 + $0x4ac] ss:$48 sps:$4 sm:$0xff]  }
 0x512   : > { %5332 = vmatmul.mubr.bf16.vlgmr.msra.gmra.mrb[8].mxu1 %v12998_v25 }
 0x513   : > { %5496 = vmatmul.mubr.bf16.vlgmr.msra.gmra.mrb[20].mxu0 %v12998_v25  ;;  %5341 = vmatpush1.bf16.msra.mxu1 %v10642_v6  ;;  %v10714_v6 = vld [vmem:[%s15130_s6 + $0x498] ss:$48 sps:$4 sm:$0xff]  }
 0x514   : > { %5372 = vmatprep.mubr.bf16.mxu1 %v12774_v59  ;;  %5505 = vmatpush1.bf16.msra.mxu0 %v10645_v9  ;;  %v10717_v9 = vld [vmem:[%s15130_s6 + $0x4a8] ss:$48 sps:$4 sm:$0xff]  }
 0x515   : > { %5536 = vmatprep.mubr.bf16.mxu0 %v12774_v59  ;;  %5342 = vmatprep.subr.bf16.mxu1 %v10650_v3  ;;  %v10662_v59 = vld [vmem:[%s15130_s6 + $0x13c] ss:$48 sps:$4 sm:$0xff]  }
 0x516   : > { %5506 = vmatprep.subr.bf16.mxu0 %v10653_v10  ;;  %v10722_v3 = vld [vmem:[%s15130_s6 + $0x4fc] ss:$48 sps:$4 sm:$0xff]  }
 0x517   : > { %5343 = vmatpush1.bf16.msra.mxu1 %v10648_v11  ;;  %v10725_v10 = vld [vmem:[%s15130_s6 + $0x50c] ss:$48 sps:$4 sm:$0xff]   ;;  %v10720_v11 = vld [vmem:[%s15130_s6 + $0x4f8] ss:$48 sps:$4 sm:$0xff]  }
 0x518   : > { %5507 = vmatpush1.bf16.msra.mxu0 %v10651_v13  ;;  %5344 = vmatprep.subr.bf16.mxu1 %v10656_v29  ;;  %v10723_v13 = vld [vmem:[%s15130_s6 + $0x508] ss:$48 sps:$4 sm:$0xff]   ;;  %v10728_v29 = vld [vmem:[%s15130_s6 + $0x55c] ss:$48 sps:$4 sm:$0xff]  }
 0x519   : > { %5508 = vmatprep.subr.bf16.mxu0 %v10659_v0  ;;  %v10731_v0 = vld [vmem:[%s15130_s6 + $0x56c] ss:$48 sps:$4 sm:$0xff]  }
 0x51b   : > { %5345 = vmatpush1.bf16.msra.mxu1 %v10654_v14  ;;  %v10726_v14 = vld [vmem:[%s15130_s6 + $0x558] ss:$48 sps:$4 sm:$0xff]  }
 0x51c   : > { %5509 = vmatpush1.bf16.msra.mxu0 %v10657_v17  ;;  %5346 = vmatprep.subr.bf16.mxu1 %v10662_v59  ;;  %v10729_v17 = vld [vmem:[%s15130_s6 + $0x568] ss:$48 sps:$4 sm:$0xff]   ;;  %v10734_v59 = vld [vmem:[%s15130_s6 + $0x5bc] ss:$48 sps:$4 sm:$0xff]  }
 0x51d   : > { %5510 = vmatprep.subr.bf16.mxu0 %v10665_v18  ;;  %v10737_v18 = vld [vmem:[%s15130_s6 + $0x5cc] ss:$48 sps:$4 sm:$0xff]  }
 0x51f   : > { %5347 = vmatpush1.bf16.msra.mxu1 %v10660_v19  ;;  %v10732_v19 = vld [vmem:[%s15130_s6 + $0x5b8] ss:$48 sps:$4 sm:$0xff]  }
 0x520   : > { %5511 = vmatpush1.bf16.msra.mxu0 %v10663_v21  ;;  %5348 = vmatprep.subr.bf16.mxu1 %v10668_v23  ;;  %v10735_v21 = vld [vmem:[%s15130_s6 + $0x5c8] ss:$48 sps:$4 sm:$0xff]   ;;  %v10740_v23 = vld [vmem:[%s15130_s6 + $0x61c] ss:$48 sps:$4 sm:$0xff]  }
 0x521   : > { %5512 = vmatprep.subr.bf16.mxu0 %v10671_v24  ;;  %v10743_v24 = vld [vmem:[%s15130_s6 + $0x62c] ss:$48 sps:$4 sm:$0xff]  }
 0x523   : > { %5349 = vmatpush1.bf16.msra.mxu1 %v10666_v27  ;;  %v10738_v27 = vld [vmem:[%s15130_s6 + $0x618] ss:$48 sps:$4 sm:$0xff]  }
 0x524   : > { %5513 = vmatpush1.bf16.msra.mxu0 %v10669_v28  ;;  %5350 = vmatprep.subr.bf16.mxu1 %v10674_v31  ;;  %v10741_v28 = vld [vmem:[%s15130_s6 + $0x628] ss:$48 sps:$4 sm:$0xff]   ;;  %v10746_v31 = vld [vmem:[%s15130_s6 + $0x67c] ss:$48 sps:$4 sm:$0xff]  }
 0x525   : > { %5514 = vmatprep.subr.bf16.mxu0 %v10677_v20  ;;  %v10749_v20 = vld [vmem:[%s15130_s6 + $0x68c] ss:$48 sps:$4 sm:$0xff]  }
 0x527   : > { %5351 = vmatpush1.bf16.msra.mxu1 %v10672_v32  ;;  %v10744_v32 = vld [vmem:[%s15130_s6 + $0x678] ss:$48 sps:$4 sm:$0xff]  }
 0x528   : > { %5515 = vmatpush1.bf16.msra.mxu0 %v10675_v33  ;;  %5352 = vmatprep.subr.bf16.mxu1 %v10680_v45  ;;  %v10747_v33 = vld [vmem:[%s15130_s6 + $0x688] ss:$48 sps:$4 sm:$0xff]   ;;  %v10752_v45 = vld [vmem:[%s15130_s6 + $0x6dc] ss:$48 sps:$4 sm:$0xff]  }
 0x529   : > { %5516 = vmatprep.subr.bf16.mxu0 %v10683_v58  ;;  %v10750_v58 = vld [vmem:[%s15130_s6 + $0x6d8] ss:$48 sps:$4 sm:$0xff]  }
 0x52b   : > { %5353 = vmatpush1.bf16.msra.mxu1 %v10678_v34  ;;  %v10753_v34 = vld [vmem:[%s15130_s6 + $0x6e8] ss:$48 sps:$4 sm:$0xff]  }
 0x52c   : > { %5517 = vmatpush1.bf16.msra.mxu0 %v10681_v35  ;;  %5354 = vmatprep.subr.bf16.mxu1 %v10686_v36  ;;  %v10761_v35 = vld [vmem:[%s15130_s6 + $0x74c] ss:$48 sps:$4 sm:$0xff]   ;;  %v10756_v36 = vld [vmem:[%s15130_s6 + $0x738] ss:$48 sps:$4 sm:$0xff]  }
 0x52d   : > { %5518 = vmatprep.subr.bf16.mxu0 %v10689_v37  ;;  %v10759_v37 = vld [vmem:[%s15130_s6 + $0x748] ss:$48 sps:$4 sm:$0xff]  }
 0x52f   : > { %5355 = vmatpush1.bf16.msra.mxu1 %v10684_v38  ;;  %v10764_v38 = vld [vmem:[%s15130_s6 + $0x79c] ss:$48 sps:$4 sm:$0xff]  }
 0x530   : > { %5519 = vmatpush1.bf16.msra.mxu0 %v10687_v39  ;;  %5356 = vmatprep.subr.bf16.mxu1 %v10692_v40  ;;  %v10767_v39 = vld [vmem:[%s15130_s6 + $0x7ac] ss:$48 sps:$4 sm:$0xff]   ;;  %v10762_v40 = vld [vmem:[%s15130_s6 + $0x798] ss:$48 sps:$4 sm:$0xff]  }
 0x531   : > { %5520 = vmatprep.subr.bf16.mxu0 %v10695_v41  ;;  %v10765_v41 = vld [vmem:[%s15130_s6 + $0x7a8] ss:$48 sps:$4 sm:$0xff]  }
 0x533   : > { %5357 = vmatpush1.bf16.msra.mxu1 %v10690_v42  ;;  %v10770_v42 = vld [vmem:[%s15130_s6 + $0x7fc] ss:$48 sps:$4 sm:$0xff]  }
 0x534   : > { %5521 = vmatpush1.bf16.msra.mxu0 %v10693_v44  ;;  %5358 = vmatprep.subr.bf16.mxu1 %v10698_v60  ;;  %v10773_v44 = vld [vmem:[%s15130_s6 + $0x80c] ss:$48 sps:$4 sm:$0xff]   ;;  %v10768_v60 = vld [vmem:[%s15130_s6 + $0x7f8] ss:$48 sps:$4 sm:$0xff]  }
 0x535   : > { %5522 = vmatprep.subr.bf16.mxu0 %v10701_v48  ;;  %v10771_v48 = vld [vmem:[%s15130_s6 + $0x808] ss:$48 sps:$4 sm:$0xff]  }
 0x537   : > { %5359 = vmatpush1.bf16.msra.mxu1 %v10696_v49  ;;  %v10776_v49 = vld [vmem:[%s15130_s6 + $0x85c] ss:$48 sps:$4 sm:$0xff]  }
 0x538   : > { %5523 = vmatpush1.bf16.msra.mxu0 %v10699_v50  ;;  %5360 = vmatprep.subr.bf16.mxu1 %v10704_v51  ;;  %v10779_v51 = vld [vmem:[%s15130_s6 + $0x86c] ss:$48 sps:$4 sm:$0xff]  }
 0x539   : > { %5524 = vmatprep.subr.bf16.mxu0 %v10707_v52 }
 0x53b   : > { %5361 = vmatpush1.bf16.msra.mxu1 %v10702_v53 }
 0x53c   : > { %5525 = vmatpush1.bf16.msra.mxu0 %v10705_v54  ;;  %5362 = vmatprep.subr.bf16.mxu1 %v10710_v56 }
 0x53d   : > { %5526 = vmatprep.subr.bf16.mxu0 %v10713_v57  ;;  %v10774_v57 = vld [vmem:[%s15130_s6 + $0x858] ss:$48 sps:$4 sm:$0xff]  }
 0x53f   : > { %5363 = vmatpush1.bf16.msra.mxu1 %v10708_v61 }
 0x540   : > { %5527 = vmatpush1.bf16.msra.mxu0 %v10711_v62  ;;  %5364 = vmatprep.subr.bf16.mxu1 %v10716_v2  ;;  %v10777_v62 = vld [vmem:[%s15130_s6 + $0x868] ss:$48 sps:$4 sm:$0xff]  }
 0x541   : > { %5528 = vmatprep.subr.bf16.mxu0 %v10719_v4  ;;  %v10780_v2 = vld [vmem:[%s15130_s6 + $0x8b8] ss:$48 sps:$4 sm:$0xff]  }
 0x542   : > { %v10783_v4 = vld [vmem:[%s15130_s6 + $0x8c8] ss:$48 sps:$4 sm:$0xff]  }
 0x543   : > { %5365 = vmatpush1.bf16.msra.mxu1 %v10714_v6  ;;  %v10788_v6 = vld [vmem:[%s15130_s6 + $0x91c] ss:$48 sps:$4 sm:$0xff]  }
 0x544   : > { %5529 = vmatpush1.bf16.msra.mxu0 %v10717_v9  ;;  %5366 = vmatprep.subr.bf16.mxu1 %v10722_v3  ;;  %v10791_v9 = vld [vmem:[%s15130_s6 + $0x92c] ss:$48 sps:$4 sm:$0xff]   ;;  %v10786_v3 = vld [vmem:[%s15130_s6 + $0x918] ss:$48 sps:$4 sm:$0xff]  }
 0x545   : > { %5530 = vmatprep.subr.bf16.mxu0 %v10725_v10  ;;  %v10789_v10 = vld [vmem:[%s15130_s6 + $0x928] ss:$48 sps:$4 sm:$0xff]  }
 0x547   : > { %5367 = vmatpush1.bf16.msra.mxu1 %v10720_v11  ;;  %v10794_v11 = vld [vmem:[%s15130_s6 + $0x97c] ss:$48 sps:$4 sm:$0xff]  }
 0x548   : > { %5531 = vmatpush1.bf16.msra.mxu0 %v10723_v13  ;;  %5368 = vmatprep.subr.bf16.mxu1 %v10728_v29  ;;  %v10797_v13 = vld [vmem:[%s15130_s6 + $0x98c] ss:$48 sps:$4 sm:$0xff]   ;;  %v10792_v29 = vld [vmem:[%s15130_s6 + $0x978] ss:$48 sps:$4 sm:$0xff]  }
 0x549   : > { %5532 = vmatprep.subr.bf16.mxu0 %v10731_v0  ;;  %v10795_v0 = vld [vmem:[%s15130_s6 + $0x988] ss:$48 sps:$4 sm:$0xff]  }
 0x54b   : > { %5369 = vmatpush1.bf16.msra.mxu1 %v10726_v14  ;;  %v10800_v14 = vld [vmem:[%s15130_s6 + $0x9dc] ss:$48 sps:$4 sm:$0xff]  }
 0x54c   : > { %5533 = vmatpush1.bf16.msra.mxu0 %v10729_v17  ;;  %5370 = vmatprep.subr.bf16.mxu1 %v10734_v59  ;;  %v10803_v17 = vld [vmem:[%s15130_s6 + $0x9ec] ss:$48 sps:$4 sm:$0xff]   ;;  %v10798_v59 = vld [vmem:[%s15130_s6 + $0x9d8] ss:$48 sps:$4 sm:$0xff]  }
 0x54d   : > { %5534 = vmatprep.subr.bf16.mxu0 %v10737_v18  ;;  %v10801_v18 = vld [vmem:[%s15130_s6 + $0x9e8] ss:$48 sps:$4 sm:$0xff]  }
 0x54f   : > { %5371 = vmatpush1.bf16.msra.mxu1 %v10732_v19  ;;  %v10806_v19 = vld [vmem:[%s15130_s6 + $0xa3c] ss:$48 sps:$4 sm:$0xff]  }
 0x550   : > { %5535 = vmatpush1.bf16.msra.mxu0 %v10735_v21  ;;  %5381 = vmatprep.subr.bf16.mxu1 %v10740_v23  ;;  %v10809_v21 = vld [vmem:[%s15130_s6 + $0xa4c] ss:$48 sps:$4 sm:$0xff]   ;;  %v10804_v23 = vld [vmem:[%s15130_s6 + $0xa38] ss:$48 sps:$4 sm:$0xff]  }
 0x551   : > { %5545 = vmatprep.subr.bf16.mxu0 %v10743_v24  ;;  %v10807_v24 = vld [vmem:[%s15130_s6 + $0xa48] ss:$48 sps:$4 sm:$0xff]  }
 0x552   : > { %5373 = vmatmul.mubr.bf16.vlgmr.msra.gmra.mrb[12].mxu1 %v12782_v1 }
 0x553   : > { %5537 = vmatmul.mubr.bf16.vlgmr.msra.gmra.mrb[24].mxu0 %v12782_v1  ;;  %5382 = vmatpush1.bf16.msra.mxu1 %v10738_v27  ;;  %v10755_v1 = vld [vmem:[%s15130_s6 + $0x6ec] ss:$48 sps:$4 sm:$0xff]  }
 0x554   : > { %5413 = vmatprep.mubr.bf16.mxu1 %v12990_v22  ;;  %5546 = vmatpush1.bf16.msra.mxu0 %v10741_v28  ;;  %v10812_v27 = vld [vmem:[%s15130_s6 + $0xa9c] ss:$48 sps:$4 sm:$0xff]  }
 0x555   : > { %5577 = vmatprep.mubr.bf16.mxu0 %v12990_v22  ;;  %5383 = vmatprep.subr.bf16.mxu1 %v10746_v31  ;;  %v10758_v22 = vld [vmem:[%s15130_s6 + $0x73c] ss:$48 sps:$4 sm:$0xff]   ;;  %v10810_v31 = vld [vmem:[%s15130_s6 + $0xa98] ss:$48 sps:$4 sm:$0xff]  }
 0x556   : > { %5547 = vmatprep.subr.bf16.mxu0 %v10749_v20  ;;  %v10815_v28 = vld [vmem:[%s15130_s6 + $0xaac] ss:$48 sps:$4 sm:$0xff]   ;;  %v10813_v20 = vld [vmem:[%s15130_s6 + $0xaa8] ss:$48 sps:$4 sm:$0xff]  }
 0x557   : > { %5384 = vmatpush1.bf16.msra.mxu1 %v10744_v32  ;;  %v10818_v32 = vld [vmem:[%s15130_s6 + $0xafc] ss:$48 sps:$4 sm:$0xff]  }
 0x558   : > { %5548 = vmatpush1.bf16.msra.mxu0 %v10747_v33  ;;  %5385 = vmatprep.subr.bf16.mxu1 %v10752_v45  ;;  %v10821_v33 = vld [vmem:[%s15130_s6 + $0xb0c] ss:$48 sps:$4 sm:$0xff]   ;;  %v10816_v45 = vld [vmem:[%s15130_s6 + $0xaf8] ss:$48 sps:$4 sm:$0xff]  }
 0x559   : > { %5549 = vmatprep.subr.bf16.mxu0 %v10755_v1  ;;  %v10819_v1 = vld [vmem:[%s15130_s6 + $0xb08] ss:$48 sps:$4 sm:$0xff]  }
 0x55b   : > { %5386 = vmatpush1.bf16.msra.mxu1 %v10750_v58  ;;  %v10824_v58 = vld [vmem:[%s15130_s6 + $0xb5c] ss:$48 sps:$4 sm:$0xff]  }
 0x55c   : > { %5550 = vmatpush1.bf16.msra.mxu0 %v10753_v34  ;;  %5387 = vmatprep.subr.bf16.mxu1 %v10758_v22  ;;  %v10827_v34 = vld [vmem:[%s15130_s6 + $0xb6c] ss:$48 sps:$4 sm:$0xff]   ;;  %v10822_v22 = vld [vmem:[%s15130_s6 + $0xb58] ss:$48 sps:$4 sm:$0xff]  }
 0x55d   : > { %5551 = vmatprep.subr.bf16.mxu0 %v10761_v35  ;;  %v10825_v35 = vld [vmem:[%s15130_s6 + $0xb68] ss:$48 sps:$4 sm:$0xff]  }
 0x55f   : > { %5388 = vmatpush1.bf16.msra.mxu1 %v10756_v36  ;;  %v10830_v36 = vld [vmem:[%s15130_s6 + $0xbbc] ss:$48 sps:$4 sm:$0xff]  }
 0x560   : > { %5552 = vmatpush1.bf16.msra.mxu0 %v10759_v37  ;;  %5389 = vmatprep.subr.bf16.mxu1 %v10764_v38  ;;  %v10833_v37 = vld [vmem:[%s15130_s6 + $0xbcc] ss:$48 sps:$4 sm:$0xff]   ;;  %v13784_v38 = vld [vmem:[%s482_s18] sm:$0xf] }
 0x561   : > { %5553 = vmatprep.subr.bf16.mxu0 %v10767_v39  ;;  %v10828_v39 = vld [vmem:[%s15130_s6 + $0xbb8] ss:$48 sps:$4 sm:$0xff]  }
 0x563   : > { %5390 = vmatpush1.bf16.msra.mxu1 %v10762_v40  ;;  %v10831_v40 = vld [vmem:[%s15130_s6 + $0xbc8] ss:$48 sps:$4 sm:$0xff]  }
 0x564   : > { %5554 = vmatpush1.bf16.msra.mxu0 %v10765_v41  ;;  %5391 = vmatprep.subr.bf16.mxu1 %v10770_v42  ;;  %v10836_v41 = vld [vmem:[%s15132_s8 + $0x4] ss:$48 sps:$4 sm:$0xff]  }
 0x565   : > { %v5169_v50 = vpop.f32.mrb[12].mxu0  ;;  %5555 = vmatprep.subr.bf16.mxu0 %v10773_v44  ;;  %v10857_v42 = vld [vmem:[%s15132_s8 + $0x24] ss:$48 sps:$4 sm:$0xff]   ;;  %v13800_v44 = vrot.slane %v13784_v38, %v11855_v47 }
 0x566   : > { %v13665_v52 = vadd.f32 %v5169_v50, %v12628_v26  ;;  %v5171_v53 = vpop.f32.mrb[13].mxu0  ;;  %v10782_v26 = vld [vmem:[%s15130_s6 + $0x8bc] ss:$48 sps:$4 sm:$0xff]   ;;  %v10863_v50 = vld [vmem:[%s15132_s8 + $0x84] ss:$48 sps:$4 sm:$0xff]  }
 0x567   : > { %v13668_v54 = vadd.f32 %v5171_v53, %v12630_v63  ;;  %5392 = vmatpush1.bf16.msra.mxu1 %v10768_v60  ;;  %v5173_v56 = vpop.f32.mrb[14].mxu0  ;;  %v10785_v63 = vld [vmem:[%s15130_s6 + $0x8cc] ss:$48 sps:$4 sm:$0xff]   ;;  %v10834_v60 = vld [vmem:[%s15132_s8] ss:$48 sps:$4 sm:$0xff]  }
 0x568   : > { %5556 = vmatpush1.bf16.msra.mxu0 %v10771_v48  ;;  %v5174_v61 = vpop.f32.mrb[15].mxu0  ;;  %5393 = vmatprep.subr.bf16.mxu1 %v10776_v49  ;;  %v10839_v48 = vld [vmem:[%s15132_s8 + $0x64] ss:$48 sps:$4 sm:$0xff]   ;;  %v10855_v49 = vld [vmem:[%s15132_s8 + $0x20] ss:$48 sps:$4 sm:$0xff]  }
 0x569   : > { %5557 = vmatprep.subr.bf16.mxu0 %v10779_v51  ;;  %v13816_v51 = vpack.c.bf16 %v13800_v44, %v13800_v44  ;;  %v10837_v53 = vld [vmem:[%s15132_s8 + $0x60] ss:$48 sps:$4 sm:$0xff]   ;;  %v10842_v56 = vld [vmem:[%s15132_s8 + $0xc4] ss:$48 sps:$4 sm:$0xff]  }
 0x56a   : > { %v10840_v61 = vld [vmem:[%s15132_s8 + $0xc0] ss:$48 sps:$4 sm:$0xff]  }
 0x56b   : > { %5394 = vmatpush1.bf16.msra.mxu1 %v10774_v57  ;;  %v10861_v57 = vld [vmem:[%s15132_s8 + $0x80] ss:$48 sps:$4 sm:$0xff]  }
 0x56c   : > { %5558 = vmatpush1.bf16.msra.mxu0 %v10777_v62  ;;  %5395 = vmatprep.subr.bf16.mxu1 %v10782_v26  ;;  %v10845_v62 = vld [vmem:[%s15132_s8 + $0x124] ss:$48 sps:$4 sm:$0xff]   ;;  %v10867_v26 = vld [vmem:[%s15132_s8 + $0xe0] ss:$48 sps:$4 sm:$0xff]  }
 0x56d   : > { %5559 = vmatprep.subr.bf16.mxu0 %v10785_v63  ;;  %v10875_v63 = vld [vmem:[%s15132_s8 + $0x144] ss:$48 sps:$4 sm:$0xff]  }
 0x56f   : > { %5396 = vmatpush1.bf16.msra.mxu1 %v10780_v2  ;;  %v10843_v2 = vld [vmem:[%s15132_s8 + $0x120] ss:$48 sps:$4 sm:$0xff]  }
 0x570   : > { %5560 = vmatpush1.bf16.msra.mxu0 %v10783_v4  ;;  %5397 = vmatprep.subr.bf16.mxu1 %v10788_v6  ;;  %v10848_v4 = vld [vmem:[%s15132_s8 + $0x184] ss:$48 sps:$4 sm:$0xff]   ;;  %v10873_v6 = vld [vmem:[%s15132_s8 + $0x140] ss:$48 sps:$4 sm:$0xff]  }
 0x571   : > { %5561 = vmatprep.subr.bf16.mxu0 %v10791_v9  ;;  %v10881_v9 = vld [vmem:[%s15132_s8 + $0x1a4] ss:$48 sps:$4 sm:$0xff]  }
 0x573   : > { %5398 = vmatpush1.bf16.msra.mxu1 %v10786_v3  ;;  %v10846_v3 = vld [vmem:[%s15132_s8 + $0x180] ss:$48 sps:$4 sm:$0xff]  }
 0x574   : > { %5562 = vmatpush1.bf16.msra.mxu0 %v10789_v10  ;;  %5399 = vmatprep.subr.bf16.mxu1 %v10794_v11  ;;  %v10851_v10 = vld [vmem:[%s15132_s8 + $0x1e4] ss:$48 sps:$4 sm:$0xff]   ;;  %v10879_v11 = vld [vmem:[%s15132_s8 + $0x1a0] ss:$48 sps:$4 sm:$0xff]  }
 0x575   : > { %5563 = vmatprep.subr.bf16.mxu0 %v10797_v13  ;;  %v10887_v13 = vld [vmem:[%s15132_s8 + $0x204] ss:$48 sps:$4 sm:$0xff]  }
 0x577   : > { %5400 = vmatpush1.bf16.msra.mxu1 %v10792_v29  ;;  %v10849_v29 = vld [vmem:[%s15132_s8 + $0x1e0] ss:$48 sps:$4 sm:$0xff]  }
 0x578   : > { %5564 = vmatpush1.bf16.msra.mxu0 %v10795_v0  ;;  %5401 = vmatprep.subr.bf16.mxu1 %v10800_v14  ;;  %v10854_v0 = vld [vmem:[%s15132_s8 + $0x244] ss:$48 sps:$4 sm:$0xff]   ;;  %v10885_v14 = vld [vmem:[%s15132_s8 + $0x200] ss:$48 sps:$4 sm:$0xff]  }
 0x579   : > { %5565 = vmatprep.subr.bf16.mxu0 %v10803_v17 }
 0x57b   : > { %5402 = vmatpush1.bf16.msra.mxu1 %v10798_v59  ;;  %v10893_v59 = vld [vmem:[%s15132_s8 + $0x264] ss:$48 sps:$4 sm:$0xff]  }
 0x57c   : > { %5566 = vmatpush1.bf16.msra.mxu0 %v10801_v18  ;;  %5403 = vmatprep.subr.bf16.mxu1 %v10806_v19 }
 0x57d   : > { %5567 = vmatprep.subr.bf16.mxu0 %v10809_v21 }
 0x57f   : > { %5404 = vmatpush1.bf16.msra.mxu1 %v10804_v23 }
 0x580   : > { %5568 = vmatpush1.bf16.msra.mxu0 %v10807_v24  ;;  %5405 = vmatprep.subr.bf16.mxu1 %v10812_v27  ;;  %v10852_v24 = vld [vmem:[%s15132_s8 + $0x240] ss:$48 sps:$4 sm:$0xff]  }
 0x581   : > { %5569 = vmatprep.subr.bf16.mxu0 %v10815_v28  ;;  %v10860_v28 = vld [vmem:[%s15132_s8 + $0x2a4] ss:$48 sps:$4 sm:$0xff]  }
 0x583   : > { %5406 = vmatpush1.bf16.msra.mxu1 %v10810_v31  ;;  %v10858_v31 = vld [vmem:[%s15132_s8 + $0x2a0] ss:$48 sps:$4 sm:$0xff]  }
 0x584   : > { %5570 = vmatpush1.bf16.msra.mxu0 %v10813_v20  ;;  %5407 = vmatprep.subr.bf16.mxu1 %v10818_v32  ;;  %v10866_v20 = vld [vmem:[%s15132_s8 + $0x304] ss:$48 sps:$4 sm:$0xff]   ;;  %v10897_v32 = vld [vmem:[%s15132_s8 + $0x2c0] ss:$48 sps:$4 sm:$0xff]  }
 0x585   : > { %5571 = vmatprep.subr.bf16.mxu0 %v10821_v33  ;;  %v10905_v33 = vld [vmem:[%s15132_s8 + $0x324] ss:$48 sps:$4 sm:$0xff]  }
 0x587   : > { %5408 = vmatpush1.bf16.msra.mxu1 %v10816_v45  ;;  %v10864_v45 = vld [vmem:[%s15132_s8 + $0x300] ss:$48 sps:$4 sm:$0xff]  }
 0x588   : > { %5572 = vmatpush1.bf16.msra.mxu0 %v10819_v1  ;;  %5409 = vmatprep.subr.bf16.mxu1 %v10824_v58  ;;  %v10872_v1 = vld [vmem:[%s15132_s8 + $0x364] ss:$48 sps:$4 sm:$0xff]   ;;  %v10903_v58 = vld [vmem:[%s15132_s8 + $0x320] ss:$48 sps:$4 sm:$0xff]  }
 0x589   : > { %5573 = vmatprep.subr.bf16.mxu0 %v10827_v34  ;;  %v10911_v34 = vld [vmem:[%s15132_s8 + $0x384] ss:$48 sps:$4 sm:$0xff]  }
 0x58b   : > { %5410 = vmatpush1.bf16.msra.mxu1 %v10822_v22  ;;  %v10870_v22 = vld [vmem:[%s15132_s8 + $0x360] ss:$48 sps:$4 sm:$0xff]  }
 0x58c   : > { %5574 = vmatpush1.bf16.msra.mxu0 %v10825_v35  ;;  %5411 = vmatprep.subr.bf16.mxu1 %v10830_v36  ;;  %v10878_v35 = vld [vmem:[%s15132_s8 + $0x3c4] ss:$48 sps:$4 sm:$0xff]   ;;  %v10909_v36 = vld [vmem:[%s15132_s8 + $0x380] ss:$48 sps:$4 sm:$0xff]  }
 0x58d   : > { %5575 = vmatprep.subr.bf16.mxu0 %v10833_v37  ;;  %v10917_v37 = vld [vmem:[%s15132_s8 + $0x3e4] ss:$48 sps:$4 sm:$0xff]  }
 0x58f   : > { %5412 = vmatpush1.bf16.msra.mxu1 %v10828_v39  ;;  %v10876_v39 = vld [vmem:[%s15132_s8 + $0x3c0] ss:$48 sps:$4 sm:$0xff]  }
 0x590   : > { %5576 = vmatpush1.bf16.msra.mxu0 %v10831_v40  ;;  %8030 = vmatprep.subr.bf16.mxu1 %v10836_v41  ;;  %v10884_v40 = vld [vmem:[%s15132_s8 + $0x424] ss:$48 sps:$4 sm:$0xff]   ;;  %v10915_v41 = vld [vmem:[%s15132_s8 + $0x3e0] ss:$48 sps:$4 sm:$0xff]  }
 0x591   : > { %8358 = vmatprep.subr.bf16.mxu0 %v10857_v42  ;;  %v10923_v42 = vld [vmem:[%s15132_s8 + $0x444] ss:$48 sps:$4 sm:$0xff]  }
 0x592   : > { %5414 = vmatmul.mubr.bf16.vlgmr.msra.gmra.mrb[12].mxu1 %v12998_v25 }
 0x593   : > { %5578 = vmatmul.mubr.bf16.vlgmr.msra.gmra.mrb[28].mxu0 %v12998_v25  ;;  %8031 = vmatpush1.bf16.msra.mxu1 %v10834_v60  ;;  %v10869_v25 = vld [vmem:[%s15132_s8 + $0xe4] ss:$48 sps:$4 sm:$0xff]   ;;  %v10882_v60 = vld [vmem:[%s15132_s8 + $0x420] ss:$48 sps:$4 sm:$0xff]  }
 0x594   : > { %8032 = vmatprep.subr.bf16.mxu1 %v10839_v48  ;;  %8359 = vmatpush1.bf16.msra.mxu0 %v10855_v49  ;;  %v10890_v48 = vld [vmem:[%s15132_s8 + $0x484] ss:$48 sps:$4 sm:$0xff]   ;;  %v10921_v49 = vld [vmem:[%s15132_s8 + $0x440] ss:$48 sps:$4 sm:$0xff]  }
 0x595   : > { %8360 = vmatprep.subr.bf16.mxu0 %v10863_v50  ;;  %8062 = vmatprep.mubr.bf16.mxu1 %v13816_v51  ;;  %v10929_v50 = vld [vmem:[%s15132_s8 + $0x4a4] ss:$48 sps:$4 sm:$0xff]  }
 0x596   : > { %8390 = vmatprep.mubr.bf16.mxu0 %v13816_v51 }
 0x597   : > { %8033 = vmatpush1.bf16.msra.mxu1 %v10837_v53  ;;  %v10888_v53 = vld [vmem:[%s15132_s8 + $0x480] ss:$48 sps:$4 sm:$0xff]  }
 0x598   : > { %8034 = vmatprep.subr.bf16.mxu1 %v10842_v56  ;;  %8361 = vmatpush1.bf16.msra.mxu0 %v10861_v57  ;;  %v10896_v56 = vld [vmem:[%s15132_s8 + $0x4e4] ss:$48 sps:$4 sm:$0xff]   ;;  %v10927_v57 = vld [vmem:[%s15132_s8 + $0x4a0] ss:$48 sps:$4 sm:$0xff]  }
 0x599   : > { %8362 = vmatprep.subr.bf16.mxu0 %v10869_v25  ;;  %v10935_v25 = vld [vmem:[%s15132_s8 + $0x504] ss:$48 sps:$4 sm:$0xff]  }
 0x59b   : > { %8035 = vmatpush1.bf16.msra.mxu1 %v10840_v61  ;;  %v10894_v61 = vld [vmem:[%s15132_s8 + $0x4e0] ss:$48 sps:$4 sm:$0xff]  }
 0x59c   : > { %8036 = vmatprep.subr.bf16.mxu1 %v10845_v62  ;;  %8363 = vmatpush1.bf16.msra.mxu0 %v10867_v26  ;;  %v10902_v62 = vld [vmem:[%s15132_s8 + $0x544] ss:$48 sps:$4 sm:$0xff]   ;;  %v10933_v26 = vld [vmem:[%s15132_s8 + $0x500] ss:$48 sps:$4 sm:$0xff]  }
 0x59d   : > { %8364 = vmatprep.subr.bf16.mxu0 %v10875_v63  ;;  %v10941_v63 = vld [vmem:[%s15132_s8 + $0x564] ss:$48 sps:$4 sm:$0xff]  }
 0x59f   : > { %8037 = vmatpush1.bf16.msra.mxu1 %v10843_v2  ;;  %v10900_v2 = vld [vmem:[%s15132_s8 + $0x540] ss:$48 sps:$4 sm:$0xff]  }
 0x5a0   : > { %8038 = vmatprep.subr.bf16.mxu1 %v10848_v4  ;;  %8365 = vmatpush1.bf16.msra.mxu0 %v10873_v6  ;;  %v10908_v4 = vld [vmem:[%s15132_s8 + $0x5a4] ss:$48 sps:$4 sm:$0xff]   ;;  %v10939_v6 = vld [vmem:[%s15132_s8 + $0x560] ss:$48 sps:$4 sm:$0xff]  }
 0x5a1   : > { %8366 = vmatprep.subr.bf16.mxu0 %v10881_v9  ;;  %v10947_v9 = vld [vmem:[%s15132_s8 + $0x5c4] ss:$48 sps:$4 sm:$0xff]  }
 0x5a3   : > { %8039 = vmatpush1.bf16.msra.mxu1 %v10846_v3  ;;  %v13998_v3 = vrot.slane %v13784_v38, %v11974_v8 }
 0x5a4   : > { %8040 = vmatprep.subr.bf16.mxu1 %v10851_v10  ;;  %8367 = vmatpush1.bf16.msra.mxu0 %v10879_v11  ;;  %v10906_v10 = vld [vmem:[%s15132_s8 + $0x5a0] ss:$48 sps:$4 sm:$0xff]   ;;  %v10914_v11 = vld [vmem:[%s15132_s8 + $0x604] ss:$48 sps:$4 sm:$0xff]  }
 0x5a5   : > { %v5456_v17 = vpop.f32.mrb[16].mxu0  ;;  %8368 = vmatprep.subr.bf16.mxu0 %v10887_v13  ;;  %v10945_v13 = vld [vmem:[%s15132_s8 + $0x5c0] ss:$48 sps:$4 sm:$0xff]  }
 0x5a6   : > { %v13883_v18 = vadd.f32 %v5456_v17, %v13253_v5  ;;  %v5458_v19 = vpop.f32.mrb[17].mxu0  ;;  %v10891_v5 = vld [vmem:[%s15132_s8 + $0x260] ss:$48 sps:$4 sm:$0xff]  }
 0x5a7   : > { %v13886_v21 = vadd.f32 %v5458_v19, %v13258_v7  ;;  %v5460_v23 = vpop.f32.mrb[18].mxu0  ;;  %8041 = vmatpush1.bf16.msra.mxu1 %v10849_v29  ;;  %v10899_v7 = vld [vmem:[%s15132_s8 + $0x2c4] ss:$48 sps:$4 sm:$0xff]   ;;  %v10912_v17 = vld [vmem:[%s15132_s8 + $0x600] ss:$48 sps:$4 sm:$0xff]  }
 0x5a8   : > { %v5461_v27 = vpop.f32.mrb[19].mxu0  ;;  %8042 = vmatprep.subr.bf16.mxu1 %v10854_v0  ;;  %8369 = vmatpush1.bf16.msra.mxu0 %v10885_v14  ;;  %v10953_v29 = vld [vmem:[%s15132_s8 + $0x624] ss:$48 sps:$4 sm:$0xff]   ;;  %v14014_v0 = vrot.slane %v13784_v38, %v11978_v12  ;;  %v14018_v14 = vpack.c.bf16 %v13998_v3, %v13998_v3  ;;  %v10951_v19 = vld [vmem:[%s15132_s8 + $0x620] ss:$48 sps:$4 sm:$0xff]  }
 0x5a9   : > { %8370 = vmatprep.subr.bf16.mxu0 %v10893_v59  ;;  %v10920_v59 = vld [vmem:[%s15132_s8 + $0x664] ss:$48 sps:$4 sm:$0xff]   ;;  %v10918_v27 = vld [vmem:[%s15132_s8 + $0x660] ss:$48 sps:$4 sm:$0xff]  }
 0x5aa   : > { %v10959_v23 = vld [vmem:[%s15132_s8 + $0x684] ss:$48 sps:$4 sm:$0xff]  }
 0x5ab   : > { %8043 = vmatpush1.bf16.msra.mxu1 %v10852_v24  ;;  %v14034_v24 = vpack.c.bf16 %v14014_v0, %v14014_v0 }
 0x5ac   : > { %8044 = vmatprep.subr.bf16.mxu1 %v10860_v28  ;;  %8371 = vmatpush1.bf16.msra.mxu0 %v10891_v5  ;;  %v10926_v28 = vld [vmem:[%s15132_s8 + $0x6c4] ss:$48 sps:$4 sm:$0xff]   ;;  %v10957_v5 = vld [vmem:[%s15132_s8 + $0x680] ss:$48 sps:$4 sm:$0xff]  }
 0x5ad   : > { %8372 = vmatprep.subr.bf16.mxu0 %v10899_v7  ;;  %v10965_v7 = vld [vmem:[%s15132_s8 + $0x6e4] ss:$48 sps:$4 sm:$0xff]  }
 0x5af   : > { %8045 = vmatpush1.bf16.msra.mxu1 %v10858_v31  ;;  %v10924_v31 = vld [vmem:[%s15132_s8 + $0x6c0] ss:$48 sps:$4 sm:$0xff]  }
 0x5b0   : > { %8046 = vmatprep.subr.bf16.mxu1 %v10866_v20  ;;  %8373 = vmatpush1.bf16.msra.mxu0 %v10897_v32  ;;  %v10932_v20 = vld [vmem:[%s15132_s8 + $0x724] ss:$48 sps:$4 sm:$0xff]   ;;  %v10963_v32 = vld [vmem:[%s15132_s8 + $0x6e0] ss:$48 sps:$4 sm:$0xff]  }
 0x5b1   : > { %8374 = vmatprep.subr.bf16.mxu0 %v10905_v33  ;;  %v10971_v33 = vld [vmem:[%s15132_s8 + $0x744] ss:$48 sps:$4 sm:$0xff]  }
 0x5b3   : > { %8047 = vmatpush1.bf16.msra.mxu1 %v10864_v45  ;;  %v10930_v45 = vld [vmem:[%s15132_s8 + $0x720] ss:$48 sps:$4 sm:$0xff]  }
 0x5b4   : > { %8048 = vmatprep.subr.bf16.mxu1 %v10872_v1  ;;  %8375 = vmatpush1.bf16.msra.mxu0 %v10903_v58  ;;  %v10938_v1 = vld [vmem:[%s15132_s8 + $0x784] ss:$48 sps:$4 sm:$0xff]   ;;  %v10969_v58 = vld [vmem:[%s15132_s8 + $0x740] ss:$48 sps:$4 sm:$0xff]  }
 0x5b5   : > { %8376 = vmatprep.subr.bf16.mxu0 %v10911_v34  ;;  %v10977_v34 = vld [vmem:[%s15132_s8 + $0x7a4] ss:$48 sps:$4 sm:$0xff]  }
 0x5b7   : > { %8049 = vmatpush1.bf16.msra.mxu1 %v10870_v22  ;;  %v10936_v22 = vld [vmem:[%s15132_s8 + $0x780] ss:$48 sps:$4 sm:$0xff]  }
 0x5b8   : > { %8050 = vmatprep.subr.bf16.mxu1 %v10878_v35  ;;  %8377 = vmatpush1.bf16.msra.mxu0 %v10909_v36  ;;  %v10944_v35 = vld [vmem:[%s15132_s8 + $0x7e4] ss:$48 sps:$4 sm:$0xff]   ;;  %v10975_v36 = vld [vmem:[%s15132_s8 + $0x7a0] ss:$48 sps:$4 sm:$0xff]  }
 0x5b9   : > { %8378 = vmatprep.subr.bf16.mxu0 %v10917_v37  ;;  %v10983_v37 = vld [vmem:[%s15132_s8 + $0x804] ss:$48 sps:$4 sm:$0xff]  }
 0x5bb   : > { %8051 = vmatpush1.bf16.msra.mxu1 %v10876_v39  ;;  %v10942_v39 = vld [vmem:[%s15132_s8 + $0x7e0] ss:$48 sps:$4 sm:$0xff]  }
 0x5bc   : > { %8052 = vmatprep.subr.bf16.mxu1 %v10884_v40  ;;  %8379 = vmatpush1.bf16.msra.mxu0 %v10915_v41  ;;  %v10950_v40 = vld [vmem:[%s15132_s8 + $0x844] ss:$48 sps:$4 sm:$0xff]   ;;  %v10981_v41 = vld [vmem:[%s15132_s8 + $0x800] ss:$48 sps:$4 sm:$0xff]  }
 0x5bd   : > { %8380 = vmatprep.subr.bf16.mxu0 %v10923_v42  ;;  %v10989_v42 = vld [vmem:[%s15132_s8 + $0x864] ss:$48 sps:$4 sm:$0xff]  }
 0x5bf   : > { %8053 = vmatpush1.bf16.msra.mxu1 %v10882_v60 }
 0x5c0   : > { %8054 = vmatprep.subr.bf16.mxu1 %v10890_v48  ;;  %8381 = vmatpush1.bf16.msra.mxu0 %v10921_v49 }
 0x5c1   : > { %8382 = vmatprep.subr.bf16.mxu0 %v10929_v50  ;;  %v10948_v50 = vld [vmem:[%s15132_s8 + $0x840] ss:$48 sps:$4 sm:$0xff]  }
 0x5c3   : > { %8055 = vmatpush1.bf16.msra.mxu1 %v10888_v53 }
 0x5c4   : > { %8056 = vmatprep.subr.bf16.mxu1 %v10896_v56  ;;  %8383 = vmatpush1.bf16.msra.mxu0 %v10927_v57  ;;  %v10956_v57 = vld [vmem:[%s15132_s8 + $0x8a4] ss:$48 sps:$4 sm:$0xff]  }
 0x5c5   : > { %8384 = vmatprep.subr.bf16.mxu0 %v10935_v25 }
 0x5c7   : > { %8057 = vmatpush1.bf16.msra.mxu1 %v10894_v61  ;;  %v10995_v61 = vld [vmem:[%s15132_s8 + $0x8c4] ss:$48 sps:$4 sm:$0xff]  }
 0x5c8   : > { %8058 = vmatprep.subr.bf16.mxu1 %v10902_v62  ;;  %8385 = vmatpush1.bf16.msra.mxu0 %v10933_v26  ;;  %v10962_v62 = vld [vmem:[%s15132_s8 + $0x904] ss:$48 sps:$4 sm:$0xff]   ;;  %v10993_v26 = vld [vmem:[%s15132_s8 + $0x8c0] ss:$48 sps:$4 sm:$0xff]  }
 0x5c9   : > { %8386 = vmatprep.subr.bf16.mxu0 %v10941_v63  ;;  %v11001_v63 = vld [vmem:[%s15132_s8 + $0x924] ss:$48 sps:$4 sm:$0xff]  }
 0x5cb   : > { %8059 = vmatpush1.bf16.msra.mxu1 %v10900_v2  ;;  %v10960_v2 = vld [vmem:[%s15132_s8 + $0x900] ss:$48 sps:$4 sm:$0xff]  }
 0x5cc   : > { %8060 = vmatprep.subr.bf16.mxu1 %v10908_v4  ;;  %8387 = vmatpush1.bf16.msra.mxu0 %v10939_v6  ;;  %v10968_v4 = vld [vmem:[%s15132_s8 + $0x964] ss:$48 sps:$4 sm:$0xff]   ;;  %v10999_v6 = vld [vmem:[%s15132_s8 + $0x920] ss:$48 sps:$4 sm:$0xff]  }
 0x5cd   : > { %8388 = vmatprep.subr.bf16.mxu0 %v10947_v9  ;;  %v11007_v9 = vld [vmem:[%s15132_s8 + $0x984] ss:$48 sps:$4 sm:$0xff]  }
 0x5cf   : > { %8061 = vmatpush1.bf16.msra.mxu1 %v10906_v10  ;;  %v10966_v10 = vld [vmem:[%s15132_s8 + $0x960] ss:$48 sps:$4 sm:$0xff]  }
 0x5d0   : > { %8071 = vmatprep.subr.bf16.mxu1 %v10914_v11  ;;  %8389 = vmatpush1.bf16.msra.mxu0 %v10945_v13  ;;  %v10974_v11 = vld [vmem:[%s15132_s8 + $0x9c4] ss:$48 sps:$4 sm:$0xff]   ;;  %v11005_v13 = vld [vmem:[%s15132_s8 + $0x980] ss:$48 sps:$4 sm:$0xff]  }
 0x5d1   : > { %8399 = vmatprep.subr.bf16.mxu0 %v10953_v29  ;;  %v11013_v29 = vld [vmem:[%s15132_s8 + $0x9e4] ss:$48 sps:$4 sm:$0xff]  }
 0x5d2   : > { %8063 = vmatmul.mubr.bf16.vlgmr.msra.gmra.mrb[20].mxu1 %v14018_v14 }
 0x5d3   : > { %8072 = vmatpush1.bf16.msra.mxu1 %v10912_v17  ;;  %8391 = vmatmul.mubr.bf16.vlgmr.msra.gmra.mrb[32].mxu0 %v14018_v14  ;;  %v10972_v17 = vld [vmem:[%s15132_s8 + $0x9c0] ss:$48 sps:$4 sm:$0xff]  }
 0x5d4   : > { %8073 = vmatprep.subr.bf16.mxu1 %v10920_v59  ;;  %8400 = vmatpush1.bf16.msra.mxu0 %v10951_v19  ;;  %v10980_v59 = vld [vmem:[%s15132_s8 + $0xa24] ss:$48 sps:$4 sm:$0xff]   ;;  %v11011_v19 = vld [vmem:[%s15132_s8 + $0x9e0] ss:$48 sps:$4 sm:$0xff]  }
 0x5d5   : > { %8401 = vmatprep.subr.bf16.mxu0 %v10959_v23  ;;  %8103 = vmatprep.mubr.bf16.mxu1 %v14034_v24  ;;  %v11019_v23 = vld [vmem:[%s15132_s8 + $0xa44] ss:$48 sps:$4 sm:$0xff]  }
 0x5d6   : > { %8431 = vmatprep.mubr.bf16.mxu0 %v14034_v24 }
 0x5d7   : > { %8074 = vmatpush1.bf16.msra.mxu1 %v10918_v27  ;;  %v10978_v27 = vld [vmem:[%s15132_s8 + $0xa20] ss:$48 sps:$4 sm:$0xff]  }
 0x5d8   : > { %8075 = vmatprep.subr.bf16.mxu1 %v10926_v28  ;;  %8402 = vmatpush1.bf16.msra.mxu0 %v10957_v5  ;;  %v10986_v28 = vld [vmem:[%s15132_s8 + $0xa84] ss:$48 sps:$4 sm:$0xff]   ;;  %v11017_v5 = vld [vmem:[%s15132_s8 + $0xa40] ss:$48 sps:$4 sm:$0xff]  }
 0x5d9   : > { %8403 = vmatprep.subr.bf16.mxu0 %v10965_v7  ;;  %v11025_v7 = vld [vmem:[%s15132_s8 + $0xaa4] ss:$48 sps:$4 sm:$0xff]  }
 0x5db   : > { %8076 = vmatpush1.bf16.msra.mxu1 %v10924_v31  ;;  %v10984_v31 = vld [vmem:[%s15132_s8 + $0xa80] ss:$48 sps:$4 sm:$0xff]  }
 0x5dc   : > { %8077 = vmatprep.subr.bf16.mxu1 %v10932_v20  ;;  %8404 = vmatpush1.bf16.msra.mxu0 %v10963_v32  ;;  %v10992_v20 = vld [vmem:[%s15132_s8 + $0xae4] ss:$48 sps:$4 sm:$0xff]   ;;  %v11023_v32 = vld [vmem:[%s15132_s8 + $0xaa0] ss:$48 sps:$4 sm:$0xff]  }
 0x5dd   : > { %8405 = vmatprep.subr.bf16.mxu0 %v10971_v33  ;;  %v11031_v33 = vld [vmem:[%s15132_s8 + $0xb04] ss:$48 sps:$4 sm:$0xff]  }
 0x5df   : > { %8078 = vmatpush1.bf16.msra.mxu1 %v10930_v45  ;;  %v10990_v45 = vld [vmem:[%s15132_s8 + $0xae0] ss:$48 sps:$4 sm:$0xff]  }
 0x5e0   : > { %8079 = vmatprep.subr.bf16.mxu1 %v10938_v1  ;;  %8406 = vmatpush1.bf16.msra.mxu0 %v10969_v58  ;;  %v10998_v1 = vld [vmem:[%s15132_s8 + $0xb44] ss:$48 sps:$4 sm:$0xff]   ;;  %v11029_v58 = vld [vmem:[%s15132_s8 + $0xb00] ss:$48 sps:$4 sm:$0xff]  }
 0x5e1   : > { %8407 = vmatprep.subr.bf16.mxu0 %v10977_v34  ;;  %v11037_v34 = vld [vmem:[%s15132_s8 + $0xb64] ss:$48 sps:$4 sm:$0xff]  }
 0x5e3   : > { %8080 = vmatpush1.bf16.msra.mxu1 %v10936_v22  ;;  %v10996_v22 = vld [vmem:[%s15132_s8 + $0xb40] ss:$48 sps:$4 sm:$0xff]  }
 0x5e4   : > { %8081 = vmatprep.subr.bf16.mxu1 %v10944_v35  ;;  %8408 = vmatpush1.bf16.msra.mxu0 %v10975_v36  ;;  %v11004_v35 = vld [vmem:[%s15132_s8 + $0xba4] ss:$48 sps:$4 sm:$0xff]   ;;  %v11035_v36 = vld [vmem:[%s15132_s8 + $0xb60] ss:$48 sps:$4 sm:$0xff]  }
 0x5e5   : > { %8409 = vmatprep.subr.bf16.mxu0 %v10983_v37  ;;  %v11043_v37 = vld [vmem:[%s15132_s8 + $0xbc4] ss:$48 sps:$4 sm:$0xff]  }
 0x5e6   : > { %v5497_v60 = vpop.f32.mrb[20].mxu0 }
 0x5e7   : > { %v14101_v48 = vadd.f32 %v5497_v60, %v13883_v18  ;;  %v5499_v49 = vpop.f32.mrb[21].mxu0  ;;  %8082 = vmatpush1.bf16.msra.mxu1 %v10942_v39  ;;  %v10987_v18 = vld [vmem:[%s15132_s8 + $0x860] ss:$48 sps:$4 sm:$0xff]   ;;  %v14216_v39 = vrot.slane %v13784_v38, %v12033_v55  ;;  %v11049_v38 = vld [vmem:[%s15132_s8 + $0x2c] ss:$48 sps:$4 sm:$0xff]  }
 0x5e8   : > { %v14107_v53 = vadd.f32 %v5499_v49, %v13886_v21  ;;  %v5501_v56 = vpop.f32.mrb[22].mxu0  ;;  %8083 = vmatprep.subr.bf16.mxu1 %v10950_v40  ;;  %8410 = vmatpush1.bf16.msra.mxu0 %v10981_v41  ;;  %v10954_v21 = vld [vmem:[%s15132_s8 + $0x8a0] ss:$48 sps:$4 sm:$0xff]   ;;  %v11010_v41 = vld [vmem:[%s15132_s8 + $0xc] ss:$48 sps:$4 sm:$0xff]  }
 0x5e9   : > { %v5502_v25 = vpop.f32.mrb[23].mxu0  ;;  %8411 = vmatprep.subr.bf16.mxu0 %v10989_v42  ;;  %v11002_v40 = vld [vmem:[%s15132_s8 + $0xba0] ss:$48 sps:$4 sm:$0xff]   ;;  %v14232_v60 = vpack.c.bf16 %v14216_v39, %v14216_v39  ;;  %v11008_v49 = vld [vmem:[%s15132_s8 + $0x8] ss:$48 sps:$4 sm:$0xff]  }
 0x5ea   : > { %v11041_v42 = vld [vmem:[%s15132_s8 + $0xbc0] ss:$48 sps:$4 sm:$0xff]   ;;  %v11047_v56 = vld [vmem:[%s15132_s8 + $0x28] ss:$48 sps:$4 sm:$0xff]   ;;  %v11022_v25 = vld [vmem:[%s15132_s8 + $0xcc] ss:$48 sps:$4 sm:$0xff]  }
 0x5eb   : > { %8084 = vmatpush1.bf16.msra.mxu1 %v10948_v50  ;;  %v11016_v50 = vld [vmem:[%s15132_s8 + $0x6c] ss:$48 sps:$4 sm:$0xff]  }
 0x5ec   : > { %8085 = vmatprep.subr.bf16.mxu1 %v10956_v57  ;;  %8412 = vmatpush1.bf16.msra.mxu0 %v10987_v18  ;;  %v11055_v57 = vld [vmem:[%s15132_s8 + $0x8c] ss:$48 sps:$4 sm:$0xff]   ;;  %v11014_v18 = vld [vmem:[%s15132_s8 + $0x68] ss:$48 sps:$4 sm:$0xff]  }
 0x5ed   : > { %8413 = vmatprep.subr.bf16.mxu0 %v10995_v61  ;;  %v11053_v61 = vld [vmem:[%s15132_s8 + $0x88] ss:$48 sps:$4 sm:$0xff]  }
 0x5ef   : > { %8086 = vmatpush1.bf16.msra.mxu1 %v10954_v21  ;;  %v11061_v21 = vld [vmem:[%s15132_s8 + $0xec] ss:$48 sps:$4 sm:$0xff]  }
 0x5f0   : > { %8087 = vmatprep.subr.bf16.mxu1 %v10962_v62  ;;  %8414 = vmatpush1.bf16.msra.mxu0 %v10993_v26  ;;  %v11020_v62 = vld [vmem:[%s15132_s8 + $0xc8] ss:$48 sps:$4 sm:$0xff]   ;;  %v11028_v26 = vld [vmem:[%s15132_s8 + $0x12c] ss:$48 sps:$4 sm:$0xff]  }
 0x5f1   : > { %8415 = vmatprep.subr.bf16.mxu0 %v11001_v63  ;;  %v11059_v63 = vld [vmem:[%s15132_s8 + $0xe8] ss:$48 sps:$4 sm:$0xff]  }
 0x5f3   : > { %8088 = vmatpush1.bf16.msra.mxu1 %v10960_v2  ;;  %v11067_v2 = vld [vmem:[%s15132_s8 + $0x14c] ss:$48 sps:$4 sm:$0xff]  }
 0x5f4   : > { %8089 = vmatprep.subr.bf16.mxu1 %v10968_v4  ;;  %8416 = vmatpush1.bf16.msra.mxu0 %v10999_v6  ;;  %v11026_v4 = vld [vmem:[%s15132_s8 + $0x128] ss:$48 sps:$4 sm:$0xff]   ;;  %v11034_v6 = vld [vmem:[%s15132_s8 + $0x18c] ss:$48 sps:$4 sm:$0xff]  }
 0x5f5   : > { %8417 = vmatprep.subr.bf16.mxu0 %v11007_v9  ;;  %v11065_v9 = vld [vmem:[%s15132_s8 + $0x148] ss:$48 sps:$4 sm:$0xff]  }
 0x5f7   : > { %8090 = vmatpush1.bf16.msra.mxu1 %v10966_v10  ;;  %v11073_v10 = vld [vmem:[%s15132_s8 + $0x1ac] ss:$48 sps:$4 sm:$0xff]  }
 0x5f8   : > { %8091 = vmatprep.subr.bf16.mxu1 %v10974_v11  ;;  %8418 = vmatpush1.bf16.msra.mxu0 %v11005_v13  ;;  %v11032_v11 = vld [vmem:[%s15132_s8 + $0x188] ss:$48 sps:$4 sm:$0xff]   ;;  %v11040_v13 = vld [vmem:[%s15132_s8 + $0x1ec] ss:$48 sps:$4 sm:$0xff]  }
 0x5f9   : > { %8419 = vmatprep.subr.bf16.mxu0 %v11013_v29  ;;  %v11071_v29 = vld [vmem:[%s15132_s8 + $0x1a8] ss:$48 sps:$4 sm:$0xff]  }
 0x5fb   : > { %8092 = vmatpush1.bf16.msra.mxu1 %v10972_v17  ;;  %v11079_v17 = vld [vmem:[%s15132_s8 + $0x20c] ss:$48 sps:$4 sm:$0xff]  }
 0x5fc   : > { %8093 = vmatprep.subr.bf16.mxu1 %v10980_v59  ;;  %8420 = vmatpush1.bf16.msra.mxu0 %v11011_v19  ;;  %v11038_v59 = vld [vmem:[%s15132_s8 + $0x1e8] ss:$48 sps:$4 sm:$0xff]   ;;  %v11046_v19 = vld [vmem:[%s15132_s8 + $0x24c] ss:$48 sps:$4 sm:$0xff]  }
 0x5fd   : > { %8421 = vmatprep.subr.bf16.mxu0 %v11019_v23  ;;  %v11077_v23 = vld [vmem:[%s15132_s8 + $0x208] ss:$48 sps:$4 sm:$0xff]  }
 0x5ff   : > { %8094 = vmatpush1.bf16.msra.mxu1 %v10978_v27  ;;  %v11085_v27 = vld [vmem:[%s15132_s8 + $0x26c] ss:$48 sps:$4 sm:$0xff]  }
 0x600   : > { %8095 = vmatprep.subr.bf16.mxu1 %v10986_v28  ;;  %8422 = vmatpush1.bf16.msra.mxu0 %v11017_v5 }
 0x601   : > { %8423 = vmatprep.subr.bf16.mxu0 %v11025_v7 }
 0x603   : > { %8096 = vmatpush1.bf16.msra.mxu1 %v10984_v31  ;;  %v11044_v31 = vld [vmem:[%s15132_s8 + $0x248] ss:$48 sps:$4 sm:$0xff]  }
 0x604   : > { %8097 = vmatprep.subr.bf16.mxu1 %v10992_v20  ;;  %8424 = vmatpush1.bf16.msra.mxu0 %v11023_v32 }
 0x605   : > { %8425 = vmatprep.subr.bf16.mxu0 %v11031_v33  ;;  %v11052_v33 = vld [vmem:[%s15132_s8 + $0x2ac] ss:$48 sps:$4 sm:$0xff]  }
 0x607   : > { %8098 = vmatpush1.bf16.msra.mxu1 %v10990_v45 }
 0x608   : > { %8099 = vmatprep.subr.bf16.mxu1 %v10998_v1  ;;  %8426 = vmatpush1.bf16.msra.mxu0 %v11029_v58  ;;  %v11091_v1 = vld [vmem:[%s15132_s8 + $0x2cc] ss:$48 sps:$4 sm:$0xff]  }
 0x609   : > { %8427 = vmatprep.subr.bf16.mxu0 %v11037_v34  ;;  %v11058_v58 = vld [vmem:[%s15132_s8 + $0x30c] ss:$48 sps:$4 sm:$0xff]   ;;  %v11089_v34 = vld [vmem:[%s15132_s8 + $0x2c8] ss:$48 sps:$4 sm:$0xff]  }
 0x60b   : > { %8100 = vmatpush1.bf16.msra.mxu1 %v10996_v22  ;;  %v11097_v22 = vld [vmem:[%s15132_s8 + $0x32c] ss:$48 sps:$4 sm:$0xff]  }
 0x60c   : > { %8101 = vmatprep.subr.bf16.mxu1 %v11004_v35  ;;  %8428 = vmatpush1.bf16.msra.mxu0 %v11035_v36  ;;  %v11056_v35 = vld [vmem:[%s15132_s8 + $0x308] ss:$48 sps:$4 sm:$0xff]   ;;  %v11064_v36 = vld [vmem:[%s15132_s8 + $0x36c] ss:$48 sps:$4 sm:$0xff]  }
 0x60d   : > { %8429 = vmatprep.subr.bf16.mxu0 %v11043_v37  ;;  %v11095_v37 = vld [vmem:[%s15132_s8 + $0x328] ss:$48 sps:$4 sm:$0xff]  }
 0x60f   : > { %8102 = vmatpush1.bf16.msra.mxu1 %v11002_v40  ;;  %v11103_v40 = vld [vmem:[%s15132_s8 + $0x38c] ss:$48 sps:$4 sm:$0xff]  }
 0x610   : > { %8112 = vmatprep.subr.bf16.mxu1 %v11010_v41  ;;  %8430 = vmatpush1.bf16.msra.mxu0 %v11041_v42  ;;  %v11062_v41 = vld [vmem:[%s15132_s8 + $0x368] ss:$48 sps:$4 sm:$0xff]   ;;  %v11070_v42 = vld [vmem:[%s15132_s8 + $0x3cc] ss:$48 sps:$4 sm:$0xff]  }
 0x611   : > { %8440 = vmatprep.subr.bf16.mxu0 %v11049_v38  ;;  %v11101_v38 = vld [vmem:[%s15132_s8 + $0x388] ss:$48 sps:$4 sm:$0xff]  }
 0x612   : > { %8104 = vmatmul.mubr.bf16.vlgmr.msra.gmra.mrb[20].mxu1 %v14232_v60 }
 0x613   : > { %8113 = vmatpush1.bf16.msra.mxu1 %v11008_v49  ;;  %8432 = vmatmul.mubr.bf16.vlgmr.msra.gmra.mrb[32].mxu0 %v14232_v60  ;;  %v11109_v49 = vld [vmem:[%s15132_s8 + $0x3ec] ss:$48 sps:$4 sm:$0xff]  }
 0x614   : > { %8114 = vmatprep.subr.bf16.mxu1 %v11016_v50  ;;  %8441 = vmatpush1.bf16.msra.mxu0 %v11047_v56  ;;  %v11068_v50 = vld [vmem:[%s15132_s8 + $0x3c8] ss:$48 sps:$4 sm:$0xff]   ;;  %v11076_v56 = vld [vmem:[%s15132_s8 + $0x42c] ss:$48 sps:$4 sm:$0xff]  }
 0x615   : > { %8442 = vmatprep.subr.bf16.mxu0 %v11055_v57  ;;  %8144 = vmatprep.mubr.bf16.mxu1 %v13816_v51  ;;  %v11107_v57 = vld [vmem:[%s15132_s8 + $0x3e8] ss:$48 sps:$4 sm:$0xff]  }
 0x616   : > { %8472 = vmatprep.mubr.bf16.mxu0 %v13816_v51 }
 0x617   : > { %8115 = vmatpush1.bf16.msra.mxu1 %v11014_v18  ;;  %v11115_v18 = vld [vmem:[%s15132_s8 + $0x44c] ss:$48 sps:$4 sm:$0xff]  }
 0x618   : > { %8116 = vmatprep.subr.bf16.mxu1 %v11022_v25  ;;  %8443 = vmatpush1.bf16.msra.mxu0 %v11053_v61  ;;  %v11074_v25 = vld [vmem:[%s15132_s8 + $0x428] ss:$48 sps:$4 sm:$0xff]   ;;  %v11082_v61 = vld [vmem:[%s15132_s8 + $0x48c] ss:$48 sps:$4 sm:$0xff]  }
 0x619   : > { %8444 = vmatprep.subr.bf16.mxu0 %v11061_v21  ;;  %v11113_v21 = vld [vmem:[%s15132_s8 + $0x448] ss:$48 sps:$4 sm:$0xff]  }
 0x61b   : > { %8117 = vmatpush1.bf16.msra.mxu1 %v11020_v62  ;;  %v11121_v62 = vld [vmem:[%s15132_s8 + $0x4ac] ss:$48 sps:$4 sm:$0xff]  }
 0x61c   : > { %8118 = vmatprep.subr.bf16.mxu1 %v11028_v26  ;;  %8445 = vmatpush1.bf16.msra.mxu0 %v11059_v63  ;;  %v11080_v26 = vld [vmem:[%s15132_s8 + $0x488] ss:$48 sps:$4 sm:$0xff]   ;;  %v11088_v63 = vld [vmem:[%s15132_s8 + $0x4ec] ss:$48 sps:$4 sm:$0xff]  }
 0x61d   : > { %8446 = vmatprep.subr.bf16.mxu0 %v11067_v2  ;;  %v11119_v2 = vld [vmem:[%s15132_s8 + $0x4a8] ss:$48 sps:$4 sm:$0xff]  }
 0x61f   : > { %8119 = vmatpush1.bf16.msra.mxu1 %v11026_v4  ;;  %v11127_v4 = vld [vmem:[%s15132_s8 + $0x50c] ss:$48 sps:$4 sm:$0xff]  }
 0x620   : > { %8120 = vmatprep.subr.bf16.mxu1 %v11034_v6  ;;  %8447 = vmatpush1.bf16.msra.mxu0 %v11065_v9  ;;  %v11086_v6 = vld [vmem:[%s15132_s8 + $0x4e8] ss:$48 sps:$4 sm:$0xff]   ;;  %v11094_v9 = vld [vmem:[%s15132_s8 + $0x54c] ss:$48 sps:$4 sm:$0xff]  }
 0x621   : > { %8448 = vmatprep.subr.bf16.mxu0 %v11073_v10  ;;  %v11125_v10 = vld [vmem:[%s15132_s8 + $0x508] ss:$48 sps:$4 sm:$0xff]  }
 0x623   : > { %8121 = vmatpush1.bf16.msra.mxu1 %v11032_v11  ;;  %v11133_v11 = vld [vmem:[%s15132_s8 + $0x56c] ss:$48 sps:$4 sm:$0xff]  }
 0x624   : > { %8122 = vmatprep.subr.bf16.mxu1 %v11040_v13  ;;  %8449 = vmatpush1.bf16.msra.mxu0 %v11071_v29  ;;  %v11092_v13 = vld [vmem:[%s15132_s8 + $0x548] ss:$48 sps:$4 sm:$0xff]   ;;  %v11100_v29 = vld [vmem:[%s15132_s8 + $0x5ac] ss:$48 sps:$4 sm:$0xff]  }
 0x625   : > { %8450 = vmatprep.subr.bf16.mxu0 %v11079_v17  ;;  %v11131_v17 = vld [vmem:[%s15132_s8 + $0x568] ss:$48 sps:$4 sm:$0xff]  }
 0x626   : > { %v5538_v28 = vpop.f32.mrb[24].mxu0 }
 0x627   : > { %v14311_v5 = vadd.f32 %v5538_v28, %v12986_v15  ;;  %v5540_v7 = vpop.f32.mrb[25].mxu0  ;;  %8123 = vmatpush1.bf16.msra.mxu1 %v11038_v59  ;;  %v11083_v15 = vld [vmem:[%s15132_s8 + $0x268] ss:$48 sps:$4 sm:$0xff]   ;;  %v11139_v59 = vld [vmem:[%s15132_s8 + $0x5cc] ss:$48 sps:$4 sm:$0xff]  }
 0x628   : > { %v14317_v20 = vadd.f32 %v5540_v7, %v12988_v16  ;;  %v5542_v32 = vpop.f32.mrb[26].mxu0  ;;  %8124 = vmatprep.subr.bf16.mxu1 %v11046_v19  ;;  %8451 = vmatpush1.bf16.msra.mxu0 %v11077_v23  ;;  %v11050_v16 = vld [vmem:[%s15132_s8 + $0x2a8] ss:$48 sps:$4 sm:$0xff]   ;;  %v11106_v23 = vld [vmem:[%s15132_s8 + $0x60c] ss:$48 sps:$4 sm:$0xff]  }
 0x629   : > { %v5543_v45 = vpop.f32.mrb[27].mxu0  ;;  %8452 = vmatprep.subr.bf16.mxu0 %v11085_v27  ;;  %v11098_v19 = vld [vmem:[%s15132_s8 + $0x5a8] ss:$48 sps:$4 sm:$0xff]   ;;  %v11145_v28 = vld [vmem:[%s15132_s8 + $0x62c] ss:$48 sps:$4 sm:$0xff]  }
 0x62a   : > { %v11137_v27 = vld [vmem:[%s15132_s8 + $0x5c8] ss:$48 sps:$4 sm:$0xff]   ;;  %v11118_v45 = vld [vmem:[%s15132_s8 + $0x6cc] ss:$48 sps:$4 sm:$0xff]  }
 0x62b   : > { %8125 = vmatpush1.bf16.msra.mxu1 %v11044_v31  ;;  %v11104_v7 = vld [vmem:[%s15132_s8 + $0x608] ss:$48 sps:$4 sm:$0xff]   ;;  %v11112_v31 = vld [vmem:[%s15132_s8 + $0x66c] ss:$48 sps:$4 sm:$0xff]  }
 0x62c   : > { %8126 = vmatprep.subr.bf16.mxu1 %v11052_v33  ;;  %8453 = vmatpush1.bf16.msra.mxu0 %v11083_v15  ;;  %v11143_v32 = vld [vmem:[%s15132_s8 + $0x628] ss:$48 sps:$4 sm:$0xff]   ;;  %v11151_v33 = vld [vmem:[%s15132_s8 + $0x68c] ss:$48 sps:$4 sm:$0xff]  }
 0x62d   : > { %8454 = vmatprep.subr.bf16.mxu0 %v11091_v1  ;;  %v11110_v15 = vld [vmem:[%s15132_s8 + $0x668] ss:$48 sps:$4 sm:$0xff]  }
 0x62e   : > { %v11149_v1 = vld [vmem:[%s15132_s8 + $0x688] ss:$48 sps:$4 sm:$0xff]  }
 0x62f   : > { %8127 = vmatpush1.bf16.msra.mxu1 %v11050_v16  ;;  %v11157_v16 = vld [vmem:[%s15132_s8 + $0x6ec] ss:$48 sps:$4 sm:$0xff]  }
 0x630   : > { %8128 = vmatprep.subr.bf16.mxu1 %v11058_v58  ;;  %8455 = vmatpush1.bf16.msra.mxu0 %v11089_v34  ;;  %v11116_v58 = vld [vmem:[%s15132_s8 + $0x6c8] ss:$48 sps:$4 sm:$0xff]   ;;  %v11124_v34 = vld [vmem:[%s15132_s8 + $0x72c] ss:$48 sps:$4 sm:$0xff]  }
 0x631   : > { %8456 = vmatprep.subr.bf16.mxu0 %v11097_v22  ;;  %v11155_v22 = vld [vmem:[%s15132_s8 + $0x6e8] ss:$48 sps:$4 sm:$0xff]  }
 0x633   : > { %8129 = vmatpush1.bf16.msra.mxu1 %v11056_v35  ;;  %v11163_v35 = vld [vmem:[%s15132_s8 + $0x74c] ss:$48 sps:$4 sm:$0xff]  }
 0x634   : > { %8130 = vmatprep.subr.bf16.mxu1 %v11064_v36  ;;  %8457 = vmatpush1.bf16.msra.mxu0 %v11095_v37  ;;  %v11122_v36 = vld [vmem:[%s15132_s8 + $0x728] ss:$48 sps:$4 sm:$0xff]   ;;  %v11130_v37 = vld [vmem:[%s15132_s8 + $0x78c] ss:$48 sps:$4 sm:$0xff]  }
 0x635   : > { %8458 = vmatprep.subr.bf16.mxu0 %v11103_v40  ;;  %v11161_v40 = vld [vmem:[%s15132_s8 + $0x748] ss:$48 sps:$4 sm:$0xff]  }
 0x637   : > { %8131 = vmatpush1.bf16.msra.mxu1 %v11062_v41  ;;  %v11169_v41 = vld [vmem:[%s15132_s8 + $0x7ac] ss:$48 sps:$4 sm:$0xff]  }
 0x638   : > { %8132 = vmatprep.subr.bf16.mxu1 %v11070_v42  ;;  %8459 = vmatpush1.bf16.msra.mxu0 %v11101_v38  ;;  %v11128_v42 = vld [vmem:[%s15132_s8 + $0x788] ss:$48 sps:$4 sm:$0xff]   ;;  %v11136_v38 = vld [vmem:[%s15132_s8 + $0x7ec] ss:$48 sps:$4 sm:$0xff]  }
 0x639   : > { %8460 = vmatprep.subr.bf16.mxu0 %v11109_v49  ;;  %v11167_v49 = vld [vmem:[%s15132_s8 + $0x7a8] ss:$48 sps:$4 sm:$0xff]  }
 0x63b   : > { %8133 = vmatpush1.bf16.msra.mxu1 %v11068_v50  ;;  %v11175_v50 = vld [vmem:[%s15132_s8 + $0x80c] ss:$48 sps:$4 sm:$0xff]  }
 0x63c   : > { %8134 = vmatprep.subr.bf16.mxu1 %v11076_v56  ;;  %8461 = vmatpush1.bf16.msra.mxu0 %v11107_v57  ;;  %v11134_v56 = vld [vmem:[%s15132_s8 + $0x7e8] ss:$48 sps:$4 sm:$0xff]   ;;  %v11142_v57 = vld [vmem:[%s15132_s8 + $0x84c] ss:$48 sps:$4 sm:$0xff]  }
 0x63d   : > { %8462 = vmatprep.subr.bf16.mxu0 %v11115_v18  ;;  %v11173_v18 = vld [vmem:[%s15132_s8 + $0x808] ss:$48 sps:$4 sm:$0xff]  }
 0x63f   : > { %8135 = vmatpush1.bf16.msra.mxu1 %v11074_v25  ;;  %v11181_v25 = vld [vmem:[%s15132_s8 + $0x86c] ss:$48 sps:$4 sm:$0xff]  }
 0x640   : > { %8136 = vmatprep.subr.bf16.mxu1 %v11082_v61  ;;  %8463 = vmatpush1.bf16.msra.mxu0 %v11113_v21 }
 0x641   : > { %8464 = vmatprep.subr.bf16.mxu0 %v11121_v62 }
 0x643   : > { %8137 = vmatpush1.bf16.msra.mxu1 %v11080_v26  ;;  %v11140_v26 = vld [vmem:[%s15132_s8 + $0x848] ss:$48 sps:$4 sm:$0xff]  }
 0x644   : > { %8138 = vmatprep.subr.bf16.mxu1 %v11088_v63  ;;  %8465 = vmatpush1.bf16.msra.mxu0 %v11119_v2 }
 0x645   : > { %8466 = vmatprep.subr.bf16.mxu0 %v11127_v4  ;;  %v11148_v4 = vld [vmem:[%s15132_s8 + $0x8ac] ss:$48 sps:$4 sm:$0xff]  }
 0x647   : > { %8139 = vmatpush1.bf16.msra.mxu1 %v11086_v6 }
 0x648   : > { %8140 = vmatprep.subr.bf16.mxu1 %v11094_v9  ;;  %8467 = vmatpush1.bf16.msra.mxu0 %v11125_v10  ;;  %v11187_v9 = vld [vmem:[%s15132_s8 + $0x8cc] ss:$48 sps:$4 sm:$0xff]  }
 0x649   : > { %8468 = vmatprep.subr.bf16.mxu0 %v11133_v11  ;;  %v11154_v10 = vld [vmem:[%s15132_s8 + $0x90c] ss:$48 sps:$4 sm:$0xff]   ;;  %v11185_v11 = vld [vmem:[%s15132_s8 + $0x8c8] ss:$48 sps:$4 sm:$0xff]  }
 0x64b   : > { %8141 = vmatpush1.bf16.msra.mxu1 %v11092_v13  ;;  %v11193_v13 = vld [vmem:[%s15132_s8 + $0x92c] ss:$48 sps:$4 sm:$0xff]  }
 0x64c   : > { %8142 = vmatprep.subr.bf16.mxu1 %v11100_v29  ;;  %8469 = vmatpush1.bf16.msra.mxu0 %v11131_v17  ;;  %v11152_v29 = vld [vmem:[%s15132_s8 + $0x908] ss:$48 sps:$4 sm:$0xff]   ;;  %v11160_v17 = vld [vmem:[%s15132_s8 + $0x96c] ss:$48 sps:$4 sm:$0xff]  }
 0x64d   : > { %8470 = vmatprep.subr.bf16.mxu0 %v11139_v59  ;;  %v11191_v59 = vld [vmem:[%s15132_s8 + $0x928] ss:$48 sps:$4 sm:$0xff]  }
 0x64f   : > { %8143 = vmatpush1.bf16.msra.mxu1 %v11098_v19  ;;  %v11199_v19 = vld [vmem:[%s15132_s8 + $0x98c] ss:$48 sps:$4 sm:$0xff]  }
 0x650   : > { %8153 = vmatprep.subr.bf16.mxu1 %v11106_v23  ;;  %8471 = vmatpush1.bf16.msra.mxu0 %v11137_v27  ;;  %v11158_v23 = vld [vmem:[%s15132_s8 + $0x968] ss:$48 sps:$4 sm:$0xff]   ;;  %v11166_v27 = vld [vmem:[%s15132_s8 + $0x9cc] ss:$48 sps:$4 sm:$0xff]  }
 0x651   : > { %8481 = vmatprep.subr.bf16.mxu0 %v11145_v28  ;;  %v11197_v28 = vld [vmem:[%s15132_s8 + $0x988] ss:$48 sps:$4 sm:$0xff]  }
 0x652   : > { %8145 = vmatmul.mubr.bf16.vlgmr.msra.gmra.mrb[4].mxu1 %v14018_v14 }
 0x653   : > { %8154 = vmatpush1.bf16.msra.mxu1 %v11104_v7  ;;  %8473 = vmatmul.mubr.bf16.vlgmr.msra.gmra.mrb[36].mxu0 %v14018_v14  ;;  %v11205_v7 = vld [vmem:[%s15132_s8 + $0x9ec] ss:$48 sps:$4 sm:$0xff]  }
 0x654   : > { %8155 = vmatprep.subr.bf16.mxu1 %v11112_v31  ;;  %8482 = vmatpush1.bf16.msra.mxu0 %v11143_v32  ;;  %v11164_v31 = vld [vmem:[%s15132_s8 + $0x9c8] ss:$48 sps:$4 sm:$0xff]   ;;  %v11172_v32 = vld [vmem:[%s15132_s8 + $0xa2c] ss:$48 sps:$4 sm:$0xff]  }
 0x655   : > { %8483 = vmatprep.subr.bf16.mxu0 %v11151_v33  ;;  %8185 = vmatprep.mubr.bf16.mxu1 %v14034_v24  ;;  %v11203_v33 = vld [vmem:[%s15132_s8 + $0x9e8] ss:$48 sps:$4 sm:$0xff]  }
 0x656   : > { %8513 = vmatprep.mubr.bf16.mxu0 %v14034_v24 }
 0x657   : > { %8156 = vmatpush1.bf16.msra.mxu1 %v11110_v15  ;;  %v11211_v15 = vld [vmem:[%s15132_s8 + $0xa4c] ss:$48 sps:$4 sm:$0xff]  }
 0x658   : > { %8157 = vmatprep.subr.bf16.mxu1 %v11118_v45  ;;  %8484 = vmatpush1.bf16.msra.mxu0 %v11149_v1  ;;  %v11170_v45 = vld [vmem:[%s15132_s8 + $0xa28] ss:$48 sps:$4 sm:$0xff]   ;;  %v11178_v1 = vld [vmem:[%s15132_s8 + $0xa8c] ss:$48 sps:$4 sm:$0xff]  }
 0x659   : > { %8485 = vmatprep.subr.bf16.mxu0 %v11157_v16  ;;  %v11209_v16 = vld [vmem:[%s15132_s8 + $0xa48] ss:$48 sps:$4 sm:$0xff]  }
 0x65b   : > { %8158 = vmatpush1.bf16.msra.mxu1 %v11116_v58  ;;  %v11217_v58 = vld [vmem:[%s15132_s8 + $0xaac] ss:$48 sps:$4 sm:$0xff]  }
 0x65c   : > { %8159 = vmatprep.subr.bf16.mxu1 %v11124_v34  ;;  %8486 = vmatpush1.bf16.msra.mxu0 %v11155_v22  ;;  %v11176_v34 = vld [vmem:[%s15132_s8 + $0xa88] ss:$48 sps:$4 sm:$0xff]   ;;  %v11184_v22 = vld [vmem:[%s15132_s8 + $0xaec] ss:$48 sps:$4 sm:$0xff]  }
 0x65d   : > { %8487 = vmatprep.subr.bf16.mxu0 %v11163_v35  ;;  %v11215_v35 = vld [vmem:[%s15132_s8 + $0xaa8] ss:$48 sps:$4 sm:$0xff]  }
 0x65f   : > { %8160 = vmatpush1.bf16.msra.mxu1 %v11122_v36  ;;  %v11223_v36 = vld [vmem:[%s15132_s8 + $0xb0c] ss:$48 sps:$4 sm:$0xff]  }
 0x660   : > { %8161 = vmatprep.subr.bf16.mxu1 %v11130_v37  ;;  %8488 = vmatpush1.bf16.msra.mxu0 %v11161_v40  ;;  %v11182_v37 = vld [vmem:[%s15132_s8 + $0xae8] ss:$48 sps:$4 sm:$0xff]   ;;  %v11190_v40 = vld [vmem:[%s15132_s8 + $0xb4c] ss:$48 sps:$4 sm:$0xff]  }
 0x661   : > { %8489 = vmatprep.subr.bf16.mxu0 %v11169_v41  ;;  %v11221_v41 = vld [vmem:[%s15132_s8 + $0xb08] ss:$48 sps:$4 sm:$0xff]  }
 0x663   : > { %8162 = vmatpush1.bf16.msra.mxu1 %v11128_v42  ;;  %v11229_v42 = vld [vmem:[%s15132_s8 + $0xb6c] ss:$48 sps:$4 sm:$0xff]  }
 0x664   : > { %8163 = vmatprep.subr.bf16.mxu1 %v11136_v38  ;;  %8490 = vmatpush1.bf16.msra.mxu0 %v11167_v49  ;;  %v11188_v38 = vld [vmem:[%s15132_s8 + $0xb48] ss:$48 sps:$4 sm:$0xff]   ;;  %v11196_v49 = vld [vmem:[%s15132_s8 + $0xbac] ss:$48 sps:$4 sm:$0xff]  }
 0x665   : > { %8491 = vmatprep.subr.bf16.mxu0 %v11175_v50  ;;  %v11227_v50 = vld [vmem:[%s15132_s8 + $0xb68] ss:$48 sps:$4 sm:$0xff]  }
 0x666   : > { %v5579_v61 = vpop.f32.mrb[28].mxu0 }
 0x667   : > { %v14513_v21 = vadd.f32 %v5579_v61, %v14311_v5  ;;  %v5581_v62 = vpop.f32.mrb[29].mxu0  ;;  %8164 = vmatpush1.bf16.msra.mxu1 %v11134_v56  ;;  %v11179_v5 = vld [vmem:[%s15132_s8 + $0x868] ss:$48 sps:$4 sm:$0xff]   ;;  %v11235_v56 = vld [vmem:[%s15132_s8 + $0xbcc] ss:$48 sps:$4 sm:$0xff]  }
 0x668   : > { %v14519_v63 = vadd.f32 %v5581_v62, %v14317_v20  ;;  %v5583_v2 = vpop.f32.mrb[30].mxu0  ;;  %8165 = vmatprep.subr.bf16.mxu1 %v11142_v57  ;;  %8492 = vmatpush1.bf16.msra.mxu0 %v11173_v18  ;;  %v11146_v20 = vld [vmem:[%s15132_s8 + $0x8a8] ss:$48 sps:$4 sm:$0xff]   ;;  %v11202_v18 = vld [vmem:[%s15132_s8 + $0x14] ss:$48 sps:$4 sm:$0xff]  }
 0x669   : > { %v5584_v6 = vpop.f32.mrb[31].mxu0  ;;  %8493 = vmatprep.subr.bf16.mxu0 %v11181_v25  ;;  %v11194_v57 = vld [vmem:[%s15132_s8 + $0xba8] ss:$48 sps:$4 sm:$0xff]   ;;  %v11200_v61 = vld [vmem:[%s15132_s8 + $0x10] ss:$48 sps:$4 sm:$0xff]  }
 0x66a   : > { %v11233_v25 = vld [vmem:[%s15132_s8 + $0xbc8] ss:$48 sps:$4 sm:$0xff]   ;;  %v11208_v62 = vld [vmem:[%s15132_s8 + $0x74] ss:$48 sps:$4 sm:$0xff]   ;;  %v11218_v6 = vld [vmem:[%s15132_s8 + $0x130] ss:$48 sps:$4 sm:$0xff]  }
 0x66b   : > { %8166 = vmatpush1.bf16.msra.mxu1 %v11140_v26  ;;  %v11206_v26 = vld [vmem:[%s15132_s8 + $0x70] ss:$48 sps:$4 sm:$0xff]   ;;  %v11214_v2 = vld [vmem:[%s15132_s8 + $0xd4] ss:$48 sps:$4 sm:$0xff]  }
 0x66c   : > { %8167 = vmatprep.subr.bf16.mxu1 %v11148_v4  ;;  %8494 = vmatpush1.bf16.msra.mxu0 %v11179_v5  ;;  %v11212_v4 = vld [vmem:[%s15132_s8 + $0xd0] ss:$48 sps:$4 sm:$0xff]   ;;  %v11220_v5 = vld [vmem:[%s15132_s8 + $0x134] ss:$48 sps:$4 sm:$0xff]  }
 0x66d   : > { %8495 = vmatprep.subr.bf16.mxu0 %v11187_v9  ;;  %v11226_v9 = vld [vmem:[%s15132_s8 + $0x194] ss:$48 sps:$4 sm:$0xff]  }
 0x66f   : > { %8168 = vmatpush1.bf16.msra.mxu1 %v11146_v20  ;;  %v11224_v20 = vld [vmem:[%s15132_s8 + $0x190] ss:$48 sps:$4 sm:$0xff]  }
 0x670   : > { %8169 = vmatprep.subr.bf16.mxu1 %v11154_v10  ;;  %8496 = vmatpush1.bf16.msra.mxu0 %v11185_v11  ;;  %v11232_v10 = vld [vmem:[%s15132_s8 + $0x1f4] ss:$48 sps:$4 sm:$0xff]   ;;  %v11230_v11 = vld [vmem:[%s15132_s8 + $0x1f0] ss:$48 sps:$4 sm:$0xff]  }
 0x671   : > { %8497 = vmatprep.subr.bf16.mxu0 %v11193_v13  ;;  %v11238_v13 = vld [vmem:[%s15132_s8 + $0x254] ss:$48 sps:$4 sm:$0xff]  }
 0x673   : > { %8170 = vmatpush1.bf16.msra.mxu1 %v11152_v29  ;;  %v11236_v29 = vld [vmem:[%s15132_s8 + $0x250] ss:$48 sps:$4 sm:$0xff]  }
 0x674   : > { %8171 = vmatprep.subr.bf16.mxu1 %v11160_v17  ;;  %8498 = vmatpush1.bf16.msra.mxu0 %v11191_v59  ;;  %v11241_v17 = vld [vmem:[%s15132_s8 + $0x2b4] ss:$48 sps:$4 sm:$0xff]   ;;  %v11239_v59 = vld [vmem:[%s15132_s8 + $0x2b0] ss:$48 sps:$4 sm:$0xff]  }
 0x675   : > { %8499 = vmatprep.subr.bf16.mxu0 %v11199_v19  ;;  %v11244_v19 = vld [vmem:[%s15132_s8 + $0x314] ss:$48 sps:$4 sm:$0xff]  }
 0x677   : > { %8172 = vmatpush1.bf16.msra.mxu1 %v11158_v23  ;;  %v11242_v23 = vld [vmem:[%s15132_s8 + $0x310] ss:$48 sps:$4 sm:$0xff]  }
 0x678   : > { %8173 = vmatprep.subr.bf16.mxu1 %v11166_v27  ;;  %8500 = vmatpush1.bf16.msra.mxu0 %v11197_v28  ;;  %v11247_v27 = vld [vmem:[%s15132_s8 + $0x374] ss:$48 sps:$4 sm:$0xff]   ;;  %v11245_v28 = vld [vmem:[%s15132_s8 + $0x370] ss:$48 sps:$4 sm:$0xff]  }
 0x679   : > { %8501 = vmatprep.subr.bf16.mxu0 %v11205_v7  ;;  %v11250_v7 = vld [vmem:[%s15132_s8 + $0x3d4] ss:$48 sps:$4 sm:$0xff]  }
 0x67b   : > { %8174 = vmatpush1.bf16.msra.mxu1 %v11164_v31  ;;  %v11248_v31 = vld [vmem:[%s15132_s8 + $0x3d0] ss:$48 sps:$4 sm:$0xff]  }
 0x67c   : > { %8175 = vmatprep.subr.bf16.mxu1 %v11172_v32  ;;  %8502 = vmatpush1.bf16.msra.mxu0 %v11203_v33  ;;  %v11253_v32 = vld [vmem:[%s15132_s8 + $0x434] ss:$48 sps:$4 sm:$0xff]   ;;  %v11251_v33 = vld [vmem:[%s15132_s8 + $0x430] ss:$48 sps:$4 sm:$0xff]  }
 0x67d   : > { %8503 = vmatprep.subr.bf16.mxu0 %v11211_v15  ;;  %v11256_v15 = vld [vmem:[%s15132_s8 + $0x494] ss:$48 sps:$4 sm:$0xff]  }
 0x67f   : > { %8176 = vmatpush1.bf16.msra.mxu1 %v11170_v45  ;;  %v11254_v45 = vld [vmem:[%s15132_s8 + $0x490] ss:$48 sps:$4 sm:$0xff]  }
 0x680   : > { %8177 = vmatprep.subr.bf16.mxu1 %v11178_v1  ;;  %8504 = vmatpush1.bf16.msra.mxu0 %v11209_v16  ;;  %v11259_v1 = vld [vmem:[%s15132_s8 + $0x4f4] ss:$48 sps:$4 sm:$0xff]   ;;  %v11257_v16 = vld [vmem:[%s15132_s8 + $0x4f0] ss:$48 sps:$4 sm:$0xff]  }
 0x681   : > { %8505 = vmatprep.subr.bf16.mxu0 %v11217_v58  ;;  %v11262_v58 = vld [vmem:[%s15132_s8 + $0x554] ss:$48 sps:$4 sm:$0xff]  }
 0x683   : > { %8178 = vmatpush1.bf16.msra.mxu1 %v11176_v34  ;;  %v11260_v34 = vld [vmem:[%s15132_s8 + $0x550] ss:$48 sps:$4 sm:$0xff]  }
 0x684   : > { %8179 = vmatprep.subr.bf16.mxu1 %v11184_v22  ;;  %8506 = vmatpush1.bf16.msra.mxu0 %v11215_v35  ;;  %v11265_v22 = vld [vmem:[%s15132_s8 + $0x5b4] ss:$48 sps:$4 sm:$0xff]   ;;  %v11263_v35 = vld [vmem:[%s15132_s8 + $0x5b0] ss:$48 sps:$4 sm:$0xff]  }
 0x685   : > { %8507 = vmatprep.subr.bf16.mxu0 %v11223_v36  ;;  %v11268_v36 = vld [vmem:[%s15132_s8 + $0x614] ss:$48 sps:$4 sm:$0xff]  }
 0x687   : > { %8180 = vmatpush1.bf16.msra.mxu1 %v11182_v37  ;;  %v11266_v37 = vld [vmem:[%s15132_s8 + $0x610] ss:$48 sps:$4 sm:$0xff]  }
 0x688   : > { %8181 = vmatprep.subr.bf16.mxu1 %v11190_v40  ;;  %8508 = vmatpush1.bf16.msra.mxu0 %v11221_v41  ;;  %v11271_v40 = vld [vmem:[%s15132_s8 + $0x674] ss:$48 sps:$4 sm:$0xff]   ;;  %v11269_v41 = vld [vmem:[%s15132_s8 + $0x670] ss:$48 sps:$4 sm:$0xff]  }
 0x689   : > { %8509 = vmatprep.subr.bf16.mxu0 %v11229_v42  ;;  %v11274_v42 = vld [vmem:[%s15132_s8 + $0x6d4] ss:$48 sps:$4 sm:$0xff]  }
 0x68b   : > { %8182 = vmatpush1.bf16.msra.mxu1 %v11188_v38  ;;  %v11272_v38 = vld [vmem:[%s15132_s8 + $0x6d0] ss:$48 sps:$4 sm:$0xff]  }
 0x68c   : > { %8183 = vmatprep.subr.bf16.mxu1 %v11196_v49  ;;  %8510 = vmatpush1.bf16.msra.mxu0 %v11227_v50  ;;  %v11277_v49 = vld [vmem:[%s15132_s8 + $0x734] ss:$48 sps:$4 sm:$0xff]  }
 0x68d   : > { %8511 = vmatprep.subr.bf16.mxu0 %v11235_v56  ;;  %v14757_v50 = vld [vmem:[%s15133_s9] sm:$0xff] }
 0x68e   : > { %v11275_v56 = vld [vmem:[%s15132_s8 + $0x730] ss:$48 sps:$4 sm:$0xff]  }
 0x68f   : > { %8184 = vmatpush1.bf16.msra.mxu1 %v11194_v57  ;;  %v5593_v57 = vrot.slane %v14757_v50, %v11974_v8 }
 0x690   : > { %8194 = vmatprep.subr.bf16.mxu1 %v11202_v18  ;;  %8512 = vmatpush1.bf16.msra.mxu0 %v11233_v25  ;;  %v11280_v18 = vld [vmem:[%s15132_s8 + $0x794] ss:$48 sps:$4 sm:$0xff]   ;;  %v5597_v25 = vrot.slane %v14757_v50, %v11855_v47 }
 0x692   : > { %8186 = vmatmul.mubr.bf16.vlgmr.msra.gmra.mrb[4].mxu1 %v14232_v60 }
 0x693   : > { %8195 = vmatpush1.bf16.msra.mxu1 %v11200_v61  ;;  %8514 = vmatmul.mubr.bf16.vlgmr.msra.gmra.mrb[36].mxu0 %v14232_v60  ;;  %v14772_v61 = vld [vmem:[%s15134_s10] sm:$0xff] }
 0x694   : > { %8196 = vmatprep.subr.bf16.mxu1 %v11208_v62  ;;  %8226 = vmatprep.mubr.bf16.mxu1 %v13816_v51  ;;  %v11278_v62 = vld [vmem:[%s15132_s8 + $0x790] ss:$48 sps:$4 sm:$0xff]  }
 0x697   : > { %8197 = vmatpush1.bf16.msra.mxu1 %v11206_v26  ;;  %v10013_v26 = vadd.f32 %v13665_v52, %v5593_v57  ;;  %v11286_v52 = vld [vmem:[%s15132_s8 + $0x854] ss:$48 sps:$4 sm:$0xff]  }
 0x698   : > { %8198 = vmatprep.subr.bf16.mxu1 %v11214_v2  ;;  %v7973_v2 = vrot.slane %v14772_v61, %v11974_v8 }
 0x69b   : > { %8199 = vmatpush1.bf16.msra.mxu1 %v11212_v4  ;;  %v11283_v4 = vld [vmem:[%s15132_s8 + $0x7f4] ss:$48 sps:$4 sm:$0xff]  }
 0x69c   : > { %8200 = vmatprep.subr.bf16.mxu1 %v11220_v5  ;;  %v10017_v5 = vadd.f32 %v13668_v54, %v5597_v25 }
 0x69f   : > { %8201 = vmatpush1.bf16.msra.mxu1 %v11218_v6  ;;  %v7977_v6 = vrot.slane %v14772_v61, %v11855_v47 }
 0x6a0   : > { %8202 = vmatprep.subr.bf16.mxu1 %v11226_v9  ;;  %v11281_v9 = vld [vmem:[%s15132_s8 + $0x7f0] ss:$48 sps:$4 sm:$0xff]  }
 0x6a3   : > { %8203 = vmatpush1.bf16.msra.mxu1 %v11224_v20  ;;  %v10014_v20 = vadd.f32 %v10013_v26, %v7973_v2 }
 0x6a4   : > { %8204 = vmatprep.subr.bf16.mxu1 %v11232_v10 }
 0x6a7   : > { %8205 = vmatpush1.bf16.msra.mxu1 %v11230_v11  ;;  %v10018_v11 = vadd.f32 %v10017_v5, %v7977_v6  ;;  %v11307_v5 = vld [vmem:[%s15132_s8 + $0xaf4] ss:$48 sps:$4 sm:$0xff]  }
 0x6a8   : > { %8206 = vmatprep.subr.bf16.mxu1 %v11238_v13 }
 0x6ab   : > { %8207 = vmatpush1.bf16.msra.mxu1 %v11236_v29 }
 0x6ac   : > { %8208 = vmatprep.subr.bf16.mxu1 %v11241_v17 }
 0x6af   : > { %8209 = vmatpush1.bf16.msra.mxu1 %v11239_v59 }
 0x6b0   : > { %8210 = vmatprep.subr.bf16.mxu1 %v11244_v19  ;;  %v11284_v19 = vld [vmem:[%s15132_s8 + $0x850] ss:$48 sps:$4 sm:$0xff]  }
 0x6b3   : > { %8211 = vmatpush1.bf16.msra.mxu1 %v11242_v23 }
 0x6b4   : > { %8212 = vmatprep.subr.bf16.mxu1 %v11247_v27 }
 0x6b7   : > { %8213 = vmatpush1.bf16.msra.mxu1 %v11245_v28 }
 0x6b8   : > { %8214 = vmatprep.subr.bf16.mxu1 %v11250_v7  ;;  %v11289_v7 = vld [vmem:[%s15132_s8 + $0x8b4] ss:$48 sps:$4 sm:$0xff]  }
 0x6bb   : > { %8215 = vmatpush1.bf16.msra.mxu1 %v11248_v31 }
 0x6bc   : > { %8216 = vmatprep.subr.bf16.mxu1 %v11253_v32 }
 0x6bf   : > { %8217 = vmatpush1.bf16.msra.mxu1 %v11251_v33 }
 0x6c0   : > { %8218 = vmatprep.subr.bf16.mxu1 %v11256_v15  ;;  %v11287_v15 = vld [vmem:[%s15132_s8 + $0x8b0] ss:$48 sps:$4 sm:$0xff]  }
 0x6c3   : > { %8219 = vmatpush1.bf16.msra.mxu1 %v11254_v45  ;;  %v11292_v45 = vld [vmem:[%s15132_s8 + $0x914] ss:$48 sps:$4 sm:$0xff]  }
 0x6c4   : > { %8220 = vmatprep.subr.bf16.mxu1 %v11259_v1  ;;  %v11290_v1 = vld [vmem:[%s15132_s8 + $0x910] ss:$48 sps:$4 sm:$0xff]  }
 0x6c7   : > { %8221 = vmatpush1.bf16.msra.mxu1 %v11257_v16  ;;  %v11295_v16 = vld [vmem:[%s15132_s8 + $0x974] ss:$48 sps:$4 sm:$0xff]  }
 0x6c8   : > { %8222 = vmatprep.subr.bf16.mxu1 %v11262_v58  ;;  %v11293_v58 = vld [vmem:[%s15132_s8 + $0x970] ss:$48 sps:$4 sm:$0xff]  }
 0x6cb   : > { %8223 = vmatpush1.bf16.msra.mxu1 %v11260_v34 }
 0x6cc   : > { %8224 = vmatprep.subr.bf16.mxu1 %v11265_v22  ;;  %v11298_v22 = vld [vmem:[%s15132_s8 + $0x9d4] ss:$48 sps:$4 sm:$0xff]  }
 0x6cf   : > { %8225 = vmatpush1.bf16.msra.mxu1 %v11263_v35 }
 0x6d0   : > { %8235 = vmatprep.subr.bf16.mxu1 %v11268_v36 }
 0x6d2   : > { %8227 = vmatmul.mubr.bf16.vlgmr.msra.gmra.mrb[8].mxu1 %v14018_v14 }
 0x6d3   : > { %8236 = vmatpush1.bf16.msra.mxu1 %v11266_v37  ;;  %8267 = vmatprep.mubr.bf16.mxu1 %v14034_v24 }
 0x6d4   : > { %8237 = vmatprep.subr.bf16.mxu1 %v11271_v40  ;;  %v11296_v40 = vld [vmem:[%s15132_s8 + $0x9d0] ss:$48 sps:$4 sm:$0xff]  }
 0x6d7   : > { %8238 = vmatpush1.bf16.msra.mxu1 %v11269_v41  ;;  %v14822_v41 = vld [vmem:[%s15134_s10 + $0x8] sm:$0xf] }
 0x6d8   : > { %8239 = vmatprep.subr.bf16.mxu1 %v11274_v42  ;;  %v11301_v42 = vld [vmem:[%s15132_s8 + $0xa34] ss:$48 sps:$4 sm:$0xff]   ;;  %v8009_v57 = vrot.slane %v14822_v41, %v11855_v47 }
 0x6db   : > { %8240 = vmatpush1.bf16.msra.mxu1 %v11272_v38  ;;  %v8005_v38 = vrot.slane %v14822_v41, %v11974_v8 }
 0x6dc   : > { %8241 = vmatprep.subr.bf16.mxu1 %v11277_v49  ;;  %v14832_v49 = vld [vmem:[%s15133_s9 + $0x8] sm:$0xf] }
 0x6dd   : > { %v5625_v25 = vrot.slane %v14832_v49, %v11974_v8  ;;  %v5629_v26 = vrot.slane %v14832_v49, %v11855_v47  ;;  %v11305_v47 = vld [vmem:[%s15132_s8 + $0xaf0] ss:$48 sps:$4 sm:$0xff]  }
 0x6df   : > { %8242 = vmatpush1.bf16.msra.mxu1 %v11275_v56  ;;  %v11299_v56 = vld [vmem:[%s15132_s8 + $0xa30] ss:$48 sps:$4 sm:$0xff]  }
 0x6e0   : > { %8243 = vmatprep.subr.bf16.mxu1 %v11280_v18  ;;  %v11304_v18 = vld [vmem:[%s15132_s8 + $0xa94] ss:$48 sps:$4 sm:$0xff]  }
 0x6e3   : > { %8244 = vmatpush1.bf16.msra.mxu1 %v11278_v62 }
 0x6e4   : > { %8245 = vmatprep.subr.bf16.mxu1 %v11283_v4  ;;  %v11302_v4 = vld [vmem:[%s15132_s8 + $0xa90] ss:$48 sps:$4 sm:$0xff]  }
 0x6e5   : > { %v8105_v10 = vpop.f32.mrb[20].mxu1 }
 0x6e6   : > { %v10015_v13 = vadd.f32 %v10014_v20, %v8105_v10  ;;  %v8107_v29 = vpop.f32.mrb[21].mxu1  ;;  %v8433_v17 = vpop.f32.mrb[32].mxu0  ;;  %v5658_v20 = vadd.f32 %v5625_v25, %v14101_v48  ;;  %v11308_v48 = vld [vmem:[%s15132_s8 + $0xb50] ss:$48 sps:$4 sm:$0xff]   ;;  %v11353_v25 = vld [vmem:[%s15132_s8 + $0x4f8] ss:$48 sps:$4 sm:$0xff]  }
 0x6e7   : > { %v10019_v54 = vadd.f32 %v10018_v11, %v8107_v29  ;;  %v8109_v59 = vpop.f32.mrb[22].mxu1  ;;  %8246 = vmatpush1.bf16.msra.mxu1 %v11281_v9  ;;  %v8435_v23 = vpop.f32.mrb[33].mxu0  ;;  %v10032_v62 = vadd.f32 %v8433_v17, %v8005_v38  ;;  %v11311_v17 = vld [vmem:[%s15132_s8 + $0xbb0] ss:$48 sps:$4 sm:$0xff]   ;;  %v11347_v38 = vld [vmem:[%s15132_s8 + $0x438] ss:$48 sps:$4 sm:$0xff]  }
 0x6e8   : > { %v9711_v27 = vmul.f32 -1.442695, %v10015_v13  ;;  %v8110_v28 = vpop.f32.mrb[23].mxu1  ;;  %8247 = vmatprep.subr.bf16.mxu1 %v11286_v52  ;;  %v8437_v31 = vpop.f32.mrb[34].mxu0  ;;  %v10033_v2 = vadd.f32 %v8435_v23, %v8009_v57  ;;  %v5659_v52 = vadd.f32 %v5629_v26, %v14107_v53  ;;  %v11310_v13 = vld [vmem:[%s15132_s8 + $0xb54] ss:$48 sps:$4 sm:$0xff]  }
 0x6e9   : > { %v9712_v32 = vmul.f32 -1.442695, %v10019_v54  ;;  %v8438_v33 = vpop.f32.mrb[35].mxu0  ;;  %v11313_v53 = vld [vmem:[%s15132_s8 + $0xbb4] ss:$48 sps:$4 sm:$0xff]  }
 0x6ea   : > { %11672 = vpow2.f32 %v9711_v27  ;;  %v11316_v54 = vld [vmem:[%s15132_s8 + $0x1c] ss:$48 sps:$4 sm:$0xff]   ;;  %v11314_v59 = vld [vmem:[%s15132_s8 + $0x18] ss:$48 sps:$4 sm:$0xff]  }
 0x6eb   : > { %11674 = vpow2.f32 %v9712_v32  ;;  %8248 = vmatpush1.bf16.msra.mxu1 %v11284_v19  ;;  %v11319_v19 = vld [vmem:[%s15132_s8 + $0x7c] ss:$48 sps:$4 sm:$0xff]   ;;  %v11317_v23 = vld [vmem:[%s15132_s8 + $0x78] ss:$48 sps:$4 sm:$0xff]  }
 0x6ec   : > { %8249 = vmatprep.subr.bf16.mxu1 %v11289_v7  ;;  %v11322_v27 = vld [vmem:[%s15132_s8 + $0xdc] ss:$48 sps:$4 sm:$0xff]   ;;  %v11320_v28 = vld [vmem:[%s15132_s8 + $0xd8] ss:$48 sps:$4 sm:$0xff]  }
 0x6ed   : > { %v11325_v7 = vld [vmem:[%s15132_s8 + $0x13c] ss:$48 sps:$4 sm:$0xff]   ;;  %v11326_v32 = vld [vmem:[%s15132_s8 + $0x198] ss:$48 sps:$4 sm:$0xff]  }
 0x6ee   : > { %v11328_v31 = vld [vmem:[%s15132_s8 + $0x19c] ss:$48 sps:$4 sm:$0xff]   ;;  %v11350_v57 = vld [vmem:[%s15132_s8 + $0x498] ss:$48 sps:$4 sm:$0xff]  }
 0x6ef   : > { %8250 = vmatpush1.bf16.msra.mxu1 %v11287_v15  ;;  %v11331_v33 = vld [vmem:[%s15132_s8 + $0x1fc] ss:$48 sps:$4 sm:$0xff]   ;;  %v11329_v15 = vld [vmem:[%s15132_s8 + $0x1f8] ss:$48 sps:$4 sm:$0xff]  }
 0x6f0   : > { %8251 = vmatprep.subr.bf16.mxu1 %v11292_v45  ;;  %v11334_v45 = vld [vmem:[%s15132_s8 + $0x25c] ss:$48 sps:$4 sm:$0xff]   ;;  %v11356_v26 = vld [vmem:[%s15132_s8 + $0x558] ss:$48 sps:$4 sm:$0xff]  }
 0x6f3   : > { %8252 = vmatpush1.bf16.msra.mxu1 %v11290_v1  ;;  %v11332_v1 = vld [vmem:[%s15132_s8 + $0x258] ss:$48 sps:$4 sm:$0xff]  }
 0x6f4   : > { %v11673_v34 = vpop.eup %11672  ;;  %8253 = vmatprep.subr.bf16.mxu1 %v11295_v16  ;;  %v11337_v16 = vld [vmem:[%s15132_s8 + $0x2bc] ss:$48 sps:$4 sm:$0xff]  }
 0x6f5   : > { %v11675_v35 = vpop.eup %11674  ;;  %v8538_v36 = vadd.f32 1.0, %v11673_v34  ;;  %v11340_v34 = vld [vmem:[%s15132_s8 + $0x31c] ss:$48 sps:$4 sm:$0xff]  }
 0x6f6   : > { %v8539_v37 = vadd.f32 1.0, %v11675_v35  ;;  %v11343_v35 = vld [vmem:[%s15132_s8 + $0x37c] ss:$48 sps:$4 sm:$0xff]  }
 0x6f7   : > { %11676 = vrcp.f32 %v8538_v36  ;;  %8254 = vmatpush1.bf16.msra.mxu1 %v11293_v58  ;;  %v11335_v58 = vld [vmem:[%s15132_s8 + $0x2b8] ss:$48 sps:$4 sm:$0xff]  }
 0x6f8   : > { %11678 = vrcp.f32 %v8539_v37  ;;  %8255 = vmatprep.subr.bf16.mxu1 %v11298_v22  ;;  %v11338_v22 = vld [vmem:[%s15132_s8 + $0x318] ss:$48 sps:$4 sm:$0xff]   ;;  %v11346_v37 = vld [vmem:[%s15132_s8 + $0x3dc] ss:$48 sps:$4 sm:$0xff]  }
 0x6f9   : > { %v11341_v36 = vld [vmem:[%s15132_s8 + $0x378] ss:$48 sps:$4 sm:$0xff]  }
 0x6fb   : > { %8256 = vmatpush1.bf16.msra.mxu1 %v11296_v40  ;;  %v11344_v40 = vld [vmem:[%s15132_s8 + $0x3d8] ss:$48 sps:$4 sm:$0xff]  }
 0x6fc   : > { %8257 = vmatprep.subr.bf16.mxu1 %v11301_v42  ;;  %v11349_v42 = vld [vmem:[%s15132_s8 + $0x43c] ss:$48 sps:$4 sm:$0xff]  }
 0x6ff   : > { %8258 = vmatpush1.bf16.msra.mxu1 %v11299_v56  ;;  %v11352_v56 = vld [vmem:[%s15132_s8 + $0x49c] ss:$48 sps:$4 sm:$0xff]  }
 0x700   : > { %8259 = vmatprep.subr.bf16.mxu1 %v11304_v18  ;;  %v11355_v18 = vld [vmem:[%s15132_s8 + $0x4fc] ss:$48 sps:$4 sm:$0xff]  }
 0x701   : > { %v11677_v6 = vpop.eup %11676 }
 0x702   : > { %v11679_v9 = vpop.eup %11678  ;;  %v8578_v8 = vmul.f32 %v11677_v6, %v10032_v62  ;;  %v11358_v62 = vld [vmem:[%s15132_s8 + $0x55c] ss:$48 sps:$4 sm:$0xff]   ;;  %v11362_v6 = vld [vmem:[%s15132_s8 + $0x618] ss:$48 sps:$4 sm:$0xff]  }
 0x703   : > { %v8579_v10 = vmul.f32 %v11679_v9, %v10033_v2  ;;  %8260 = vmatpush1.bf16.msra.mxu1 %v11302_v4  ;;  %v11361_v2 = vld [vmem:[%s15132_s8 + $0x5bc] ss:$48 sps:$4 sm:$0xff]   ;;  %v11359_v4 = vld [vmem:[%s15132_s8 + $0x5b8] ss:$48 sps:$4 sm:$0xff]  }
 0x704   : > { %v14857_v11 = vadd.f32 %v8578_v8, %v5658_v20  ;;  %8261 = vmatprep.subr.bf16.mxu1 %v11307_v5  ;;  %v11364_v5 = vld [vmem:[%s15132_s8 + $0x61c] ss:$48 sps:$4 sm:$0xff]   ;;  %v11365_v20 = vld [vmem:[%s15132_s8 + $0x678] ss:$48 sps:$4 sm:$0xff]  }
 0x705   : > { %v14862_v29 = vadd.f32 %v8579_v10, %v5659_v52  ;;  %v11367_v9 = vld [vmem:[%s15132_s8 + $0x67c] ss:$48 sps:$4 sm:$0xff]   ;;  %v11368_v52 = vld [vmem:[%s15132_s8 + $0x6d8] ss:$48 sps:$4 sm:$0xff]  }
 0x706   : > { %v11370_v8 = vld [vmem:[%s15132_s8 + $0x6dc] ss:$48 sps:$4 sm:$0xff]  }
 0x707   : > { %8262 = vmatpush1.bf16.msra.mxu1 %v11305_v47  ;;  %v11376_v10 = vld [vmem:[%s15132_s8 + $0x79c] ss:$48 sps:$4 sm:$0xff]   ;;  %v5601_v47 = vrot.slane %v14757_v50, %v12033_v55 }
 0x708   : > { %8263 = vmatprep.subr.bf16.mxu1 %v11310_v13  ;;  %v7981_v13 = vrot.slane %v14772_v61, %v12033_v55 }
 0x70b   : > { %8264 = vmatpush1.bf16.msra.mxu1 %v11308_v48  ;;  %v11374_v48 = vld [vmem:[%s15132_s8 + $0x798] ss:$48 sps:$4 sm:$0xff]  }
 0x70c   : > { %8265 = vmatprep.subr.bf16.mxu1 %v11313_v53  ;;  %v5605_v53 = vrot.slane %v14757_v50, %v11978_v12 }
 0x70f   : > { %8266 = vmatpush1.bf16.msra.mxu1 %v11311_v17  ;;  %v7985_v17 = vrot.slane %v14772_v61, %v11978_v12 }
 0x710   : > { %8276 = vmatprep.subr.bf16.mxu1 %v11316_v54  ;;  %v11379_v54 = vld [vmem:[%s15132_s8 + $0x7fc] ss:$48 sps:$4 sm:$0xff]  }
 0x712   : > { %8268 = vmatmul.mubr.bf16.vlgmr.msra.gmra.mrb[8].mxu1 %v14232_v60 }
 0x713   : > { %8277 = vmatpush1.bf16.msra.mxu1 %v11314_v59  ;;  %8308 = vmatprep.mubr.bf16.mxu1 %v13816_v51  ;;  %v11323_v51 = vld [vmem:[%s15132_s8 + $0x138] ss:$48 sps:$4 sm:$0xff]   ;;  %v10020_v59 = vadd.f32 %v7981_v13, %v5601_v47 }
 0x714   : > { %8278 = vmatprep.subr.bf16.mxu1 %v11319_v19  ;;  %v10022_v19 = vadd.f32 %v7985_v17, %v5605_v53  ;;  %v11406_v17 = vld [vmem:[%s15132_s8 + $0xb5c] ss:$48 sps:$4 sm:$0xff]  }
 0x717   : > { %8279 = vmatpush1.bf16.msra.mxu1 %v11317_v23  ;;  %v11377_v23 = vld [vmem:[%s15132_s8 + $0x7f8] ss:$48 sps:$4 sm:$0xff]  }
 0x718   : > { %8280 = vmatprep.subr.bf16.mxu1 %v11322_v27  ;;  %v11382_v27 = vld [vmem:[%s15132_s8 + $0x85c] ss:$48 sps:$4 sm:$0xff]  }
 0x71b   : > { %8281 = vmatpush1.bf16.msra.mxu1 %v11320_v28 }
 0x71c   : > { %8282 = vmatprep.subr.bf16.mxu1 %v11325_v7 }
 0x71f   : > { %8283 = vmatpush1.bf16.msra.mxu1 %v11323_v51 }
 0x720   : > { %8284 = vmatprep.subr.bf16.mxu1 %v11328_v31 }
 0x723   : > { %8285 = vmatpush1.bf16.msra.mxu1 %v11326_v32 }
 0x724   : > { %8286 = vmatprep.subr.bf16.mxu1 %v11331_v33 }
 0x727   : > { %8287 = vmatpush1.bf16.msra.mxu1 %v11329_v15  ;;  %v11380_v15 = vld [vmem:[%s15132_s8 + $0x858] ss:$48 sps:$4 sm:$0xff]  }
 0x728   : > { %8288 = vmatprep.subr.bf16.mxu1 %v11334_v45 }
 0x72b   : > { %8289 = vmatpush1.bf16.msra.mxu1 %v11332_v1 }
 0x72c   : > { %8290 = vmatprep.subr.bf16.mxu1 %v11337_v16 }
 0x72f   : > { %8291 = vmatpush1.bf16.msra.mxu1 %v11335_v58  ;;  %v11385_v58 = vld [vmem:[%s15132_s8 + $0x8bc] ss:$48 sps:$4 sm:$0xff]  }
 0x730   : > { %8292 = vmatprep.subr.bf16.mxu1 %v11340_v34 }
 0x733   : > { %8293 = vmatpush1.bf16.msra.mxu1 %v11338_v22 }
 0x734   : > { %8294 = vmatprep.subr.bf16.mxu1 %v11343_v35 }
 0x737   : > { %8295 = vmatpush1.bf16.msra.mxu1 %v11341_v36  ;;  %v11383_v36 = vld [vmem:[%s15132_s8 + $0x8b8] ss:$48 sps:$4 sm:$0xff]  }
 0x738   : > { %8296 = vmatprep.subr.bf16.mxu1 %v11346_v37  ;;  %v11388_v37 = vld [vmem:[%s15132_s8 + $0x91c] ss:$48 sps:$4 sm:$0xff]  }
 0x73b   : > { %8297 = vmatpush1.bf16.msra.mxu1 %v11344_v40  ;;  %v11386_v40 = vld [vmem:[%s15132_s8 + $0x918] ss:$48 sps:$4 sm:$0xff]  }
 0x73c   : > { %8298 = vmatprep.subr.bf16.mxu1 %v11349_v42  ;;  %v11391_v42 = vld [vmem:[%s15132_s8 + $0x97c] ss:$48 sps:$4 sm:$0xff]  }
 0x73f   : > { %8299 = vmatpush1.bf16.msra.mxu1 %v11347_v38  ;;  %v11389_v38 = vld [vmem:[%s15132_s8 + $0x978] ss:$48 sps:$4 sm:$0xff]  }
 0x740   : > { %8300 = vmatprep.subr.bf16.mxu1 %v11352_v56 }
 0x743   : > { %8301 = vmatpush1.bf16.msra.mxu1 %v11350_v57  ;;  %v11394_v57 = vld [vmem:[%s15132_s8 + $0x9dc] ss:$48 sps:$4 sm:$0xff]  }
 0x744   : > { %8302 = vmatprep.subr.bf16.mxu1 %v11355_v18 }
 0x747   : > { %8303 = vmatpush1.bf16.msra.mxu1 %v11353_v25 }
 0x748   : > { %8304 = vmatprep.subr.bf16.mxu1 %v11358_v62 }
 0x74b   : > { %8305 = vmatpush1.bf16.msra.mxu1 %v11356_v26  ;;  %v11392_v26 = vld [vmem:[%s15132_s8 + $0x9d8] ss:$48 sps:$4 sm:$0xff]  }
 0x74c   : > { %8306 = vmatprep.subr.bf16.mxu1 %v11361_v2  ;;  %v11397_v2 = vld [vmem:[%s15132_s8 + $0xa3c] ss:$48 sps:$4 sm:$0xff]  }
 0x74f   : > { %8307 = vmatpush1.bf16.msra.mxu1 %v11359_v4  ;;  %v8013_v4 = vrot.slane %v14822_v41, %v12033_v55 }
 0x750   : > { %8317 = vmatprep.subr.bf16.mxu1 %v11364_v5  ;;  %v11395_v5 = vld [vmem:[%s15132_s8 + $0xa38] ss:$48 sps:$4 sm:$0xff]  }
 0x752   : > { %8309 = vmatmul.mubr.bf16.vlgmr.msra.gmra.mrb[12].mxu1 %v14018_v14  ;;  %v11373_v14 = vld [vmem:[%s15132_s8 + $0x73c] ss:$48 sps:$4 sm:$0xff]  }
 0x753   : > { %8318 = vmatpush1.bf16.msra.mxu1 %v11362_v6  ;;  %8349 = vmatprep.mubr.bf16.mxu1 %v14034_v24  ;;  %v11371_v24 = vld [vmem:[%s15132_s8 + $0x738] ss:$48 sps:$4 sm:$0xff]   ;;  %v8017_v6 = vrot.slane %v14822_v41, %v11978_v12  ;;  %v11403_v41 = vld [vmem:[%s15132_s8 + $0xafc] ss:$48 sps:$4 sm:$0xff]  }
 0x754   : > { %8319 = vmatprep.subr.bf16.mxu1 %v11367_v9  ;;  %v11400_v9 = vld [vmem:[%s15132_s8 + $0xa9c] ss:$48 sps:$4 sm:$0xff]  }
 0x757   : > { %8320 = vmatpush1.bf16.msra.mxu1 %v11365_v20  ;;  %v5633_v20 = vrot.slane %v14832_v49, %v12033_v55 }
 0x758   : > { %8321 = vmatprep.subr.bf16.mxu1 %v11370_v8 }
 0x759   : > { %v5660_v13 = vadd.f32 %v5633_v20, %v14513_v21  ;;  %v11404_v21 = vld [vmem:[%s15132_s8 + $0xb58] ss:$48 sps:$4 sm:$0xff]  }
 0x75b   : > { %8322 = vmatpush1.bf16.msra.mxu1 %v11368_v52  ;;  %v5637_v52 = vrot.slane %v14832_v49, %v11978_v12  ;;  %v11401_v12 = vld [vmem:[%s15132_s8 + $0xaf8] ss:$48 sps:$4 sm:$0xff]  }
 0x75c   : > { %8323 = vmatprep.subr.bf16.mxu1 %v11373_v14 }
 0x75f   : > { %8324 = vmatpush1.bf16.msra.mxu1 %v11371_v24  ;;  %v11398_v24 = vld [vmem:[%s15132_s8 + $0xa98] ss:$48 sps:$4 sm:$0xff]  }
 0x760   : > { %8325 = vmatprep.subr.bf16.mxu1 %v11376_v10 }
 0x763   : > { %8326 = vmatpush1.bf16.msra.mxu1 %v11374_v48  ;;  %v5661_v48 = vadd.f32 %v5637_v52, %v14519_v63  ;;  %v11409_v63 = vld [vmem:[%s15132_s8 + $0xbbc] ss:$48 sps:$4 sm:$0xff]  }
 0x764   : > { %8327 = vmatprep.subr.bf16.mxu1 %v11379_v54 }
 0x765   : > { %v8187_v28 = vpop.f32.mrb[4].mxu1 }
 0x766   : > { %v10021_v7 = vadd.f32 %v10020_v59, %v8187_v28  ;;  %v8189_v51 = vpop.f32.mrb[5].mxu1  ;;  %v8515_v31 = vpop.f32.mrb[36].mxu0  ;;  %v11407_v59 = vld [vmem:[%s15132_s8 + $0xbb8] ss:$48 sps:$4 sm:$0xff]  }
 0x767   : > { %v10023_v32 = vadd.f32 %v10022_v19, %v8189_v51  ;;  %v8191_v33 = vpop.f32.mrb[6].mxu1  ;;  %8328 = vmatpush1.bf16.msra.mxu1 %v11377_v23  ;;  %v8517_v45 = vpop.f32.mrb[37].mxu0  ;;  %v10034_v8 = vadd.f32 %v8515_v31, %v8013_v4  ;;  %v5608_v19 = vsub.s32 4, %v11852_v46  ;;  %v5612_v23 = vsub.s32 5, %v11852_v46 }
 0x768   : > { %v9713_v1 = vmul.f32 -1.442695, %v10021_v7  ;;  %v8192_v16 = vpop.f32.mrb[7].mxu1  ;;  %8329 = vmatprep.subr.bf16.mxu1 %v11382_v27  ;;  %v8519_v34 = vpop.f32.mrb[38].mxu0  ;;  %v10035_v14 = vadd.f32 %v8517_v45, %v8017_v6 }
 0x769   : > { %v9714_v22 = vmul.f32 -1.442695, %v10023_v32  ;;  %v8520_v35 = vpop.f32.mrb[39].mxu0  ;;  %v5609_v27 = vrot.slane %v14757_v50, %v5608_v19  ;;  %v7989_v28 = vrot.slane %v14772_v61, %v5608_v19  ;;  %v5613_v7 = vrot.slane %v14757_v50, %v5612_v23 }
 0x76a   : > { %11680 = vpow2.f32 %v9713_v1  ;;  %v7993_v51 = vrot.slane %v14772_v61, %v5612_v23 }
 0x76b   : > { %11682 = vpow2.f32 %v9714_v22  ;;  %8330 = vmatpush1.bf16.msra.mxu1 %v11380_v15  ;;  %v10024_v31 = vadd.f32 %v7989_v28, %v5609_v27 }
 0x76c   : > { %8331 = vmatprep.subr.bf16.mxu1 %v11385_v58  ;;  %v10026_v32 = vadd.f32 %v7993_v51, %v5613_v7 }
 0x76f   : > { %8332 = vmatpush1.bf16.msra.mxu1 %v11383_v36 }
 0x770   : > { %8333 = vmatprep.subr.bf16.mxu1 %v11388_v37 }
 0x773   : > { %8334 = vmatpush1.bf16.msra.mxu1 %v11386_v40 }
 0x774   : > { %v11681_v56 = vpop.eup %11680  ;;  %8335 = vmatprep.subr.bf16.mxu1 %v11391_v42 }
 0x775   : > { %v11683_v18 = vpop.eup %11682  ;;  %v8540_v25 = vadd.f32 1.0, %v11681_v56 }
 0x776   : > { %v8541_v62 = vadd.f32 1.0, %v11683_v18 }
 0x777   : > { %11684 = vrcp.f32 %v8540_v25  ;;  %8336 = vmatpush1.bf16.msra.mxu1 %v11389_v38 }
 0x778   : > { %11686 = vrcp.f32 %v8541_v62  ;;  %8337 = vmatprep.subr.bf16.mxu1 %v11394_v57 }
 0x77b   : > { %8338 = vmatpush1.bf16.msra.mxu1 %v11392_v26 }
 0x77c   : > { %8339 = vmatprep.subr.bf16.mxu1 %v11397_v2 }
 0x77f   : > { %8340 = vmatpush1.bf16.msra.mxu1 %v11395_v5 }
 0x780   : > { %8341 = vmatprep.subr.bf16.mxu1 %v11400_v9  ;;  %v5616_v9 = vsub.s32 6, %v11852_v46 }
 0x781   : > { %v11685_v10 = vpop.eup %11684 }
 0x782   : > { %v11687_v47 = vpop.eup %11686  ;;  %v8580_v55 = vmul.f32 %v11685_v10, %v10034_v8  ;;  %v7997_v20 = vrot.slane %v14772_v61, %v5616_v9 }
 0x783   : > { %v8581_v53 = vmul.f32 %v11687_v47, %v10035_v14  ;;  %8342 = vmatpush1.bf16.msra.mxu1 %v11398_v24 }
 0x784   : > { %v15075_v49 = vadd.f32 %v8580_v55, %v5660_v13  ;;  %8343 = vmatprep.subr.bf16.mxu1 %v11403_v41 }
 0x785   : > { %v15080_v54 = vadd.f32 %v8581_v53, %v5661_v48 }
 0x787   : > { %8344 = vmatpush1.bf16.msra.mxu1 %v11401_v12 }
 0x788   : > { %8345 = vmatprep.subr.bf16.mxu1 %v11406_v17 }
 0x78b   : > { %8346 = vmatpush1.bf16.msra.mxu1 %v11404_v21 }
 0x78c   : > { %8347 = vmatprep.subr.bf16.mxu1 %v11409_v63 }
 0x78f   : > { %8348 = vmatpush1.bf16.msra.mxu1 %v11407_v59 }
 0x792   : > { %8350 = vmatmul.mubr.bf16.vlgmr.msra.gmra.mrb[12].mxu1 %v14232_v60 }
 0x7e5   : > { %v8269_v33 = vpop.f32.mrb[8].mxu1 }
 0x7e6   : > { %v10025_v15 = vadd.f32 %v10024_v31, %v8269_v33  ;;  %v8271_v45 = vpop.f32.mrb[9].mxu1 }
 0x7e7   : > { %v10027_v1 = vadd.f32 %v10026_v32, %v8271_v45  ;;  %v8273_v16 = vpop.f32.mrb[10].mxu1 }
 0x7e8   : > { %v9715_v60 = vmul.f32 -1.442695, %v10025_v15  ;;  %v8274_v58 = vpop.f32.mrb[11].mxu1 }
 0x7e9   : > { %v9716_v34 = vmul.f32 -1.442695, %v10027_v1 }
 0x7ea   : > { %11688 = vpow2.f32 %v9715_v60 }
 0x7eb   : > { %11690 = vpow2.f32 %v9716_v34 }
 0x7f4   : > { %v11689_v22 = vpop.eup %11688 }
 0x7f5   : > { %v11691_v35 = vpop.eup %11690  ;;  %v8566_v36 = vadd.f32 1.0, %v11689_v22 }
 0x7f6   : > { %v8567_v37 = vadd.f32 1.0, %v11691_v35 }
 0x7f7   : > { %11692 = vrcp.f32 %v8566_v36 }
 0x7f8   : > { %11694 = vrcp.f32 %v8567_v37 }
 0x7f9   : > { %11696 = vtanh.f32 %v14857_v11  ;;  %v5620_v11 = vsub.s32 7, %v11852_v46 }
 0x7fa   : > { %11698 = vtanh.f32 %v14862_v29  ;;  %v5617_v29 = vrot.slane %v14757_v50, %v5616_v9 }
 0x7fb   : > { %v5621_v8 = vrot.slane %v14757_v50, %v5620_v11  ;;  %v8001_v52 = vrot.slane %v14772_v61, %v5620_v11 }
 0x7fc   : > { %v10028_v14 = vadd.f32 %v7997_v20, %v5617_v29 }
 0x801   : > { %v11693_v40 = vpop.eup %11692 }
 0x802   : > { %v11695_v42 = vpop.eup %11694  ;;  %v8590_v38 = vsub.f32 1.0, %v11693_v40  ;;  %v8598_v62 = vmul.f32 %v11693_v40, %v13998_v3  ;;  %v10030_v3 = vadd.f32 %v8001_v52, %v5621_v8 }
 0x803   : > { %v11697_v56 = vpop.eup %11696  ;;  %v8591_v57 = vsub.f32 1.0, %v11695_v42  ;;  %v8599_v2 = vmul.f32 %v11695_v42, %v13800_v44 }
 0x804   : > { %v11699_v18 = vpop.eup %11698  ;;  %v8594_v25 = vmul.f32 %v11697_v56, %v8590_v38 }
 0x805   : > { %v8595_v26 = vmul.f32 %v11699_v18, %v8591_v57 }
 0x806   : > { %v8602_v4 = vadd.f32 %v8598_v62, %v8594_v25 }
 0x807   : > { %v8603_v5 = vadd.f32 %v8599_v2, %v8595_v26 }
 0x809   : > { %v8610_v6 = vcombine.low %v8602_v4, %v8603_v5 }
 0x865   : > { %v8351_v24 = vpop.f32.mrb[12].mxu1 }
 0x866   : > { %v10029_v41 = vadd.f32 %v10028_v14, %v8351_v24  ;;  %v8353_v44 = vpop.f32.mrb[13].mxu1 }
 0x867   : > { %v10031_v10 = vadd.f32 %v10030_v3, %v8353_v44  ;;  %v8355_v47 = vpop.f32.mrb[14].mxu1 }
 0x868   : > { %v9717_v13 = vmul.f32 -1.442695, %v10029_v41  ;;  %v8356_v55 = vpop.f32.mrb[15].mxu1 }
 0x869   : > { %v9718_v48 = vmul.f32 -1.442695, %v10031_v10 }
 0x86a   : > { %11700 = vpow2.f32 %v9717_v13 }
 0x86b   : > { %11702 = vpow2.f32 %v9718_v48 }
 0x874   : > { %v11701_v46 = vpop.eup %11700 }
 0x875   : > { %v11703_v53 = vpop.eup %11702  ;;  %v8568_v12 = vadd.f32 1.0, %v11701_v46 }
 0x876   : > { %v8569_v17 = vadd.f32 1.0, %v11703_v53 }
 0x877   : > { %11704 = vrcp.f32 %v8568_v12 }
 0x878   : > { %11706 = vrcp.f32 %v8569_v17 }
 0x879   : > { %11708 = vtanh.f32 %v15075_v49  ;;  %v8618_v49 = vrot.slane %v8610_v6, %v12395_v30 }
 0x87a   : > { %11710 = vtanh.f32 %v15080_v54 }
 0x881   : > { %v11705_v50 = vpop.eup %11704 }
 0x882   : > { %v11707_v61 = vpop.eup %11706  ;;  %v8592_v21 = vsub.f32 1.0, %v11705_v50  ;;  %v8600_v27 = vmul.f32 %v11705_v50, %v14216_v39 }
 0x883   : > { %v11709_v63 = vpop.eup %11708  ;;  %v8593_v59 = vsub.f32 1.0, %v11707_v61  ;;  %v8601_v7 = vmul.f32 %v11707_v61, %v14014_v0 }
 0x884   : > { %v11711_v19 = vpop.eup %11710  ;;  %v8596_v23 = vmul.f32 %v11709_v63, %v8592_v21 }
 0x885   : > { %v8597_v28 = vmul.f32 %v11711_v19, %v8593_v59 }
 0x886   : > { %v8604_v51 = vadd.f32 %v8600_v27, %v8596_v23 }
 0x887   : > { %v8605_v31 = vadd.f32 %v8601_v7, %v8597_v28 }
 0x889   : > { %v8611_v32 = vcombine.low %v8604_v51, %v8605_v31 }
 0x88b   : > { %v8625_v54 = vrot.slane %v8611_v32, %v12395_v30 }
 0x88d   : > { %v8626_v33 = vcombine.low %v8618_v49, %v8625_v54 }
 0x88f   : > { %v8633_v39 = vrot.slane %v8626_v33, %v12395_v30 }
 0x891   : > { %8637 = vst.msk [vmem:[%s493_s13] sm:$0xf] %vm8635_vm5, %v8633_v39 }
 0x892 PF: > { %s23_s21 = sadd.s32 1, %s11719_s21  }
 0x893   : > { %p20_p4 = scmp.ge.s32.totalorder %s23_s21, 4  }
 0x895   :  { %22 = sbr.rel (!%p20_p4) target bundleno = 1 (0x1), region = 118 }

</bundles_post_ra>
